<compile_context>
chip_gen: v5e
topology: v5e:2x2
jax: 0.10.0
libtpu: 0.0.40
codegen_flags: <defaults>
</compile_context>

<pallas_src>
import functools

import jax
import jax.numpy as jnp
from jax.experimental import pallas as pl
from jax.experimental.pallas import tpu as pltpu


# ----------------------------------------------------------------------------
# fused kernel
# ----------------------------------------------------------------------------
def graphgps_fused_kernel(
        x_ref, a_ref, p_ref,
        lin1_w_ref, gcn_w_ref,
        qkv_w_ref, qkv_b_ref, wout_ref,
        mlp_w1_ref, mlp_w2_ref, lin2_w_ref,
        vec_ref, linb_ref,
        o_ref,
        *, num_layers, num_heads, num_classes, eps=1e-5):
    f32 = jnp.float32
    x = x_ref[...]                     # (N, F)
    a = a_ref[...]                     # (N, N) normalized adjacency
    n = x.shape[0]
    inv_n = 1.0 / float(n)

    # Reduction helpers hoisted out of the layer loop: column/row sums are done
    # on the MXU (idle at these shapes) instead of the XLU.
    ones_row = jnp.ones((1, n), f32)   # BN column sums:  ones_row @ t
    ones_col = jnp.ones((n, 1), f32)   # softmax row sums: p @ ones_col

    def batchnorm(t, gamma, beta):
        # BatchNorm1d, training mode: batch statistics, biased variance.
        s1 = jnp.dot(ones_row, t, preferred_element_type=f32)        # (1, C)
        s2 = jnp.dot(ones_row, t * t, preferred_element_type=f32)    # (1, C)
        mean = s1 * inv_n
        var = s2 * inv_n - mean * mean
        scl = gamma * jax.lax.rsqrt(var + eps)
        return t * scl + (beta - mean * scl)      # single fused scale/shift pass

    linb = linb_ref[...]               # (2, C): row 0 = lin1_b, row 1 = lin2_b(padded)

    # ---- lin1 + ReLU ---------------------------------------------------------
    h = jnp.dot(x, lin1_w_ref[...], preferred_element_type=f32) + linb[0:1, :]
    h = jnp.maximum(h, 0.0)            # (N, C)

    c = h.shape[1]

    # ---- GPSConv layers (static Python loop; L is small) ---------------------
    for l in range(num_layers):
        slab = vec_ref[l]              # (9, 2C) packed per-layer vectors
        bout = slab[0:1, :c]
        mlp_b1 = slab[1:2, :]          # full 2C width
        mlp_b2 = slab[2:3, :c]
        bn1_g, bn1_b = slab[3:4, :c], slab[4:5, :c]
        bn2_g, bn2_b = slab[5:6, :c], slab[6:7, :c]
        bn3_g, bn3_b = slab[7:8, :c], slab[8:9, :c]

        # local message-passing branch: A_hat @ (h @ W) + h   (GCNConv, no bias)
        hw = jnp.dot(h, gcn_w_ref[l], preferred_element_type=f32)
        h1 = jnp.dot(a, hw, preferred_element_type=f32) + h
        h1 = batchnorm(h1, bn1_g, bn1_b)

        # global attention branch (batch=None in GPSConv -> attend over all nodes)
        # per-head weight matrices: no lane slicing of activations, no concat.
        h2 = h                          # carry the residual in the accumulator
        for hh in range(num_heads):
            iq = (l * 3 + 0) * num_heads + hh
            ik = (l * 3 + 1) * num_heads + hh
            iv = (l * 3 + 2) * num_heads + hh
            # 1/sqrt(d) already folded into Wq / bq at pack time.
            qh = jnp.dot(h, qkv_w_ref[iq], preferred_element_type=f32) + qkv_b_ref[iq]
            kh = jnp.dot(h, qkv_w_ref[ik], preferred_element_type=f32) + qkv_b_ref[ik]
            vh = jnp.dot(h, qkv_w_ref[iv], preferred_element_type=f32) + qkv_b_ref[iv]
            # scores via dot_general contracting last dims (no explicit transpose)
            s = jax.lax.dot_general(qh, kh, (((1,), (1,)), ((), ())),
                                    preferred_element_type=f32)       # (N, N)
            pexp = jnp.exp(s - jnp.max(s, axis=-1, keepdims=True))
            rsum = jnp.dot(pexp, ones_col, preferred_element_type=f32)  # (N,1) MXU
            oh = jnp.dot(pexp, vh, preferred_element_type=f32)          # (N, d)
            oh = oh * pl.reciprocal(rsum, approx=True)                  # EUP recip
            h2 = h2 + jnp.dot(oh, wout_ref[l * num_heads + hh],
                              preferred_element_type=f32)               # (N, C)
        h2 = batchnorm(h2 + bout, bn2_g, bn2_b)

        # combine + MLP (Linear -> ReLU -> Linear) + residual + BatchNorm
        out = h1 + h2
        hid = jnp.dot(out, mlp_w1_ref[l], preferred_element_type=f32) + mlp_b1
        hid = jnp.maximum(hid, 0.0)
        out = out + jnp.dot(hid, mlp_w2_ref[l], preferred_element_type=f32) + mlp_b2
        h = batchnorm(out, bn3_g, bn3_b)

    # ---- lin2 -> global_add_pool -> log_softmax ------------------------------
    lin2_b = linb[1:2, :num_classes]
    y = jnp.dot(h, lin2_w_ref[...], preferred_element_type=f32) + lin2_b
    pooled = jnp.dot(p_ref[...], y, preferred_element_type=f32)        # (G, classes)
    z = pooled - jnp.max(pooled, axis=-1, keepdims=True)
    o_ref[...] = z - jnp.log(jnp.sum(jnp.exp(z), axis=-1, keepdims=True))


# ----------------------------------------------------------------------------
# single pallas_call wrapper (whole arrays resident in VMEM, no grid)
# ----------------------------------------------------------------------------
def graphgps_forward(x, a_hat, pool, packed, *, num_heads):
    num_layers = packed["gcn_w"].shape[0]
    num_graphs = pool.shape[0]
    num_classes = packed["lin2_w"].shape[1]

    args = (
        x, a_hat, pool,
        packed["lin1_w"], packed["gcn_w"],
        packed["qkv_w"], packed["qkv_b"], packed["wout"],
        packed["mlp_w1"], packed["mlp_w2"], packed["lin2_w"],
        packed["vec_slab"], packed["lin_b"],
    )

    # VMEM budget from the actual footprint (inputs + a few live (N,*) buffers
    # and the per-head (N,N) score matrix), floor 16 MiB, ceiling 96 MiB.
    n = x.shape[0]
    c = packed["lin1_w"].shape[1]
    in_bytes = sum(int(a.size) * a.dtype.itemsize for a in args)
    act_bytes = 4 * (3 * n * n + 12 * n * 2 * c)
    vmem_limit = min(max(2 * (in_bytes + act_bytes) + (2 << 20), 16 << 20), 96 << 20)

    return pl.pallas_call(
        functools.partial(graphgps_fused_kernel,
                          num_layers=num_layers, num_heads=num_heads,
                          num_classes=num_classes),
        out_shape=jax.ShapeDtypeStruct((num_graphs, num_classes), jnp.float32),
        in_specs=[pl.BlockSpec(memory_space=pltpu.MemorySpace.VMEM)] * len(args),
        out_specs=pl.BlockSpec(memory_space=pltpu.MemorySpace.VMEM),
        compiler_params=pltpu.CompilerParams(vmem_limit_bytes=vmem_limit),
    )(*args)


# ----------------------------------------------------------------------------
# parameter construction + packing (done once, outside the kernel)
# ----------------------------------------------------------------------------
def init_params(key, num_features, hidden, num_classes, num_layers):
    ks = iter(jax.random.split(key, 32))

    def rnd(shape, scale=0.1):
        return (scale * jax.random.normal(next(ks), shape)).astype(jnp.float32)

    L, H = num_layers, hidden
    return {
        "lin1_w": rnd((num_features, H)),
        "lin1_b": rnd((1, H)),
        "lin2_w": rnd((H, num_classes)),
        "lin2_b": rnd((1, num_classes)),
        "gcn_w": rnd((L, H, H)),
        "wq": rnd((L, H, H)),
        "wk": rnd((L, H, H)),
        "wv": rnd((L, H, H)),
        "bq": rnd((L, 1, H)),
        "bk": rnd((L, 1, H)),
        "bv": rnd((L, 1, H)),
        "wout": rnd((L, H, H)),
        "bout": rnd((L, 1, H)),
        "mlp_w1": rnd((L, H, 2 * H)),
        "mlp_b1": rnd((L, 1, 2 * H)),
        "mlp_w2": rnd((L, 2 * H, H)),
        "mlp_b2": rnd((L, 1, H)),
        "bn1_g": jnp.ones((L, 1, H), jnp.float32),
        "bn1_b": jnp.zeros((L, 1, H), jnp.float32),
        "bn2_g": jnp.ones((L, 1, H), jnp.float32),
        "bn2_b": jnp.zeros((L, 1, H), jnp.float32),
        "bn3_g": jnp.ones((L, 1, H), jnp.float32),
        "bn3_b": jnp.zeros((L, 1, H), jnp.float32),
    }


def pack_params(params, *, num_heads):
    """Repack natural MHA/BN params into the lane-dense kernel layout.

    - per-head Q/K/V weight matrices (kills activation lane slicing in-kernel)
    - 1/sqrt(d) attention scale folded into Wq / bq
    - all small per-layer vectors in one (L, 9, 2C) slab, lin biases in (2, C)
    Mathematically identical forward pass to the unpacked formulation.
    """
    L, C, _ = params["gcn_w"].shape
    d = C // num_heads
    scale = 1.0 / (float(d) ** 0.5)
    classes = params["lin2_w"].shape[1]

    def split_w(w):                       # (L, C, C) -> (L, nh, C, d)
        return w.reshape(L, C, num_heads, d).transpose(0, 2, 1, 3)

    def split_b(b):                       # (L, 1, C) -> (L, nh, 1, d)
        return b.reshape(L, num_heads, 1, d)

    wq, wk, wv = split_w(params["wq"]) * scale, split_w(params["wk"]), split_w(params["wv"])
    bq, bk, bv = split_b(params["bq"]) * scale, split_b(params["bk"]), split_b(params["bv"])

    qkv_w = jnp.stack([wq, wk, wv], axis=1).reshape(L * 3 * num_heads, C, d)
    qkv_b = jnp.stack([bq, bk, bv], axis=1).reshape(L * 3 * num_heads, 1, d)
    wout = params["wout"].reshape(L * num_heads, d, C)

    def pad2c(v):                         # (L, 1, C) -> (L, 1, 2C)
        return jnp.pad(v, ((0, 0), (0, 0), (0, C)))

    vec_slab = jnp.concatenate([
        pad2c(params["bout"]),
        params["mlp_b1"],
        pad2c(params["mlp_b2"]),
        pad2c(params["bn1_g"]), pad2c(params["bn1_b"]),
        pad2c(params["bn2_g"]), pad2c(params["bn2_b"]),
        pad2c(params["bn3_g"]), pad2c(params["bn3_b"]),
    ], axis=1)                            # (L, 9, 2C)

    lin_b = jnp.concatenate([
        params["lin1_b"],
        jnp.pad(params["lin2_b"], ((0, 0), (0, C - classes))),
    ], axis=0)                            # (2, C)

    return {
        "lin1_w": params["lin1_w"],
        "gcn_w": params["gcn_w"],
        "qkv_w": qkv_w, "qkv_b": qkv_b, "wout": wout,
        "mlp_w1": params["mlp_w1"], "mlp_w2": params["mlp_w2"],
        "lin2_w": params["lin2_w"],
        "vec_slab": vec_slab, "lin_b": lin_b,
    }


def build_graph(num_nodes, nodes_per_graph):
    """Ring graphs (undirected), GCN symmetric normalization with self loops."""
    src, dst = [], []
    for start in range(0, num_nodes, nodes_per_graph):
        for i in range(nodes_per_graph):
            a = start + i
            b = start + (i + 1) % nodes_per_graph
            src += [a, b]
            dst += [b, a]
    adj = jnp.zeros((num_nodes, num_nodes), jnp.float32)
    adj = adj.at[jnp.array(src), jnp.array(dst)].set(1.0)
    adj = adj + jnp.eye(num_nodes, dtype=jnp.float32)          # add self loops
    deg = jnp.sum(adj, axis=1)
    d_inv_sqrt = 1.0 / jnp.sqrt(deg)
    a_hat = adj * d_inv_sqrt[:, None] * d_inv_sqrt[None, :]    # D^-1/2 (A+I) D^-1/2

    num_graphs = num_nodes // nodes_per_graph
    batch = jnp.repeat(jnp.arange(num_graphs), nodes_per_graph)
    pool = jax.nn.one_hot(batch, num_graphs, dtype=jnp.float32).T  # (G, N)
    return a_hat, pool


if __name__ == "__main__":
    # small shapes consistent with the module
    N = 16                # total nodes (2 graphs x 8 nodes)
    NUM_FEATURES = 8      # dataset.num_features
    HIDDEN = 32           # args.hidden2
    NUM_CLASSES = 4       # dataset.num_classes
    NUM_LAYERS = 2        # conv1 + 1 extra GPSConv
    HEADS = 4

    key = jax.random.PRNGKey(0)
    k_x, k_p = jax.random.split(key)
    x = jax.random.normal(k_x, (N, NUM_FEATURES), dtype=jnp.float32)
    a_hat, pool = build_graph(N, N // 2)
    params = init_params(k_p, NUM_FEATURES, HIDDEN, NUM_CLASSES, NUM_LAYERS)
    packed = pack_params(params, num_heads=HEADS)

    out = graphgps_forward(x, a_hat, pool, packed, num_heads=HEADS)
    out = jax.block_until_ready(out)
    assert out.shape == (2, NUM_CLASSES)
    assert bool(jnp.all(jnp.isfinite(out)))
    # log_softmax rows should (log-)sum to ~1
    assert bool(jnp.allclose(jnp.sum(jnp.exp(out), axis=-1), 1.0, atol=1e-4))
    print("KERNEL_OK")
</pallas_src>

<mosaic_0001>
module attributes {stable_mosaic.version = 11 : i64} {
  func.func @graphgps_fused_kernel(%arg0: memref<16x8xf32, #tpu.memory_space<vmem>>, %arg1: memref<16x16xf32, #tpu.memory_space<vmem>>, %arg2: memref<2x16xf32, #tpu.memory_space<vmem>>, %arg3: memref<8x32xf32, #tpu.memory_space<vmem>>, %arg4: memref<2x32x32xf32, #tpu.memory_space<vmem>>, %arg5: memref<24x32x8xf32, #tpu.memory_space<vmem>>, %arg6: memref<24x1x8xf32, #tpu.memory_space<vmem>>, %arg7: memref<8x8x32xf32, #tpu.memory_space<vmem>>, %arg8: memref<2x32x64xf32, #tpu.memory_space<vmem>>, %arg9: memref<2x64x32xf32, #tpu.memory_space<vmem>>, %arg10: memref<32x4xf32, #tpu.memory_space<vmem>>, %arg11: memref<2x9x64xf32, #tpu.memory_space<vmem>>, %arg12: memref<2x32xf32, #tpu.memory_space<vmem>>, %arg13: memref<2x4xf32, #tpu.memory_space<vmem>>) attributes {dimension_semantics = [], scalar_prefetch = 0 : i64, scratch_operands = 0 : i64, tpu.core_type = #tpu.core_type<tc>} {
    %c0 = arith.constant 0 : index
    %c0_0 = arith.constant 0 : index
    %0 = vector.load %arg0[%c0, %c0_0] : memref<16x8xf32, #tpu.memory_space<vmem>>, vector<16x8xf32>
    %c0_1 = arith.constant 0 : index
    %c0_2 = arith.constant 0 : index
    %1 = vector.load %arg1[%c0_1, %c0_2] : memref<16x16xf32, #tpu.memory_space<vmem>>, vector<16x16xf32>
    %cst = arith.constant 1.000000e+00 : f32
    %2 = vector.broadcast %cst : f32 to vector<1x16xf32>
    %cst_3 = arith.constant 1.000000e+00 : f32
    %3 = vector.broadcast %cst_3 : f32 to vector<16x1xf32>
    %c0_4 = arith.constant 0 : index
    %c0_5 = arith.constant 0 : index
    %4 = vector.load %arg12[%c0_4, %c0_5] : memref<2x32xf32, #tpu.memory_space<vmem>>, vector<2x32xf32>
    %c0_6 = arith.constant 0 : index
    %c0_7 = arith.constant 0 : index
    %5 = vector.load %arg3[%c0_6, %c0_7] : memref<8x32xf32, #tpu.memory_space<vmem>>, vector<8x32xf32>
    %cst_8 = arith.constant dense<0.000000e+00> : vector<16x32xf32>
    %6 = tpu.matmul %0, %5, %cst_8 {dimension_numbers = #tpu.dot_dimension_numbers<[1], [0], [0], [1], [0, 0, 1, 1], [], []>} : vector<16x8xf32>, vector<8x32xf32>, vector<16x32xf32> -> vector<16x32xf32>
    %7 = vector.extract_strided_slice %4 {offsets = [0, 0], sizes = [1, 32], strides = [1, 1]} : vector<2x32xf32> to vector<1x32xf32>
    %8 = vector.broadcast %7 : vector<1x32xf32> to vector<16x32xf32>
    %9 = arith.addf %6, %8 : vector<16x32xf32>
    %cst_9 = arith.constant 0.000000e+00 : f32
    %10 = vector.broadcast %cst_9 : f32 to vector<16x32xf32>
    %11 = arith.maximumf %9, %10 : vector<16x32xf32>
    %c0_10 = arith.constant 0 : index
    %c0_11 = arith.constant 0 : index
    %c0_12 = arith.constant 0 : index
    %12 = vector.load %arg11[%c0_10, %c0_11, %c0_12] : memref<2x9x64xf32, #tpu.memory_space<vmem>>, vector<1x9x64xf32>
    %13 = vector.shape_cast %12 : vector<1x9x64xf32> to vector<9x64xf32>
    %14 = vector.extract_strided_slice %13 {offsets = [0, 0], sizes = [1, 32], strides = [1, 1]} : vector<9x64xf32> to vector<1x32xf32>
    %15 = vector.extract_strided_slice %13 {offsets = [1, 0], sizes = [1, 64], strides = [1, 1]} : vector<9x64xf32> to vector<1x64xf32>
    %16 = vector.extract_strided_slice %13 {offsets = [2, 0], sizes = [1, 32], strides = [1, 1]} : vector<9x64xf32> to vector<1x32xf32>
    %17 = vector.extract_strided_slice %13 {offsets = [3, 0], sizes = [1, 32], strides = [1, 1]} : vector<9x64xf32> to vector<1x32xf32>
    %18 = vector.extract_strided_slice %13 {offsets = [4, 0], sizes = [1, 32], strides = [1, 1]} : vector<9x64xf32> to vector<1x32xf32>
    %19 = vector.extract_strided_slice %13 {offsets = [5, 0], sizes = [1, 32], strides = [1, 1]} : vector<9x64xf32> to vector<1x32xf32>
    %20 = vector.extract_strided_slice %13 {offsets = [6, 0], sizes = [1, 32], strides = [1, 1]} : vector<9x64xf32> to vector<1x32xf32>
    %21 = vector.extract_strided_slice %13 {offsets = [7, 0], sizes = [1, 32], strides = [1, 1]} : vector<9x64xf32> to vector<1x32xf32>
    %22 = vector.extract_strided_slice %13 {offsets = [8, 0], sizes = [1, 32], strides = [1, 1]} : vector<9x64xf32> to vector<1x32xf32>
    %c0_13 = arith.constant 0 : index
    %c0_14 = arith.constant 0 : index
    %c0_15 = arith.constant 0 : index
    %23 = vector.load %arg4[%c0_13, %c0_14, %c0_15] : memref<2x32x32xf32, #tpu.memory_space<vmem>>, vector<1x32x32xf32>
    %24 = vector.shape_cast %23 : vector<1x32x32xf32> to vector<32x32xf32>
    %cst_16 = arith.constant dense<0.000000e+00> : vector<16x32xf32>
    %25 = tpu.matmul %11, %24, %cst_16 {dimension_numbers = #tpu.dot_dimension_numbers<[1], [0], [0], [1], [0, 0, 1, 1], [], []>} : vector<16x32xf32>, vector<32x32xf32>, vector<16x32xf32> -> vector<16x32xf32>
    %cst_17 = arith.constant dense<0.000000e+00> : vector<16x32xf32>
    %26 = tpu.matmul %1, %25, %cst_17 {dimension_numbers = #tpu.dot_dimension_numbers<[1], [0], [0], [1], [0, 0, 1, 1], [], []>} : vector<16x16xf32>, vector<16x32xf32>, vector<16x32xf32> -> vector<16x32xf32>
    %27 = arith.addf %26, %11 : vector<16x32xf32>
    %cst_18 = arith.constant dense<0.000000e+00> : vector<1x32xf32>
    %28 = tpu.matmul %2, %27, %cst_18 {dimension_numbers = #tpu.dot_dimension_numbers<[1], [0], [0], [1], [0, 0, 1, 1], [], []>} : vector<1x16xf32>, vector<16x32xf32>, vector<1x32xf32> -> vector<1x32xf32>
    %29 = arith.mulf %27, %27 : vector<16x32xf32>
    %cst_19 = arith.constant dense<0.000000e+00> : vector<1x32xf32>
    %30 = tpu.matmul %2, %29, %cst_19 {dimension_numbers = #tpu.dot_dimension_numbers<[1], [0], [0], [1], [0, 0, 1, 1], [], []>} : vector<1x16xf32>, vector<16x32xf32>, vector<1x32xf32> -> vector<1x32xf32>
    %cst_20 = arith.constant 6.250000e-02 : f32
    %31 = vector.broadcast %cst_20 : f32 to vector<1x32xf32>
    %32 = arith.mulf %28, %31 : vector<1x32xf32>
    %cst_21 = arith.constant 6.250000e-02 : f32
    %33 = vector.broadcast %cst_21 : f32 to vector<1x32xf32>
    %34 = arith.mulf %30, %33 : vector<1x32xf32>
    %35 = arith.mulf %32, %32 : vector<1x32xf32>
    %36 = arith.subf %34, %35 : vector<1x32xf32>
    %cst_22 = arith.constant 9.99999974E-6 : f32
    %37 = vector.broadcast %cst_22 : f32 to vector<1x32xf32>
    %38 = arith.addf %36, %37 : vector<1x32xf32>
    %39 = math.rsqrt %38 : vector<1x32xf32>
    %40 = arith.mulf %17, %39 : vector<1x32xf32>
    %41 = vector.broadcast %40 : vector<1x32xf32> to vector<16x32xf32>
    %42 = arith.mulf %27, %41 : vector<16x32xf32>
    %43 = arith.mulf %32, %40 : vector<1x32xf32>
    %44 = arith.subf %18, %43 : vector<1x32xf32>
    %45 = vector.broadcast %44 : vector<1x32xf32> to vector<16x32xf32>
    %46 = arith.addf %42, %45 : vector<16x32xf32>
    %c0_23 = arith.constant 0 : index
    %c0_24 = arith.constant 0 : index
    %c0_25 = arith.constant 0 : index
    %47 = vector.load %arg5[%c0_23, %c0_24, %c0_25] : memref<24x32x8xf32, #tpu.memory_space<vmem>>, vector<1x32x8xf32>
    %48 = vector.shape_cast %47 : vector<1x32x8xf32> to vector<32x8xf32>
    %cst_26 = arith.constant dense<0.000000e+00> : vector<16x8xf32>
    %49 = tpu.matmul %11, %48, %cst_26 {dimension_numbers = #tpu.dot_dimension_numbers<[1], [0], [0], [1], [0, 0, 1, 1], [], []>} : vector<16x32xf32>, vector<32x8xf32>, vector<16x8xf32> -> vector<16x8xf32>
    %c0_27 = arith.constant 0 : index
    %c0_28 = arith.constant 0 : index
    %c0_29 = arith.constant 0 : index
    %50 = vector.load %arg6[%c0_27, %c0_28, %c0_29] : memref<24x1x8xf32, #tpu.memory_space<vmem>>, vector<1x1x8xf32>
    %51 = vector.shape_cast %50 : vector<1x1x8xf32> to vector<1x8xf32>
    %52 = vector.broadcast %51 : vector<1x8xf32> to vector<16x8xf32>
    %53 = arith.addf %49, %52 : vector<16x8xf32>
    %c4 = arith.constant 4 : index
    %c0_30 = arith.constant 0 : index
    %c0_31 = arith.constant 0 : index
    %54 = vector.load %arg5[%c4, %c0_30, %c0_31] : memref<24x32x8xf32, #tpu.memory_space<vmem>>, vector<1x32x8xf32>
    %55 = vector.shape_cast %54 : vector<1x32x8xf32> to vector<32x8xf32>
    %cst_32 = arith.constant dense<0.000000e+00> : vector<16x8xf32>
    %56 = tpu.matmul %11, %55, %cst_32 {dimension_numbers = #tpu.dot_dimension_numbers<[1], [0], [0], [1], [0, 0, 1, 1], [], []>} : vector<16x32xf32>, vector<32x8xf32>, vector<16x8xf32> -> vector<16x8xf32>
    %c4_33 = arith.constant 4 : index
    %c0_34 = arith.constant 0 : index
    %c0_35 = arith.constant 0 : index
    %57 = vector.load %arg6[%c4_33, %c0_34, %c0_35] : memref<24x1x8xf32, #tpu.memory_space<vmem>>, vector<1x1x8xf32>
    %58 = vector.shape_cast %57 : vector<1x1x8xf32> to vector<1x8xf32>
    %59 = vector.broadcast %58 : vector<1x8xf32> to vector<16x8xf32>
    %60 = arith.addf %56, %59 : vector<16x8xf32>
    %c8 = arith.constant 8 : index
    %c0_36 = arith.constant 0 : index
    %c0_37 = arith.constant 0 : index
    %61 = vector.load %arg5[%c8, %c0_36, %c0_37] : memref<24x32x8xf32, #tpu.memory_space<vmem>>, vector<1x32x8xf32>
    %62 = vector.shape_cast %61 : vector<1x32x8xf32> to vector<32x8xf32>
    %cst_38 = arith.constant dense<0.000000e+00> : vector<16x8xf32>
    %63 = tpu.matmul %11, %62, %cst_38 {dimension_numbers = #tpu.dot_dimension_numbers<[1], [0], [0], [1], [0, 0, 1, 1], [], []>} : vector<16x32xf32>, vector<32x8xf32>, vector<16x8xf32> -> vector<16x8xf32>
    %c8_39 = arith.constant 8 : index
    %c0_40 = arith.constant 0 : index
    %c0_41 = arith.constant 0 : index
    %64 = vector.load %arg6[%c8_39, %c0_40, %c0_41] : memref<24x1x8xf32, #tpu.memory_space<vmem>>, vector<1x1x8xf32>
    %65 = vector.shape_cast %64 : vector<1x1x8xf32> to vector<1x8xf32>
    %66 = vector.broadcast %65 : vector<1x8xf32> to vector<16x8xf32>
    %67 = arith.addf %63, %66 : vector<16x8xf32>
    %cst_42 = arith.constant dense<0.000000e+00> : vector<16x16xf32>
    %68 = tpu.matmul %53, %60, %cst_42 {dimension_numbers = #tpu.dot_dimension_numbers<[1], [1], [0], [0], [0, 0, 1, 0], [], []>} : vector<16x8xf32>, vector<16x8xf32>, vector<16x16xf32> -> vector<16x16xf32>
    %cst_43 = arith.constant dense<0xFF800000> : vector<16xf32>
    %69 = vector.multi_reduction <maximumf>, %68, %cst_43 [1] : vector<16x16xf32> to vector<16xf32>
    %70 = vector.shape_cast %69 : vector<16xf32> to vector<16x1xf32>
    %71 = vector.broadcast %70 : vector<16x1xf32> to vector<16x16xf32>
    %72 = arith.subf %68, %71 : vector<16x16xf32>
    %73 = math.exp %72 : vector<16x16xf32>
    %cst_44 = arith.constant dense<0.000000e+00> : vector<16x1xf32>
    %74 = tpu.matmul %73, %3, %cst_44 {dimension_numbers = #tpu.dot_dimension_numbers<[1], [0], [0], [1], [0, 0, 1, 1], [], []>} : vector<16x16xf32>, vector<16x1xf32>, vector<16x1xf32> -> vector<16x1xf32>
    %cst_45 = arith.constant dense<0.000000e+00> : vector<16x8xf32>
    %75 = tpu.matmul %73, %67, %cst_45 {dimension_numbers = #tpu.dot_dimension_numbers<[1], [0], [0], [1], [0, 0, 1, 1], [], []>} : vector<16x16xf32>, vector<16x8xf32>, vector<16x8xf32> -> vector<16x8xf32>
    %76 = tpu.reciprocal %74 {approx = true} : vector<16x1xf32> -> vector<16x1xf32>
    %77 = vector.broadcast %76 : vector<16x1xf32> to vector<16x8xf32>
    %78 = arith.mulf %75, %77 : vector<16x8xf32>
    %c0_46 = arith.constant 0 : index
    %c0_47 = arith.constant 0 : index
    %c0_48 = arith.constant 0 : index
    %79 = vector.load %arg7[%c0_46, %c0_47, %c0_48] : memref<8x8x32xf32, #tpu.memory_space<vmem>>, vector<1x8x32xf32>
    %80 = vector.shape_cast %79 : vector<1x8x32xf32> to vector<8x32xf32>
    %cst_49 = arith.constant dense<0.000000e+00> : vector<16x32xf32>
    %81 = tpu.matmul %78, %80, %cst_49 {dimension_numbers = #tpu.dot_dimension_numbers<[1], [0], [0], [1], [0, 0, 1, 1], [], []>} : vector<16x8xf32>, vector<8x32xf32>, vector<16x32xf32> -> vector<16x32xf32>
    %82 = arith.addf %11, %81 : vector<16x32xf32>
    %c1 = arith.constant 1 : index
    %c0_50 = arith.constant 0 : index
    %c0_51 = arith.constant 0 : index
    %83 = vector.load %arg5[%c1, %c0_50, %c0_51] : memref<24x32x8xf32, #tpu.memory_space<vmem>>, vector<1x32x8xf32>
    %84 = vector.shape_cast %83 : vector<1x32x8xf32> to vector<32x8xf32>
    %cst_52 = arith.constant dense<0.000000e+00> : vector<16x8xf32>
    %85 = tpu.matmul %11, %84, %cst_52 {dimension_numbers = #tpu.dot_dimension_numbers<[1], [0], [0], [1], [0, 0, 1, 1], [], []>} : vector<16x32xf32>, vector<32x8xf32>, vector<16x8xf32> -> vector<16x8xf32>
    %c1_53 = arith.constant 1 : index
    %c0_54 = arith.constant 0 : index
    %c0_55 = arith.constant 0 : index
    %86 = vector.load %arg6[%c1_53, %c0_54, %c0_55] : memref<24x1x8xf32, #tpu.memory_space<vmem>>, vector<1x1x8xf32>
    %87 = vector.shape_cast %86 : vector<1x1x8xf32> to vector<1x8xf32>
    %88 = vector.broadcast %87 : vector<1x8xf32> to vector<16x8xf32>
    %89 = arith.addf %85, %88 : vector<16x8xf32>
    %c5 = arith.constant 5 : index
    %c0_56 = arith.constant 0 : index
    %c0_57 = arith.constant 0 : index
    %90 = vector.load %arg5[%c5, %c0_56, %c0_57] : memref<24x32x8xf32, #tpu.memory_space<vmem>>, vector<1x32x8xf32>
    %91 = vector.shape_cast %90 : vector<1x32x8xf32> to vector<32x8xf32>
    %cst_58 = arith.constant dense<0.000000e+00> : vector<16x8xf32>
    %92 = tpu.matmul %11, %91, %cst_58 {dimension_numbers = #tpu.dot_dimension_numbers<[1], [0], [0], [1], [0, 0, 1, 1], [], []>} : vector<16x32xf32>, vector<32x8xf32>, vector<16x8xf32> -> vector<16x8xf32>
    %c5_59 = arith.constant 5 : index
    %c0_60 = arith.constant 0 : index
    %c0_61 = arith.constant 0 : index
    %93 = vector.load %arg6[%c5_59, %c0_60, %c0_61] : memref<24x1x8xf32, #tpu.memory_space<vmem>>, vector<1x1x8xf32>
    %94 = vector.shape_cast %93 : vector<1x1x8xf32> to vector<1x8xf32>
    %95 = vector.broadcast %94 : vector<1x8xf32> to vector<16x8xf32>
    %96 = arith.addf %92, %95 : vector<16x8xf32>
    %c9 = arith.constant 9 : index
    %c0_62 = arith.constant 0 : index
    %c0_63 = arith.constant 0 : index
    %97 = vector.load %arg5[%c9, %c0_62, %c0_63] : memref<24x32x8xf32, #tpu.memory_space<vmem>>, vector<1x32x8xf32>
    %98 = vector.shape_cast %97 : vector<1x32x8xf32> to vector<32x8xf32>
    %cst_64 = arith.constant dense<0.000000e+00> : vector<16x8xf32>
    %99 = tpu.matmul %11, %98, %cst_64 {dimension_numbers = #tpu.dot_dimension_numbers<[1], [0], [0], [1], [0, 0, 1, 1], [], []>} : vector<16x32xf32>, vector<32x8xf32>, vector<16x8xf32> -> vector<16x8xf32>
    %c9_65 = arith.constant 9 : index
    %c0_66 = arith.constant 0 : index
    %c0_67 = arith.constant 0 : index
    %100 = vector.load %arg6[%c9_65, %c0_66, %c0_67] : memref<24x1x8xf32, #tpu.memory_space<vmem>>, vector<1x1x8xf32>
    %101 = vector.shape_cast %100 : vector<1x1x8xf32> to vector<1x8xf32>
    %102 = vector.broadcast %101 : vector<1x8xf32> to vector<16x8xf32>
    %103 = arith.addf %99, %102 : vector<16x8xf32>
    %cst_68 = arith.constant dense<0.000000e+00> : vector<16x16xf32>
    %104 = tpu.matmul %89, %96, %cst_68 {dimension_numbers = #tpu.dot_dimension_numbers<[1], [1], [0], [0], [0, 0, 1, 0], [], []>} : vector<16x8xf32>, vector<16x8xf32>, vector<16x16xf32> -> vector<16x16xf32>
    %cst_69 = arith.constant dense<0xFF800000> : vector<16xf32>
    %105 = vector.multi_reduction <maximumf>, %104, %cst_69 [1] : vector<16x16xf32> to vector<16xf32>
    %106 = vector.shape_cast %105 : vector<16xf32> to vector<16x1xf32>
    %107 = vector.broadcast %106 : vector<16x1xf32> to vector<16x16xf32>
    %108 = arith.subf %104, %107 : vector<16x16xf32>
    %109 = math.exp %108 : vector<16x16xf32>
    %cst_70 = arith.constant dense<0.000000e+00> : vector<16x1xf32>
    %110 = tpu.matmul %109, %3, %cst_70 {dimension_numbers = #tpu.dot_dimension_numbers<[1], [0], [0], [1], [0, 0, 1, 1], [], []>} : vector<16x16xf32>, vector<16x1xf32>, vector<16x1xf32> -> vector<16x1xf32>
    %cst_71 = arith.constant dense<0.000000e+00> : vector<16x8xf32>
    %111 = tpu.matmul %109, %103, %cst_71 {dimension_numbers = #tpu.dot_dimension_numbers<[1], [0], [0], [1], [0, 0, 1, 1], [], []>} : vector<16x16xf32>, vector<16x8xf32>, vector<16x8xf32> -> vector<16x8xf32>
    %112 = tpu.reciprocal %110 {approx = true} : vector<16x1xf32> -> vector<16x1xf32>
    %113 = vector.broadcast %112 : vector<16x1xf32> to vector<16x8xf32>
    %114 = arith.mulf %111, %113 : vector<16x8xf32>
    %c1_72 = arith.constant 1 : index
    %c0_73 = arith.constant 0 : index
    %c0_74 = arith.constant 0 : index
    %115 = vector.load %arg7[%c1_72, %c0_73, %c0_74] : memref<8x8x32xf32, #tpu.memory_space<vmem>>, vector<1x8x32xf32>
    %116 = vector.shape_cast %115 : vector<1x8x32xf32> to vector<8x32xf32>
    %cst_75 = arith.constant dense<0.000000e+00> : vector<16x32xf32>
    %117 = tpu.matmul %114, %116, %cst_75 {dimension_numbers = #tpu.dot_dimension_numbers<[1], [0], [0], [1], [0, 0, 1, 1], [], []>} : vector<16x8xf32>, vector<8x32xf32>, vector<16x32xf32> -> vector<16x32xf32>
    %118 = arith.addf %82, %117 : vector<16x32xf32>
    %c2 = arith.constant 2 : index
    %c0_76 = arith.constant 0 : index
    %c0_77 = arith.constant 0 : index
    %119 = vector.load %arg5[%c2, %c0_76, %c0_77] : memref<24x32x8xf32, #tpu.memory_space<vmem>>, vector<1x32x8xf32>
    %120 = vector.shape_cast %119 : vector<1x32x8xf32> to vector<32x8xf32>
    %cst_78 = arith.constant dense<0.000000e+00> : vector<16x8xf32>
    %121 = tpu.matmul %11, %120, %cst_78 {dimension_numbers = #tpu.dot_dimension_numbers<[1], [0], [0], [1], [0, 0, 1, 1], [], []>} : vector<16x32xf32>, vector<32x8xf32>, vector<16x8xf32> -> vector<16x8xf32>
    %c2_79 = arith.constant 2 : index
    %c0_80 = arith.constant 0 : index
    %c0_81 = arith.constant 0 : index
    %122 = vector.load %arg6[%c2_79, %c0_80, %c0_81] : memref<24x1x8xf32, #tpu.memory_space<vmem>>, vector<1x1x8xf32>
    %123 = vector.shape_cast %122 : vector<1x1x8xf32> to vector<1x8xf32>
    %124 = vector.broadcast %123 : vector<1x8xf32> to vector<16x8xf32>
    %125 = arith.addf %121, %124 : vector<16x8xf32>
    %c6 = arith.constant 6 : index
    %c0_82 = arith.constant 0 : index
    %c0_83 = arith.constant 0 : index
    %126 = vector.load %arg5[%c6, %c0_82, %c0_83] : memref<24x32x8xf32, #tpu.memory_space<vmem>>, vector<1x32x8xf32>
    %127 = vector.shape_cast %126 : vector<1x32x8xf32> to vector<32x8xf32>
    %cst_84 = arith.constant dense<0.000000e+00> : vector<16x8xf32>
    %128 = tpu.matmul %11, %127, %cst_84 {dimension_numbers = #tpu.dot_dimension_numbers<[1], [0], [0], [1], [0, 0, 1, 1], [], []>} : vector<16x32xf32>, vector<32x8xf32>, vector<16x8xf32> -> vector<16x8xf32>
    %c6_85 = arith.constant 6 : index
    %c0_86 = arith.constant 0 : index
    %c0_87 = arith.constant 0 : index
    %129 = vector.load %arg6[%c6_85, %c0_86, %c0_87] : memref<24x1x8xf32, #tpu.memory_space<vmem>>, vector<1x1x8xf32>
    %130 = vector.shape_cast %129 : vector<1x1x8xf32> to vector<1x8xf32>
    %131 = vector.broadcast %130 : vector<1x8xf32> to vector<16x8xf32>
    %132 = arith.addf %128, %131 : vector<16x8xf32>
    %c10 = arith.constant 10 : index
    %c0_88 = arith.constant 0 : index
    %c0_89 = arith.constant 0 : index
    %133 = vector.load %arg5[%c10, %c0_88, %c0_89] : memref<24x32x8xf32, #tpu.memory_space<vmem>>, vector<1x32x8xf32>
    %134 = vector.shape_cast %133 : vector<1x32x8xf32> to vector<32x8xf32>
    %cst_90 = arith.constant dense<0.000000e+00> : vector<16x8xf32>
    %135 = tpu.matmul %11, %134, %cst_90 {dimension_numbers = #tpu.dot_dimension_numbers<[1], [0], [0], [1], [0, 0, 1, 1], [], []>} : vector<16x32xf32>, vector<32x8xf32>, vector<16x8xf32> -> vector<16x8xf32>
    %c10_91 = arith.constant 10 : index
    %c0_92 = arith.constant 0 : index
    %c0_93 = arith.constant 0 : index
    %136 = vector.load %arg6[%c10_91, %c0_92, %c0_93] : memref<24x1x8xf32, #tpu.memory_space<vmem>>, vector<1x1x8xf32>
    %137 = vector.shape_cast %136 : vector<1x1x8xf32> to vector<1x8xf32>
    %138 = vector.broadcast %137 : vector<1x8xf32> to vector<16x8xf32>
    %139 = arith.addf %135, %138 : vector<16x8xf32>
    %cst_94 = arith.constant dense<0.000000e+00> : vector<16x16xf32>
    %140 = tpu.matmul %125, %132, %cst_94 {dimension_numbers = #tpu.dot_dimension_numbers<[1], [1], [0], [0], [0, 0, 1, 0], [], []>} : vector<16x8xf32>, vector<16x8xf32>, vector<16x16xf32> -> vector<16x16xf32>
    %cst_95 = arith.constant dense<0xFF800000> : vector<16xf32>
    %141 = vector.multi_reduction <maximumf>, %140, %cst_95 [1] : vector<16x16xf32> to vector<16xf32>
    %142 = vector.shape_cast %141 : vector<16xf32> to vector<16x1xf32>
    %143 = vector.broadcast %142 : vector<16x1xf32> to vector<16x16xf32>
    %144 = arith.subf %140, %143 : vector<16x16xf32>
    %145 = math.exp %144 : vector<16x16xf32>
    %cst_96 = arith.constant dense<0.000000e+00> : vector<16x1xf32>
    %146 = tpu.matmul %145, %3, %cst_96 {dimension_numbers = #tpu.dot_dimension_numbers<[1], [0], [0], [1], [0, 0, 1, 1], [], []>} : vector<16x16xf32>, vector<16x1xf32>, vector<16x1xf32> -> vector<16x1xf32>
    %cst_97 = arith.constant dense<0.000000e+00> : vector<16x8xf32>
    %147 = tpu.matmul %145, %139, %cst_97 {dimension_numbers = #tpu.dot_dimension_numbers<[1], [0], [0], [1], [0, 0, 1, 1], [], []>} : vector<16x16xf32>, vector<16x8xf32>, vector<16x8xf32> -> vector<16x8xf32>
    %148 = tpu.reciprocal %146 {approx = true} : vector<16x1xf32> -> vector<16x1xf32>
    %149 = vector.broadcast %148 : vector<16x1xf32> to vector<16x8xf32>
    %150 = arith.mulf %147, %149 : vector<16x8xf32>
    %c2_98 = arith.constant 2 : index
    %c0_99 = arith.constant 0 : index
    %c0_100 = arith.constant 0 : index
    %151 = vector.load %arg7[%c2_98, %c0_99, %c0_100] : memref<8x8x32xf32, #tpu.memory_space<vmem>>, vector<1x8x32xf32>
    %152 = vector.shape_cast %151 : vector<1x8x32xf32> to vector<8x32xf32>
    %cst_101 = arith.constant dense<0.000000e+00> : vector<16x32xf32>
    %153 = tpu.matmul %150, %152, %cst_101 {dimension_numbers = #tpu.dot_dimension_numbers<[1], [0], [0], [1], [0, 0, 1, 1], [], []>} : vector<16x8xf32>, vector<8x32xf32>, vector<16x32xf32> -> vector<16x32xf32>
    %154 = arith.addf %118, %153 : vector<16x32xf32>
    %c3 = arith.constant 3 : index
    %c0_102 = arith.constant 0 : index
    %c0_103 = arith.constant 0 : index
    %155 = vector.load %arg5[%c3, %c0_102, %c0_103] : memref<24x32x8xf32, #tpu.memory_space<vmem>>, vector<1x32x8xf32>
    %156 = vector.shape_cast %155 : vector<1x32x8xf32> to vector<32x8xf32>
    %cst_104 = arith.constant dense<0.000000e+00> : vector<16x8xf32>
    %157 = tpu.matmul %11, %156, %cst_104 {dimension_numbers = #tpu.dot_dimension_numbers<[1], [0], [0], [1], [0, 0, 1, 1], [], []>} : vector<16x32xf32>, vector<32x8xf32>, vector<16x8xf32> -> vector<16x8xf32>
    %c3_105 = arith.constant 3 : index
    %c0_106 = arith.constant 0 : index
    %c0_107 = arith.constant 0 : index
    %158 = vector.load %arg6[%c3_105, %c0_106, %c0_107] : memref<24x1x8xf32, #tpu.memory_space<vmem>>, vector<1x1x8xf32>
    %159 = vector.shape_cast %158 : vector<1x1x8xf32> to vector<1x8xf32>
    %160 = vector.broadcast %159 : vector<1x8xf32> to vector<16x8xf32>
    %161 = arith.addf %157, %160 : vector<16x8xf32>
    %c7 = arith.constant 7 : index
    %c0_108 = arith.constant 0 : index
    %c0_109 = arith.constant 0 : index
    %162 = vector.load %arg5[%c7, %c0_108, %c0_109] : memref<24x32x8xf32, #tpu.memory_space<vmem>>, vector<1x32x8xf32>
    %163 = vector.shape_cast %162 : vector<1x32x8xf32> to vector<32x8xf32>
    %cst_110 = arith.constant dense<0.000000e+00> : vector<16x8xf32>
    %164 = tpu.matmul %11, %163, %cst_110 {dimension_numbers = #tpu.dot_dimension_numbers<[1], [0], [0], [1], [0, 0, 1, 1], [], []>} : vector<16x32xf32>, vector<32x8xf32>, vector<16x8xf32> -> vector<16x8xf32>
    %c7_111 = arith.constant 7 : index
    %c0_112 = arith.constant 0 : index
    %c0_113 = arith.constant 0 : index
    %165 = vector.load %arg6[%c7_111, %c0_112, %c0_113] : memref<24x1x8xf32, #tpu.memory_space<vmem>>, vector<1x1x8xf32>
    %166 = vector.shape_cast %165 : vector<1x1x8xf32> to vector<1x8xf32>
    %167 = vector.broadcast %166 : vector<1x8xf32> to vector<16x8xf32>
    %168 = arith.addf %164, %167 : vector<16x8xf32>
    %c11 = arith.constant 11 : index
    %c0_114 = arith.constant 0 : index
    %c0_115 = arith.constant 0 : index
    %169 = vector.load %arg5[%c11, %c0_114, %c0_115] : memref<24x32x8xf32, #tpu.memory_space<vmem>>, vector<1x32x8xf32>
    %170 = vector.shape_cast %169 : vector<1x32x8xf32> to vector<32x8xf32>
    %cst_116 = arith.constant dense<0.000000e+00> : vector<16x8xf32>
    %171 = tpu.matmul %11, %170, %cst_116 {dimension_numbers = #tpu.dot_dimension_numbers<[1], [0], [0], [1], [0, 0, 1, 1], [], []>} : vector<16x32xf32>, vector<32x8xf32>, vector<16x8xf32> -> vector<16x8xf32>
    %c11_117 = arith.constant 11 : index
    %c0_118 = arith.constant 0 : index
    %c0_119 = arith.constant 0 : index
    %172 = vector.load %arg6[%c11_117, %c0_118, %c0_119] : memref<24x1x8xf32, #tpu.memory_space<vmem>>, vector<1x1x8xf32>
    %173 = vector.shape_cast %172 : vector<1x1x8xf32> to vector<1x8xf32>
    %174 = vector.broadcast %173 : vector<1x8xf32> to vector<16x8xf32>
    %175 = arith.addf %171, %174 : vector<16x8xf32>
    %cst_120 = arith.constant dense<0.000000e+00> : vector<16x16xf32>
    %176 = tpu.matmul %161, %168, %cst_120 {dimension_numbers = #tpu.dot_dimension_numbers<[1], [1], [0], [0], [0, 0, 1, 0], [], []>} : vector<16x8xf32>, vector<16x8xf32>, vector<16x16xf32> -> vector<16x16xf32>
    %cst_121 = arith.constant dense<0xFF800000> : vector<16xf32>
    %177 = vector.multi_reduction <maximumf>, %176, %cst_121 [1] : vector<16x16xf32> to vector<16xf32>
    %178 = vector.shape_cast %177 : vector<16xf32> to vector<16x1xf32>
    %179 = vector.broadcast %178 : vector<16x1xf32> to vector<16x16xf32>
    %180 = arith.subf %176, %179 : vector<16x16xf32>
    %181 = math.exp %180 : vector<16x16xf32>
    %cst_122 = arith.constant dense<0.000000e+00> : vector<16x1xf32>
    %182 = tpu.matmul %181, %3, %cst_122 {dimension_numbers = #tpu.dot_dimension_numbers<[1], [0], [0], [1], [0, 0, 1, 1], [], []>} : vector<16x16xf32>, vector<16x1xf32>, vector<16x1xf32> -> vector<16x1xf32>
    %cst_123 = arith.constant dense<0.000000e+00> : vector<16x8xf32>
    %183 = tpu.matmul %181, %175, %cst_123 {dimension_numbers = #tpu.dot_dimension_numbers<[1], [0], [0], [1], [0, 0, 1, 1], [], []>} : vector<16x16xf32>, vector<16x8xf32>, vector<16x8xf32> -> vector<16x8xf32>
    %184 = tpu.reciprocal %182 {approx = true} : vector<16x1xf32> -> vector<16x1xf32>
    %185 = vector.broadcast %184 : vector<16x1xf32> to vector<16x8xf32>
    %186 = arith.mulf %183, %185 : vector<16x8xf32>
    %c3_124 = arith.constant 3 : index
    %c0_125 = arith.constant 0 : index
    %c0_126 = arith.constant 0 : index
    %187 = vector.load %arg7[%c3_124, %c0_125, %c0_126] : memref<8x8x32xf32, #tpu.memory_space<vmem>>, vector<1x8x32xf32>
    %188 = vector.shape_cast %187 : vector<1x8x32xf32> to vector<8x32xf32>
    %cst_127 = arith.constant dense<0.000000e+00> : vector<16x32xf32>
    %189 = tpu.matmul %186, %188, %cst_127 {dimension_numbers = #tpu.dot_dimension_numbers<[1], [0], [0], [1], [0, 0, 1, 1], [], []>} : vector<16x8xf32>, vector<8x32xf32>, vector<16x32xf32> -> vector<16x32xf32>
    %190 = arith.addf %154, %189 : vector<16x32xf32>
    %191 = vector.broadcast %14 : vector<1x32xf32> to vector<16x32xf32>
    %192 = arith.addf %190, %191 : vector<16x32xf32>
    %cst_128 = arith.constant dense<0.000000e+00> : vector<1x32xf32>
    %193 = tpu.matmul %2, %192, %cst_128 {dimension_numbers = #tpu.dot_dimension_numbers<[1], [0], [0], [1], [0, 0, 1, 1], [], []>} : vector<1x16xf32>, vector<16x32xf32>, vector<1x32xf32> -> vector<1x32xf32>
    %194 = arith.mulf %192, %192 : vector<16x32xf32>
    %cst_129 = arith.constant dense<0.000000e+00> : vector<1x32xf32>
    %195 = tpu.matmul %2, %194, %cst_129 {dimension_numbers = #tpu.dot_dimension_numbers<[1], [0], [0], [1], [0, 0, 1, 1], [], []>} : vector<1x16xf32>, vector<16x32xf32>, vector<1x32xf32> -> vector<1x32xf32>
    %cst_130 = arith.constant 6.250000e-02 : f32
    %196 = vector.broadcast %cst_130 : f32 to vector<1x32xf32>
    %197 = arith.mulf %193, %196 : vector<1x32xf32>
    %cst_131 = arith.constant 6.250000e-02 : f32
    %198 = vector.broadcast %cst_131 : f32 to vector<1x32xf32>
    %199 = arith.mulf %195, %198 : vector<1x32xf32>
    %200 = arith.mulf %197, %197 : vector<1x32xf32>
    %201 = arith.subf %199, %200 : vector<1x32xf32>
    %cst_132 = arith.constant 9.99999974E-6 : f32
    %202 = vector.broadcast %cst_132 : f32 to vector<1x32xf32>
    %203 = arith.addf %201, %202 : vector<1x32xf32>
    %204 = math.rsqrt %203 : vector<1x32xf32>
    %205 = arith.mulf %19, %204 : vector<1x32xf32>
    %206 = vector.broadcast %205 : vector<1x32xf32> to vector<16x32xf32>
    %207 = arith.mulf %192, %206 : vector<16x32xf32>
    %208 = arith.mulf %197, %205 : vector<1x32xf32>
    %209 = arith.subf %20, %208 : vector<1x32xf32>
    %210 = vector.broadcast %209 : vector<1x32xf32> to vector<16x32xf32>
    %211 = arith.addf %207, %210 : vector<16x32xf32>
    %212 = arith.addf %46, %211 : vector<16x32xf32>
    %c0_133 = arith.constant 0 : index
    %c0_134 = arith.constant 0 : index
    %c0_135 = arith.constant 0 : index
    %213 = vector.load %arg8[%c0_133, %c0_134, %c0_135] : memref<2x32x64xf32, #tpu.memory_space<vmem>>, vector<1x32x64xf32>
    %214 = vector.shape_cast %213 : vector<1x32x64xf32> to vector<32x64xf32>
    %cst_136 = arith.constant dense<0.000000e+00> : vector<16x64xf32>
    %215 = tpu.matmul %212, %214, %cst_136 {dimension_numbers = #tpu.dot_dimension_numbers<[1], [0], [0], [1], [0, 0, 1, 1], [], []>} : vector<16x32xf32>, vector<32x64xf32>, vector<16x64xf32> -> vector<16x64xf32>
    %216 = vector.broadcast %15 : vector<1x64xf32> to vector<16x64xf32>
    %217 = arith.addf %215, %216 : vector<16x64xf32>
    %cst_137 = arith.constant 0.000000e+00 : f32
    %218 = vector.broadcast %cst_137 : f32 to vector<16x64xf32>
    %219 = arith.maximumf %217, %218 : vector<16x64xf32>
    %c0_138 = arith.constant 0 : index
    %c0_139 = arith.constant 0 : index
    %c0_140 = arith.constant 0 : index
    %220 = vector.load %arg9[%c0_138, %c0_139, %c0_140] : memref<2x64x32xf32, #tpu.memory_space<vmem>>, vector<1x64x32xf32>
    %221 = vector.shape_cast %220 : vector<1x64x32xf32> to vector<64x32xf32>
    %cst_141 = arith.constant dense<0.000000e+00> : vector<16x32xf32>
    %222 = tpu.matmul %219, %221, %cst_141 {dimension_numbers = #tpu.dot_dimension_numbers<[1], [0], [0], [1], [0, 0, 1, 1], [], []>} : vector<16x64xf32>, vector<64x32xf32>, vector<16x32xf32> -> vector<16x32xf32>
    %223 = arith.addf %212, %222 : vector<16x32xf32>
    %224 = vector.broadcast %16 : vector<1x32xf32> to vector<16x32xf32>
    %225 = arith.addf %223, %224 : vector<16x32xf32>
    %cst_142 = arith.constant dense<0.000000e+00> : vector<1x32xf32>
    %226 = tpu.matmul %2, %225, %cst_142 {dimension_numbers = #tpu.dot_dimension_numbers<[1], [0], [0], [1], [0, 0, 1, 1], [], []>} : vector<1x16xf32>, vector<16x32xf32>, vector<1x32xf32> -> vector<1x32xf32>
    %227 = arith.mulf %225, %225 : vector<16x32xf32>
    %cst_143 = arith.constant dense<0.000000e+00> : vector<1x32xf32>
    %228 = tpu.matmul %2, %227, %cst_143 {dimension_numbers = #tpu.dot_dimension_numbers<[1], [0], [0], [1], [0, 0, 1, 1], [], []>} : vector<1x16xf32>, vector<16x32xf32>, vector<1x32xf32> -> vector<1x32xf32>
    %cst_144 = arith.constant 6.250000e-02 : f32
    %229 = vector.broadcast %cst_144 : f32 to vector<1x32xf32>
    %230 = arith.mulf %226, %229 : vector<1x32xf32>
    %cst_145 = arith.constant 6.250000e-02 : f32
    %231 = vector.broadcast %cst_145 : f32 to vector<1x32xf32>
    %232 = arith.mulf %228, %231 : vector<1x32xf32>
    %233 = arith.mulf %230, %230 : vector<1x32xf32>
    %234 = arith.subf %232, %233 : vector<1x32xf32>
    %cst_146 = arith.constant 9.99999974E-6 : f32
    %235 = vector.broadcast %cst_146 : f32 to vector<1x32xf32>
    %236 = arith.addf %234, %235 : vector<1x32xf32>
    %237 = math.rsqrt %236 : vector<1x32xf32>
    %238 = arith.mulf %21, %237 : vector<1x32xf32>
    %239 = vector.broadcast %238 : vector<1x32xf32> to vector<16x32xf32>
    %240 = arith.mulf %225, %239 : vector<16x32xf32>
    %241 = arith.mulf %230, %238 : vector<1x32xf32>
    %242 = arith.subf %22, %241 : vector<1x32xf32>
    %243 = vector.broadcast %242 : vector<1x32xf32> to vector<16x32xf32>
    %244 = arith.addf %240, %243 : vector<16x32xf32>
    %c1_147 = arith.constant 1 : index
    %c0_148 = arith.constant 0 : index
    %c0_149 = arith.constant 0 : index
    %245 = vector.load %arg11[%c1_147, %c0_148, %c0_149] : memref<2x9x64xf32, #tpu.memory_space<vmem>>, vector<1x9x64xf32>
    %246 = vector.shape_cast %245 : vector<1x9x64xf32> to vector<9x64xf32>
    %247 = vector.extract_strided_slice %246 {offsets = [0, 0], sizes = [1, 32], strides = [1, 1]} : vector<9x64xf32> to vector<1x32xf32>
    %248 = vector.extract_strided_slice %246 {offsets = [1, 0], sizes = [1, 64], strides = [1, 1]} : vector<9x64xf32> to vector<1x64xf32>
    %249 = vector.extract_strided_slice %246 {offsets = [2, 0], sizes = [1, 32], strides = [1, 1]} : vector<9x64xf32> to vector<1x32xf32>
    %250 = vector.extract_strided_slice %246 {offsets = [3, 0], sizes = [1, 32], strides = [1, 1]} : vector<9x64xf32> to vector<1x32xf32>
    %251 = vector.extract_strided_slice %246 {offsets = [4, 0], sizes = [1, 32], strides = [1, 1]} : vector<9x64xf32> to vector<1x32xf32>
    %252 = vector.extract_strided_slice %246 {offsets = [5, 0], sizes = [1, 32], strides = [1, 1]} : vector<9x64xf32> to vector<1x32xf32>
    %253 = vector.extract_strided_slice %246 {offsets = [6, 0], sizes = [1, 32], strides = [1, 1]} : vector<9x64xf32> to vector<1x32xf32>
    %254 = vector.extract_strided_slice %246 {offsets = [7, 0], sizes = [1, 32], strides = [1, 1]} : vector<9x64xf32> to vector<1x32xf32>
    %255 = vector.extract_strided_slice %246 {offsets = [8, 0], sizes = [1, 32], strides = [1, 1]} : vector<9x64xf32> to vector<1x32xf32>
    %c1_150 = arith.constant 1 : index
    %c0_151 = arith.constant 0 : index
    %c0_152 = arith.constant 0 : index
    %256 = vector.load %arg4[%c1_150, %c0_151, %c0_152] : memref<2x32x32xf32, #tpu.memory_space<vmem>>, vector<1x32x32xf32>
    %257 = vector.shape_cast %256 : vector<1x32x32xf32> to vector<32x32xf32>
    %cst_153 = arith.constant dense<0.000000e+00> : vector<16x32xf32>
    %258 = tpu.matmul %244, %257, %cst_153 {dimension_numbers = #tpu.dot_dimension_numbers<[1], [0], [0], [1], [0, 0, 1, 1], [], []>} : vector<16x32xf32>, vector<32x32xf32>, vector<16x32xf32> -> vector<16x32xf32>
    %cst_154 = arith.constant dense<0.000000e+00> : vector<16x32xf32>
    %259 = tpu.matmul %1, %258, %cst_154 {dimension_numbers = #tpu.dot_dimension_numbers<[1], [0], [0], [1], [0, 0, 1, 1], [], []>} : vector<16x16xf32>, vector<16x32xf32>, vector<16x32xf32> -> vector<16x32xf32>
    %260 = arith.addf %259, %244 : vector<16x32xf32>
    %cst_155 = arith.constant dense<0.000000e+00> : vector<1x32xf32>
    %261 = tpu.matmul %2, %260, %cst_155 {dimension_numbers = #tpu.dot_dimension_numbers<[1], [0], [0], [1], [0, 0, 1, 1], [], []>} : vector<1x16xf32>, vector<16x32xf32>, vector<1x32xf32> -> vector<1x32xf32>
    %262 = arith.mulf %260, %260 : vector<16x32xf32>
    %cst_156 = arith.constant dense<0.000000e+00> : vector<1x32xf32>
    %263 = tpu.matmul %2, %262, %cst_156 {dimension_numbers = #tpu.dot_dimension_numbers<[1], [0], [0], [1], [0, 0, 1, 1], [], []>} : vector<1x16xf32>, vector<16x32xf32>, vector<1x32xf32> -> vector<1x32xf32>
    %cst_157 = arith.constant 6.250000e-02 : f32
    %264 = vector.broadcast %cst_157 : f32 to vector<1x32xf32>
    %265 = arith.mulf %261, %264 : vector<1x32xf32>
    %cst_158 = arith.constant 6.250000e-02 : f32
    %266 = vector.broadcast %cst_158 : f32 to vector<1x32xf32>
    %267 = arith.mulf %263, %266 : vector<1x32xf32>
    %268 = arith.mulf %265, %265 : vector<1x32xf32>
    %269 = arith.subf %267, %268 : vector<1x32xf32>
    %cst_159 = arith.constant 9.99999974E-6 : f32
    %270 = vector.broadcast %cst_159 : f32 to vector<1x32xf32>
    %271 = arith.addf %269, %270 : vector<1x32xf32>
    %272 = math.rsqrt %271 : vector<1x32xf32>
    %273 = arith.mulf %250, %272 : vector<1x32xf32>
    %274 = vector.broadcast %273 : vector<1x32xf32> to vector<16x32xf32>
    %275 = arith.mulf %260, %274 : vector<16x32xf32>
    %276 = arith.mulf %265, %273 : vector<1x32xf32>
    %277 = arith.subf %251, %276 : vector<1x32xf32>
    %278 = vector.broadcast %277 : vector<1x32xf32> to vector<16x32xf32>
    %279 = arith.addf %275, %278 : vector<16x32xf32>
    %c12 = arith.constant 12 : index
    %c0_160 = arith.constant 0 : index
    %c0_161 = arith.constant 0 : index
    %280 = vector.load %arg5[%c12, %c0_160, %c0_161] : memref<24x32x8xf32, #tpu.memory_space<vmem>>, vector<1x32x8xf32>
    %281 = vector.shape_cast %280 : vector<1x32x8xf32> to vector<32x8xf32>
    %cst_162 = arith.constant dense<0.000000e+00> : vector<16x8xf32>
    %282 = tpu.matmul %244, %281, %cst_162 {dimension_numbers = #tpu.dot_dimension_numbers<[1], [0], [0], [1], [0, 0, 1, 1], [], []>} : vector<16x32xf32>, vector<32x8xf32>, vector<16x8xf32> -> vector<16x8xf32>
    %c12_163 = arith.constant 12 : index
    %c0_164 = arith.constant 0 : index
    %c0_165 = arith.constant 0 : index
    %283 = vector.load %arg6[%c12_163, %c0_164, %c0_165] : memref<24x1x8xf32, #tpu.memory_space<vmem>>, vector<1x1x8xf32>
    %284 = vector.shape_cast %283 : vector<1x1x8xf32> to vector<1x8xf32>
    %285 = vector.broadcast %284 : vector<1x8xf32> to vector<16x8xf32>
    %286 = arith.addf %282, %285 : vector<16x8xf32>
    %c16 = arith.constant 16 : index
    %c0_166 = arith.constant 0 : index
    %c0_167 = arith.constant 0 : index
    %287 = vector.load %arg5[%c16, %c0_166, %c0_167] : memref<24x32x8xf32, #tpu.memory_space<vmem>>, vector<1x32x8xf32>
    %288 = vector.shape_cast %287 : vector<1x32x8xf32> to vector<32x8xf32>
    %cst_168 = arith.constant dense<0.000000e+00> : vector<16x8xf32>
    %289 = tpu.matmul %244, %288, %cst_168 {dimension_numbers = #tpu.dot_dimension_numbers<[1], [0], [0], [1], [0, 0, 1, 1], [], []>} : vector<16x32xf32>, vector<32x8xf32>, vector<16x8xf32> -> vector<16x8xf32>
    %c16_169 = arith.constant 16 : index
    %c0_170 = arith.constant 0 : index
    %c0_171 = arith.constant 0 : index
    %290 = vector.load %arg6[%c16_169, %c0_170, %c0_171] : memref<24x1x8xf32, #tpu.memory_space<vmem>>, vector<1x1x8xf32>
    %291 = vector.shape_cast %290 : vector<1x1x8xf32> to vector<1x8xf32>
    %292 = vector.broadcast %291 : vector<1x8xf32> to vector<16x8xf32>
    %293 = arith.addf %289, %292 : vector<16x8xf32>
    %c20 = arith.constant 20 : index
    %c0_172 = arith.constant 0 : index
    %c0_173 = arith.constant 0 : index
    %294 = vector.load %arg5[%c20, %c0_172, %c0_173] : memref<24x32x8xf32, #tpu.memory_space<vmem>>, vector<1x32x8xf32>
    %295 = vector.shape_cast %294 : vector<1x32x8xf32> to vector<32x8xf32>
    %cst_174 = arith.constant dense<0.000000e+00> : vector<16x8xf32>
    %296 = tpu.matmul %244, %295, %cst_174 {dimension_numbers = #tpu.dot_dimension_numbers<[1], [0], [0], [1], [0, 0, 1, 1], [], []>} : vector<16x32xf32>, vector<32x8xf32>, vector<16x8xf32> -> vector<16x8xf32>
    %c20_175 = arith.constant 20 : index
    %c0_176 = arith.constant 0 : index
    %c0_177 = arith.constant 0 : index
    %297 = vector.load %arg6[%c20_175, %c0_176, %c0_177] : memref<24x1x8xf32, #tpu.memory_space<vmem>>, vector<1x1x8xf32>
    %298 = vector.shape_cast %297 : vector<1x1x8xf32> to vector<1x8xf32>
    %299 = vector.broadcast %298 : vector<1x8xf32> to vector<16x8xf32>
    %300 = arith.addf %296, %299 : vector<16x8xf32>
    %cst_178 = arith.constant dense<0.000000e+00> : vector<16x16xf32>
    %301 = tpu.matmul %286, %293, %cst_178 {dimension_numbers = #tpu.dot_dimension_numbers<[1], [1], [0], [0], [0, 0, 1, 0], [], []>} : vector<16x8xf32>, vector<16x8xf32>, vector<16x16xf32> -> vector<16x16xf32>
    %cst_179 = arith.constant dense<0xFF800000> : vector<16xf32>
    %302 = vector.multi_reduction <maximumf>, %301, %cst_179 [1] : vector<16x16xf32> to vector<16xf32>
    %303 = vector.shape_cast %302 : vector<16xf32> to vector<16x1xf32>
    %304 = vector.broadcast %303 : vector<16x1xf32> to vector<16x16xf32>
    %305 = arith.subf %301, %304 : vector<16x16xf32>
    %306 = math.exp %305 : vector<16x16xf32>
    %cst_180 = arith.constant dense<0.000000e+00> : vector<16x1xf32>
    %307 = tpu.matmul %306, %3, %cst_180 {dimension_numbers = #tpu.dot_dimension_numbers<[1], [0], [0], [1], [0, 0, 1, 1], [], []>} : vector<16x16xf32>, vector<16x1xf32>, vector<16x1xf32> -> vector<16x1xf32>
    %cst_181 = arith.constant dense<0.000000e+00> : vector<16x8xf32>
    %308 = tpu.matmul %306, %300, %cst_181 {dimension_numbers = #tpu.dot_dimension_numbers<[1], [0], [0], [1], [0, 0, 1, 1], [], []>} : vector<16x16xf32>, vector<16x8xf32>, vector<16x8xf32> -> vector<16x8xf32>
    %309 = tpu.reciprocal %307 {approx = true} : vector<16x1xf32> -> vector<16x1xf32>
    %310 = vector.broadcast %309 : vector<16x1xf32> to vector<16x8xf32>
    %311 = arith.mulf %308, %310 : vector<16x8xf32>
    %c4_182 = arith.constant 4 : index
    %c0_183 = arith.constant 0 : index
    %c0_184 = arith.constant 0 : index
    %312 = vector.load %arg7[%c4_182, %c0_183, %c0_184] : memref<8x8x32xf32, #tpu.memory_space<vmem>>, vector<1x8x32xf32>
    %313 = vector.shape_cast %312 : vector<1x8x32xf32> to vector<8x32xf32>
    %cst_185 = arith.constant dense<0.000000e+00> : vector<16x32xf32>
    %314 = tpu.matmul %311, %313, %cst_185 {dimension_numbers = #tpu.dot_dimension_numbers<[1], [0], [0], [1], [0, 0, 1, 1], [], []>} : vector<16x8xf32>, vector<8x32xf32>, vector<16x32xf32> -> vector<16x32xf32>
    %315 = arith.addf %244, %314 : vector<16x32xf32>
    %c13 = arith.constant 13 : index
    %c0_186 = arith.constant 0 : index
    %c0_187 = arith.constant 0 : index
    %316 = vector.load %arg5[%c13, %c0_186, %c0_187] : memref<24x32x8xf32, #tpu.memory_space<vmem>>, vector<1x32x8xf32>
    %317 = vector.shape_cast %316 : vector<1x32x8xf32> to vector<32x8xf32>
    %cst_188 = arith.constant dense<0.000000e+00> : vector<16x8xf32>
    %318 = tpu.matmul %244, %317, %cst_188 {dimension_numbers = #tpu.dot_dimension_numbers<[1], [0], [0], [1], [0, 0, 1, 1], [], []>} : vector<16x32xf32>, vector<32x8xf32>, vector<16x8xf32> -> vector<16x8xf32>
    %c13_189 = arith.constant 13 : index
    %c0_190 = arith.constant 0 : index
    %c0_191 = arith.constant 0 : index
    %319 = vector.load %arg6[%c13_189, %c0_190, %c0_191] : memref<24x1x8xf32, #tpu.memory_space<vmem>>, vector<1x1x8xf32>
    %320 = vector.shape_cast %319 : vector<1x1x8xf32> to vector<1x8xf32>
    %321 = vector.broadcast %320 : vector<1x8xf32> to vector<16x8xf32>
    %322 = arith.addf %318, %321 : vector<16x8xf32>
    %c17 = arith.constant 17 : index
    %c0_192 = arith.constant 0 : index
    %c0_193 = arith.constant 0 : index
    %323 = vector.load %arg5[%c17, %c0_192, %c0_193] : memref<24x32x8xf32, #tpu.memory_space<vmem>>, vector<1x32x8xf32>
    %324 = vector.shape_cast %323 : vector<1x32x8xf32> to vector<32x8xf32>
    %cst_194 = arith.constant dense<0.000000e+00> : vector<16x8xf32>
    %325 = tpu.matmul %244, %324, %cst_194 {dimension_numbers = #tpu.dot_dimension_numbers<[1], [0], [0], [1], [0, 0, 1, 1], [], []>} : vector<16x32xf32>, vector<32x8xf32>, vector<16x8xf32> -> vector<16x8xf32>
    %c17_195 = arith.constant 17 : index
    %c0_196 = arith.constant 0 : index
    %c0_197 = arith.constant 0 : index
    %326 = vector.load %arg6[%c17_195, %c0_196, %c0_197] : memref<24x1x8xf32, #tpu.memory_space<vmem>>, vector<1x1x8xf32>
    %327 = vector.shape_cast %326 : vector<1x1x8xf32> to vector<1x8xf32>
    %328 = vector.broadcast %327 : vector<1x8xf32> to vector<16x8xf32>
    %329 = arith.addf %325, %328 : vector<16x8xf32>
    %c21 = arith.constant 21 : index
    %c0_198 = arith.constant 0 : index
    %c0_199 = arith.constant 0 : index
    %330 = vector.load %arg5[%c21, %c0_198, %c0_199] : memref<24x32x8xf32, #tpu.memory_space<vmem>>, vector<1x32x8xf32>
    %331 = vector.shape_cast %330 : vector<1x32x8xf32> to vector<32x8xf32>
    %cst_200 = arith.constant dense<0.000000e+00> : vector<16x8xf32>
    %332 = tpu.matmul %244, %331, %cst_200 {dimension_numbers = #tpu.dot_dimension_numbers<[1], [0], [0], [1], [0, 0, 1, 1], [], []>} : vector<16x32xf32>, vector<32x8xf32>, vector<16x8xf32> -> vector<16x8xf32>
    %c21_201 = arith.constant 21 : index
    %c0_202 = arith.constant 0 : index
    %c0_203 = arith.constant 0 : index
    %333 = vector.load %arg6[%c21_201, %c0_202, %c0_203] : memref<24x1x8xf32, #tpu.memory_space<vmem>>, vector<1x1x8xf32>
    %334 = vector.shape_cast %333 : vector<1x1x8xf32> to vector<1x8xf32>
    %335 = vector.broadcast %334 : vector<1x8xf32> to vector<16x8xf32>
    %336 = arith.addf %332, %335 : vector<16x8xf32>
    %cst_204 = arith.constant dense<0.000000e+00> : vector<16x16xf32>
    %337 = tpu.matmul %322, %329, %cst_204 {dimension_numbers = #tpu.dot_dimension_numbers<[1], [1], [0], [0], [0, 0, 1, 0], [], []>} : vector<16x8xf32>, vector<16x8xf32>, vector<16x16xf32> -> vector<16x16xf32>
    %cst_205 = arith.constant dense<0xFF800000> : vector<16xf32>
    %338 = vector.multi_reduction <maximumf>, %337, %cst_205 [1] : vector<16x16xf32> to vector<16xf32>
    %339 = vector.shape_cast %338 : vector<16xf32> to vector<16x1xf32>
    %340 = vector.broadcast %339 : vector<16x1xf32> to vector<16x16xf32>
    %341 = arith.subf %337, %340 : vector<16x16xf32>
    %342 = math.exp %341 : vector<16x16xf32>
    %cst_206 = arith.constant dense<0.000000e+00> : vector<16x1xf32>
    %343 = tpu.matmul %342, %3, %cst_206 {dimension_numbers = #tpu.dot_dimension_numbers<[1], [0], [0], [1], [0, 0, 1, 1], [], []>} : vector<16x16xf32>, vector<16x1xf32>, vector<16x1xf32> -> vector<16x1xf32>
    %cst_207 = arith.constant dense<0.000000e+00> : vector<16x8xf32>
    %344 = tpu.matmul %342, %336, %cst_207 {dimension_numbers = #tpu.dot_dimension_numbers<[1], [0], [0], [1], [0, 0, 1, 1], [], []>} : vector<16x16xf32>, vector<16x8xf32>, vector<16x8xf32> -> vector<16x8xf32>
    %345 = tpu.reciprocal %343 {approx = true} : vector<16x1xf32> -> vector<16x1xf32>
    %346 = vector.broadcast %345 : vector<16x1xf32> to vector<16x8xf32>
    %347 = arith.mulf %344, %346 : vector<16x8xf32>
    %c5_208 = arith.constant 5 : index
    %c0_209 = arith.constant 0 : index
    %c0_210 = arith.constant 0 : index
    %348 = vector.load %arg7[%c5_208, %c0_209, %c0_210] : memref<8x8x32xf32, #tpu.memory_space<vmem>>, vector<1x8x32xf32>
    %349 = vector.shape_cast %348 : vector<1x8x32xf32> to vector<8x32xf32>
    %cst_211 = arith.constant dense<0.000000e+00> : vector<16x32xf32>
    %350 = tpu.matmul %347, %349, %cst_211 {dimension_numbers = #tpu.dot_dimension_numbers<[1], [0], [0], [1], [0, 0, 1, 1], [], []>} : vector<16x8xf32>, vector<8x32xf32>, vector<16x32xf32> -> vector<16x32xf32>
    %351 = arith.addf %315, %350 : vector<16x32xf32>
    %c14 = arith.constant 14 : index
    %c0_212 = arith.constant 0 : index
    %c0_213 = arith.constant 0 : index
    %352 = vector.load %arg5[%c14, %c0_212, %c0_213] : memref<24x32x8xf32, #tpu.memory_space<vmem>>, vector<1x32x8xf32>
    %353 = vector.shape_cast %352 : vector<1x32x8xf32> to vector<32x8xf32>
    %cst_214 = arith.constant dense<0.000000e+00> : vector<16x8xf32>
    %354 = tpu.matmul %244, %353, %cst_214 {dimension_numbers = #tpu.dot_dimension_numbers<[1], [0], [0], [1], [0, 0, 1, 1], [], []>} : vector<16x32xf32>, vector<32x8xf32>, vector<16x8xf32> -> vector<16x8xf32>
    %c14_215 = arith.constant 14 : index
    %c0_216 = arith.constant 0 : index
    %c0_217 = arith.constant 0 : index
    %355 = vector.load %arg6[%c14_215, %c0_216, %c0_217] : memref<24x1x8xf32, #tpu.memory_space<vmem>>, vector<1x1x8xf32>
    %356 = vector.shape_cast %355 : vector<1x1x8xf32> to vector<1x8xf32>
    %357 = vector.broadcast %356 : vector<1x8xf32> to vector<16x8xf32>
    %358 = arith.addf %354, %357 : vector<16x8xf32>
    %c18 = arith.constant 18 : index
    %c0_218 = arith.constant 0 : index
    %c0_219 = arith.constant 0 : index
    %359 = vector.load %arg5[%c18, %c0_218, %c0_219] : memref<24x32x8xf32, #tpu.memory_space<vmem>>, vector<1x32x8xf32>
    %360 = vector.shape_cast %359 : vector<1x32x8xf32> to vector<32x8xf32>
    %cst_220 = arith.constant dense<0.000000e+00> : vector<16x8xf32>
    %361 = tpu.matmul %244, %360, %cst_220 {dimension_numbers = #tpu.dot_dimension_numbers<[1], [0], [0], [1], [0, 0, 1, 1], [], []>} : vector<16x32xf32>, vector<32x8xf32>, vector<16x8xf32> -> vector<16x8xf32>
    %c18_221 = arith.constant 18 : index
    %c0_222 = arith.constant 0 : index
    %c0_223 = arith.constant 0 : index
    %362 = vector.load %arg6[%c18_221, %c0_222, %c0_223] : memref<24x1x8xf32, #tpu.memory_space<vmem>>, vector<1x1x8xf32>
    %363 = vector.shape_cast %362 : vector<1x1x8xf32> to vector<1x8xf32>
    %364 = vector.broadcast %363 : vector<1x8xf32> to vector<16x8xf32>
    %365 = arith.addf %361, %364 : vector<16x8xf32>
    %c22 = arith.constant 22 : index
    %c0_224 = arith.constant 0 : index
    %c0_225 = arith.constant 0 : index
    %366 = vector.load %arg5[%c22, %c0_224, %c0_225] : memref<24x32x8xf32, #tpu.memory_space<vmem>>, vector<1x32x8xf32>
    %367 = vector.shape_cast %366 : vector<1x32x8xf32> to vector<32x8xf32>
    %cst_226 = arith.constant dense<0.000000e+00> : vector<16x8xf32>
    %368 = tpu.matmul %244, %367, %cst_226 {dimension_numbers = #tpu.dot_dimension_numbers<[1], [0], [0], [1], [0, 0, 1, 1], [], []>} : vector<16x32xf32>, vector<32x8xf32>, vector<16x8xf32> -> vector<16x8xf32>
    %c22_227 = arith.constant 22 : index
    %c0_228 = arith.constant 0 : index
    %c0_229 = arith.constant 0 : index
    %369 = vector.load %arg6[%c22_227, %c0_228, %c0_229] : memref<24x1x8xf32, #tpu.memory_space<vmem>>, vector<1x1x8xf32>
    %370 = vector.shape_cast %369 : vector<1x1x8xf32> to vector<1x8xf32>
    %371 = vector.broadcast %370 : vector<1x8xf32> to vector<16x8xf32>
    %372 = arith.addf %368, %371 : vector<16x8xf32>
    %cst_230 = arith.constant dense<0.000000e+00> : vector<16x16xf32>
    %373 = tpu.matmul %358, %365, %cst_230 {dimension_numbers = #tpu.dot_dimension_numbers<[1], [1], [0], [0], [0, 0, 1, 0], [], []>} : vector<16x8xf32>, vector<16x8xf32>, vector<16x16xf32> -> vector<16x16xf32>
    %cst_231 = arith.constant dense<0xFF800000> : vector<16xf32>
    %374 = vector.multi_reduction <maximumf>, %373, %cst_231 [1] : vector<16x16xf32> to vector<16xf32>
    %375 = vector.shape_cast %374 : vector<16xf32> to vector<16x1xf32>
    %376 = vector.broadcast %375 : vector<16x1xf32> to vector<16x16xf32>
    %377 = arith.subf %373, %376 : vector<16x16xf32>
    %378 = math.exp %377 : vector<16x16xf32>
    %cst_232 = arith.constant dense<0.000000e+00> : vector<16x1xf32>
    %379 = tpu.matmul %378, %3, %cst_232 {dimension_numbers = #tpu.dot_dimension_numbers<[1], [0], [0], [1], [0, 0, 1, 1], [], []>} : vector<16x16xf32>, vector<16x1xf32>, vector<16x1xf32> -> vector<16x1xf32>
    %cst_233 = arith.constant dense<0.000000e+00> : vector<16x8xf32>
    %380 = tpu.matmul %378, %372, %cst_233 {dimension_numbers = #tpu.dot_dimension_numbers<[1], [0], [0], [1], [0, 0, 1, 1], [], []>} : vector<16x16xf32>, vector<16x8xf32>, vector<16x8xf32> -> vector<16x8xf32>
    %381 = tpu.reciprocal %379 {approx = true} : vector<16x1xf32> -> vector<16x1xf32>
    %382 = vector.broadcast %381 : vector<16x1xf32> to vector<16x8xf32>
    %383 = arith.mulf %380, %382 : vector<16x8xf32>
    %c6_234 = arith.constant 6 : index
    %c0_235 = arith.constant 0 : index
    %c0_236 = arith.constant 0 : index
    %384 = vector.load %arg7[%c6_234, %c0_235, %c0_236] : memref<8x8x32xf32, #tpu.memory_space<vmem>>, vector<1x8x32xf32>
    %385 = vector.shape_cast %384 : vector<1x8x32xf32> to vector<8x32xf32>
    %cst_237 = arith.constant dense<0.000000e+00> : vector<16x32xf32>
    %386 = tpu.matmul %383, %385, %cst_237 {dimension_numbers = #tpu.dot_dimension_numbers<[1], [0], [0], [1], [0, 0, 1, 1], [], []>} : vector<16x8xf32>, vector<8x32xf32>, vector<16x32xf32> -> vector<16x32xf32>
    %387 = arith.addf %351, %386 : vector<16x32xf32>
    %c15 = arith.constant 15 : index
    %c0_238 = arith.constant 0 : index
    %c0_239 = arith.constant 0 : index
    %388 = vector.load %arg5[%c15, %c0_238, %c0_239] : memref<24x32x8xf32, #tpu.memory_space<vmem>>, vector<1x32x8xf32>
    %389 = vector.shape_cast %388 : vector<1x32x8xf32> to vector<32x8xf32>
    %cst_240 = arith.constant dense<0.000000e+00> : vector<16x8xf32>
    %390 = tpu.matmul %244, %389, %cst_240 {dimension_numbers = #tpu.dot_dimension_numbers<[1], [0], [0], [1], [0, 0, 1, 1], [], []>} : vector<16x32xf32>, vector<32x8xf32>, vector<16x8xf32> -> vector<16x8xf32>
    %c15_241 = arith.constant 15 : index
    %c0_242 = arith.constant 0 : index
    %c0_243 = arith.constant 0 : index
    %391 = vector.load %arg6[%c15_241, %c0_242, %c0_243] : memref<24x1x8xf32, #tpu.memory_space<vmem>>, vector<1x1x8xf32>
    %392 = vector.shape_cast %391 : vector<1x1x8xf32> to vector<1x8xf32>
    %393 = vector.broadcast %392 : vector<1x8xf32> to vector<16x8xf32>
    %394 = arith.addf %390, %393 : vector<16x8xf32>
    %c19 = arith.constant 19 : index
    %c0_244 = arith.constant 0 : index
    %c0_245 = arith.constant 0 : index
    %395 = vector.load %arg5[%c19, %c0_244, %c0_245] : memref<24x32x8xf32, #tpu.memory_space<vmem>>, vector<1x32x8xf32>
    %396 = vector.shape_cast %395 : vector<1x32x8xf32> to vector<32x8xf32>
    %cst_246 = arith.constant dense<0.000000e+00> : vector<16x8xf32>
    %397 = tpu.matmul %244, %396, %cst_246 {dimension_numbers = #tpu.dot_dimension_numbers<[1], [0], [0], [1], [0, 0, 1, 1], [], []>} : vector<16x32xf32>, vector<32x8xf32>, vector<16x8xf32> -> vector<16x8xf32>
    %c19_247 = arith.constant 19 : index
    %c0_248 = arith.constant 0 : index
    %c0_249 = arith.constant 0 : index
    %398 = vector.load %arg6[%c19_247, %c0_248, %c0_249] : memref<24x1x8xf32, #tpu.memory_space<vmem>>, vector<1x1x8xf32>
    %399 = vector.shape_cast %398 : vector<1x1x8xf32> to vector<1x8xf32>
    %400 = vector.broadcast %399 : vector<1x8xf32> to vector<16x8xf32>
    %401 = arith.addf %397, %400 : vector<16x8xf32>
    %c23 = arith.constant 23 : index
    %c0_250 = arith.constant 0 : index
    %c0_251 = arith.constant 0 : index
    %402 = vector.load %arg5[%c23, %c0_250, %c0_251] : memref<24x32x8xf32, #tpu.memory_space<vmem>>, vector<1x32x8xf32>
    %403 = vector.shape_cast %402 : vector<1x32x8xf32> to vector<32x8xf32>
    %cst_252 = arith.constant dense<0.000000e+00> : vector<16x8xf32>
    %404 = tpu.matmul %244, %403, %cst_252 {dimension_numbers = #tpu.dot_dimension_numbers<[1], [0], [0], [1], [0, 0, 1, 1], [], []>} : vector<16x32xf32>, vector<32x8xf32>, vector<16x8xf32> -> vector<16x8xf32>
    %c23_253 = arith.constant 23 : index
    %c0_254 = arith.constant 0 : index
    %c0_255 = arith.constant 0 : index
    %405 = vector.load %arg6[%c23_253, %c0_254, %c0_255] : memref<24x1x8xf32, #tpu.memory_space<vmem>>, vector<1x1x8xf32>
    %406 = vector.shape_cast %405 : vector<1x1x8xf32> to vector<1x8xf32>
    %407 = vector.broadcast %406 : vector<1x8xf32> to vector<16x8xf32>
    %408 = arith.addf %404, %407 : vector<16x8xf32>
    %cst_256 = arith.constant dense<0.000000e+00> : vector<16x16xf32>
    %409 = tpu.matmul %394, %401, %cst_256 {dimension_numbers = #tpu.dot_dimension_numbers<[1], [1], [0], [0], [0, 0, 1, 0], [], []>} : vector<16x8xf32>, vector<16x8xf32>, vector<16x16xf32> -> vector<16x16xf32>
    %cst_257 = arith.constant dense<0xFF800000> : vector<16xf32>
    %410 = vector.multi_reduction <maximumf>, %409, %cst_257 [1] : vector<16x16xf32> to vector<16xf32>
    %411 = vector.shape_cast %410 : vector<16xf32> to vector<16x1xf32>
    %412 = vector.broadcast %411 : vector<16x1xf32> to vector<16x16xf32>
    %413 = arith.subf %409, %412 : vector<16x16xf32>
    %414 = math.exp %413 : vector<16x16xf32>
    %cst_258 = arith.constant dense<0.000000e+00> : vector<16x1xf32>
    %415 = tpu.matmul %414, %3, %cst_258 {dimension_numbers = #tpu.dot_dimension_numbers<[1], [0], [0], [1], [0, 0, 1, 1], [], []>} : vector<16x16xf32>, vector<16x1xf32>, vector<16x1xf32> -> vector<16x1xf32>
    %cst_259 = arith.constant dense<0.000000e+00> : vector<16x8xf32>
    %416 = tpu.matmul %414, %408, %cst_259 {dimension_numbers = #tpu.dot_dimension_numbers<[1], [0], [0], [1], [0, 0, 1, 1], [], []>} : vector<16x16xf32>, vector<16x8xf32>, vector<16x8xf32> -> vector<16x8xf32>
    %417 = tpu.reciprocal %415 {approx = true} : vector<16x1xf32> -> vector<16x1xf32>
    %418 = vector.broadcast %417 : vector<16x1xf32> to vector<16x8xf32>
    %419 = arith.mulf %416, %418 : vector<16x8xf32>
    %c7_260 = arith.constant 7 : index
    %c0_261 = arith.constant 0 : index
    %c0_262 = arith.constant 0 : index
    %420 = vector.load %arg7[%c7_260, %c0_261, %c0_262] : memref<8x8x32xf32, #tpu.memory_space<vmem>>, vector<1x8x32xf32>
    %421 = vector.shape_cast %420 : vector<1x8x32xf32> to vector<8x32xf32>
    %cst_263 = arith.constant dense<0.000000e+00> : vector<16x32xf32>
    %422 = tpu.matmul %419, %421, %cst_263 {dimension_numbers = #tpu.dot_dimension_numbers<[1], [0], [0], [1], [0, 0, 1, 1], [], []>} : vector<16x8xf32>, vector<8x32xf32>, vector<16x32xf32> -> vector<16x32xf32>
    %423 = arith.addf %387, %422 : vector<16x32xf32>
    %424 = vector.broadcast %247 : vector<1x32xf32> to vector<16x32xf32>
    %425 = arith.addf %423, %424 : vector<16x32xf32>
    %cst_264 = arith.constant dense<0.000000e+00> : vector<1x32xf32>
    %426 = tpu.matmul %2, %425, %cst_264 {dimension_numbers = #tpu.dot_dimension_numbers<[1], [0], [0], [1], [0, 0, 1, 1], [], []>} : vector<1x16xf32>, vector<16x32xf32>, vector<1x32xf32> -> vector<1x32xf32>
    %427 = arith.mulf %425, %425 : vector<16x32xf32>
    %cst_265 = arith.constant dense<0.000000e+00> : vector<1x32xf32>
    %428 = tpu.matmul %2, %427, %cst_265 {dimension_numbers = #tpu.dot_dimension_numbers<[1], [0], [0], [1], [0, 0, 1, 1], [], []>} : vector<1x16xf32>, vector<16x32xf32>, vector<1x32xf32> -> vector<1x32xf32>
    %cst_266 = arith.constant 6.250000e-02 : f32
    %429 = vector.broadcast %cst_266 : f32 to vector<1x32xf32>
    %430 = arith.mulf %426, %429 : vector<1x32xf32>
    %cst_267 = arith.constant 6.250000e-02 : f32
    %431 = vector.broadcast %cst_267 : f32 to vector<1x32xf32>
    %432 = arith.mulf %428, %431 : vector<1x32xf32>
    %433 = arith.mulf %430, %430 : vector<1x32xf32>
    %434 = arith.subf %432, %433 : vector<1x32xf32>
    %cst_268 = arith.constant 9.99999974E-6 : f32
    %435 = vector.broadcast %cst_268 : f32 to vector<1x32xf32>
    %436 = arith.addf %434, %435 : vector<1x32xf32>
    %437 = math.rsqrt %436 : vector<1x32xf32>
    %438 = arith.mulf %252, %437 : vector<1x32xf32>
    %439 = vector.broadcast %438 : vector<1x32xf32> to vector<16x32xf32>
    %440 = arith.mulf %425, %439 : vector<16x32xf32>
    %441 = arith.mulf %430, %438 : vector<1x32xf32>
    %442 = arith.subf %253, %441 : vector<1x32xf32>
    %443 = vector.broadcast %442 : vector<1x32xf32> to vector<16x32xf32>
    %444 = arith.addf %440, %443 : vector<16x32xf32>
    %445 = arith.addf %279, %444 : vector<16x32xf32>
    %c1_269 = arith.constant 1 : index
    %c0_270 = arith.constant 0 : index
    %c0_271 = arith.constant 0 : index
    %446 = vector.load %arg8[%c1_269, %c0_270, %c0_271] : memref<2x32x64xf32, #tpu.memory_space<vmem>>, vector<1x32x64xf32>
    %447 = vector.shape_cast %446 : vector<1x32x64xf32> to vector<32x64xf32>
    %cst_272 = arith.constant dense<0.000000e+00> : vector<16x64xf32>
    %448 = tpu.matmul %445, %447, %cst_272 {dimension_numbers = #tpu.dot_dimension_numbers<[1], [0], [0], [1], [0, 0, 1, 1], [], []>} : vector<16x32xf32>, vector<32x64xf32>, vector<16x64xf32> -> vector<16x64xf32>
    %449 = vector.broadcast %248 : vector<1x64xf32> to vector<16x64xf32>
    %450 = arith.addf %448, %449 : vector<16x64xf32>
    %cst_273 = arith.constant 0.000000e+00 : f32
    %451 = vector.broadcast %cst_273 : f32 to vector<16x64xf32>
    %452 = arith.maximumf %450, %451 : vector<16x64xf32>
    %c1_274 = arith.constant 1 : index
    %c0_275 = arith.constant 0 : index
    %c0_276 = arith.constant 0 : index
    %453 = vector.load %arg9[%c1_274, %c0_275, %c0_276] : memref<2x64x32xf32, #tpu.memory_space<vmem>>, vector<1x64x32xf32>
    %454 = vector.shape_cast %453 : vector<1x64x32xf32> to vector<64x32xf32>
    %cst_277 = arith.constant dense<0.000000e+00> : vector<16x32xf32>
    %455 = tpu.matmul %452, %454, %cst_277 {dimension_numbers = #tpu.dot_dimension_numbers<[1], [0], [0], [1], [0, 0, 1, 1], [], []>} : vector<16x64xf32>, vector<64x32xf32>, vector<16x32xf32> -> vector<16x32xf32>
    %456 = arith.addf %445, %455 : vector<16x32xf32>
    %457 = vector.broadcast %249 : vector<1x32xf32> to vector<16x32xf32>
    %458 = arith.addf %456, %457 : vector<16x32xf32>
    %cst_278 = arith.constant dense<0.000000e+00> : vector<1x32xf32>
    %459 = tpu.matmul %2, %458, %cst_278 {dimension_numbers = #tpu.dot_dimension_numbers<[1], [0], [0], [1], [0, 0, 1, 1], [], []>} : vector<1x16xf32>, vector<16x32xf32>, vector<1x32xf32> -> vector<1x32xf32>
    %460 = arith.mulf %458, %458 : vector<16x32xf32>
    %cst_279 = arith.constant dense<0.000000e+00> : vector<1x32xf32>
    %461 = tpu.matmul %2, %460, %cst_279 {dimension_numbers = #tpu.dot_dimension_numbers<[1], [0], [0], [1], [0, 0, 1, 1], [], []>} : vector<1x16xf32>, vector<16x32xf32>, vector<1x32xf32> -> vector<1x32xf32>
    %cst_280 = arith.constant 6.250000e-02 : f32
    %462 = vector.broadcast %cst_280 : f32 to vector<1x32xf32>
    %463 = arith.mulf %459, %462 : vector<1x32xf32>
    %cst_281 = arith.constant 6.250000e-02 : f32
    %464 = vector.broadcast %cst_281 : f32 to vector<1x32xf32>
    %465 = arith.mulf %461, %464 : vector<1x32xf32>
    %466 = arith.mulf %463, %463 : vector<1x32xf32>
    %467 = arith.subf %465, %466 : vector<1x32xf32>
    %cst_282 = arith.constant 9.99999974E-6 : f32
    %468 = vector.broadcast %cst_282 : f32 to vector<1x32xf32>
    %469 = arith.addf %467, %468 : vector<1x32xf32>
    %470 = math.rsqrt %469 : vector<1x32xf32>
    %471 = arith.mulf %254, %470 : vector<1x32xf32>
    %472 = vector.broadcast %471 : vector<1x32xf32> to vector<16x32xf32>
    %473 = arith.mulf %458, %472 : vector<16x32xf32>
    %474 = arith.mulf %463, %471 : vector<1x32xf32>
    %475 = arith.subf %255, %474 : vector<1x32xf32>
    %476 = vector.broadcast %475 : vector<1x32xf32> to vector<16x32xf32>
    %477 = arith.addf %473, %476 : vector<16x32xf32>
    %478 = vector.extract_strided_slice %4 {offsets = [1, 0], sizes = [1, 4], strides = [1, 1]} : vector<2x32xf32> to vector<1x4xf32>
    %c0_283 = arith.constant 0 : index
    %c0_284 = arith.constant 0 : index
    %479 = vector.load %arg10[%c0_283, %c0_284] : memref<32x4xf32, #tpu.memory_space<vmem>>, vector<32x4xf32>
    %cst_285 = arith.constant dense<0.000000e+00> : vector<16x4xf32>
    %480 = tpu.matmul %477, %479, %cst_285 {dimension_numbers = #tpu.dot_dimension_numbers<[1], [0], [0], [1], [0, 0, 1, 1], [], []>} : vector<16x32xf32>, vector<32x4xf32>, vector<16x4xf32> -> vector<16x4xf32>
    %481 = vector.broadcast %478 : vector<1x4xf32> to vector<16x4xf32>
    %482 = arith.addf %480, %481 : vector<16x4xf32>
    %c0_286 = arith.constant 0 : index
    %c0_287 = arith.constant 0 : index
    %483 = vector.load %arg2[%c0_286, %c0_287] : memref<2x16xf32, #tpu.memory_space<vmem>>, vector<2x16xf32>
    %cst_288 = arith.constant dense<0.000000e+00> : vector<2x4xf32>
    %484 = tpu.matmul %483, %482, %cst_288 {dimension_numbers = #tpu.dot_dimension_numbers<[1], [0], [0], [1], [0, 0, 1, 1], [], []>} : vector<2x16xf32>, vector<16x4xf32>, vector<2x4xf32> -> vector<2x4xf32>
    %cst_289 = arith.constant dense<0xFF800000> : vector<2xf32>
    %485 = vector.multi_reduction <maximumf>, %484, %cst_289 [1] : vector<2x4xf32> to vector<2xf32>
    %486 = vector.shape_cast %485 : vector<2xf32> to vector<2x1xf32>
    %487 = vector.broadcast %486 : vector<2x1xf32> to vector<2x4xf32>
    %488 = arith.subf %484, %487 : vector<2x4xf32>
    %489 = math.exp %488 : vector<2x4xf32>
    %cst_290 = arith.constant dense<0.000000e+00> : vector<2xf32>
    %490 = vector.multi_reduction <add>, %489, %cst_290 [1] : vector<2x4xf32> to vector<2xf32>
    %491 = vector.shape_cast %490 : vector<2xf32> to vector<2x1xf32>
    %492 = math.log %491 : vector<2x1xf32>
    %493 = vector.broadcast %492 : vector<2x1xf32> to vector<2x4xf32>
    %494 = arith.subf %488, %493 : vector<2x4xf32>
    %c0_291 = arith.constant 0 : index
    %c0_292 = arith.constant 0 : index
    %495 = vector.load %arg13[%c0_291, %c0_292] : memref<2x4xf32, #tpu.memory_space<vmem>>, vector<2x4xf32>
    tpu.vector_store %arg13[%c0_291, %c0_292], %494 {strides = array<i32>} : memref<2x4xf32, #tpu.memory_space<vmem>>, vector<2x4xf32>,
    return
  }
}

</mosaic_0001>

<bundles_post_ra>
// kernel: tpu_custom_call.1
= control target key start
LH: loop header
LB: loop body
LE: loop exit
PB: predicated region body
PF: predicated region fallthrough
CT: control target
= control target key end

     0   :  { %vm52_vm0 = vcmask 64512   ;;  %s4289_s0 = inlined_call_operand.vmem [shape: f32[16,8], index: 0, kind: input, shape index: {}]   ;;  %s4290_s1 = inlined_call_operand.vmem [shape: f32[16,16], index: 1, kind: input, shape index: {}]   ;;  %s4291_s2 = inlined_call_operand.vmem [shape: f32[2,16], index: 2, kind: input, shape index: {}]   ;;  %s4292_s3 = inlined_call_operand.vmem [shape: f32[8,32], index: 3, kind: input, shape index: {}]   ;;  %s4293_s4 = inlined_call_operand.vmem [shape: f32[2,32,32], index: 4, kind: input, shape index: {}]   ;;  %s4294_s5 = inlined_call_operand.vmem [shape: f32[24,32,8], index: 5, kind: input, shape index: {}]   ;;  %s4295_s6 = inlined_call_operand.vmem [shape: f32[24,1,8], index: 6, kind: input, shape index: {}]   ;;  %s4296_s7 = inlined_call_operand.vmem [shape: f32[8,8,32], index: 7, kind: input, shape index: {}]   ;;  %s4297_s8 = inlined_call_operand.vmem [shape: f32[2,32,64], index: 8, kind: input, shape index: {}]   ;;  %s4298_s9 = inlined_call_operand.vmem [shape: f32[2,64,32], index: 9, kind: input, shape index: {}]   ;;  %s4299_s10 = inlined_call_operand.vmem [shape: f32[32,4], index: 10, kind: input, shape index: {}]   ;;  %s4300_s11 = inlined_call_operand.vmem [shape: f32[2,9,64], index: 11, kind: input, shape index: {}]   ;;  %s4301_s12 = inlined_call_operand.vmem [shape: f32[2,32], index: 12, kind: input, shape index: {}]   ;;  %s4302_s13 = inlined_call_operand.hbm [shape: f32[2,4], index: 13, kind: output, shape index: {}]  }
   0x1   :  { %v50_v0 = vld [vmem:[%s4292_s3] sm:$0xff]  ;;  %v89_v2 = vld [vmem:[%s4293_s4 + $0x18] sm:$0xff]  ;;  %v46_v3 = vld [vmem:[%s4289_s0 + $0x8] sm:$0xff] }
   0x2   :  { %v45_v1 = vld [vmem:[%s4289_s0] sm:$0xff]  ;;  %74 = vmatpush.msra.mxu0 %v50_v0  ;;  %109 = vmatpush.msra.mxu1 %v89_v2 }
   0x3   :  { %2871 = vmatmul.msk.f32.vlgmr.msra.gmra.mxu0 %vm52_vm0, %v45_v1 }
   0xb   :  { %2872 = vmatmul.msk.f32.gmra.mxu0 %vm52_vm0, %v46_v3 }
   0xc   :  { %18 = vsyncpa [#allocation3], 0  ;;  %v88_v4 = vld [vmem:[%s4293_s4 + $0x10] sm:$0xff]  ;;  %v87_v5 = vld [vmem:[%s4293_s4 + $0x8] sm:$0xff]  ;;  %vm90_vm1 = vcmask 261120   ;;  %vm120_vm2 = vcmask 130048  }
   0xd   :  { %110 = vmatpush.msra.mxu1 %v88_v4  ;;  %v86_v6 = vld [vmem:[%s4293_s4] sm:$0xff]  ;;  %v2884_v18 = vld [vmem:[%s4294_s5 + $0x98] sm:$0xff]  ;;  %v2883_v19 = vld [vmem:[%s4294_s5 + $0x90] sm:$0xff]  ;;  %v3311_v30 = vmov 1.0   ;;  %vm1329_vm9 = vcmask 523264   ;;  %s2862_s16 = sshll.u32 %s4302_s13, 4  ;;  %s2863_s16 = int_to_ptr.hbm [resolvable:$true] %s2862_s16 }
   0xe   :  { %v49_v7 = vld [vmem:[%s4301_s12] sm:$0x3]  ;;  %v2882_v20 = vld [vmem:[%s4294_s5 + $0x88] sm:$0xff]  ;;  %v231_v28 = vld [vmem:[%s4294_s5 + $0x18] sm:$0xff] }
   0xf   :  { %111 = vmatpush.msra.mxu1 %v87_v5  ;;  %v51_v8 = vperm.slane %v49_v7, 0  ;;  %v47_v17 = vld [vmem:[%s4290_s1] sm:$0xff]  ;;  %v48_v22 = vld [vmem:[%s4290_s1 + $0x8] sm:$0xff]  ;;  %v230_v31 = vld [vmem:[%s4294_s5 + $0x10] sm:$0xff] }
  0x10   :  { %v2881_v21 = vld [vmem:[%s4294_s5 + $0x80] sm:$0xff]  ;;  %v2891_v32 = vld [vmem:[%s4294_s5 + $0x118] sm:$0xff]  ;;  %v229_v34 = vld [vmem:[%s4294_s5 + $0x8] sm:$0xff] }
  0x11   :  { %112 = vmatpush.msra.mxu1 %v86_v6  ;;  %v2890_v35 = vld [vmem:[%s4294_s5 + $0x110] sm:$0xff]  ;;  %v228_v36 = vld [vmem:[%s4294_s5] sm:$0xff]  ;;  %v2889_v37 = vld [vmem:[%s4294_s5 + $0x108] sm:$0xff] }
  0x12   :  { %v2888_v38 = vld [vmem:[%s4294_s5 + $0x100] sm:$0xff]  ;;  %v2908_v43 = vld [vmem:[%s4294_s5 + $0x38] sm:$0xff]  ;;  %v2907_v44 = vld [vmem:[%s4294_s5 + $0x30] sm:$0xff] }
  0x13   :  { %v3178_v39 = vld [vmem:[%s4295_s6 + $0x4] ss:$0 sm:$0xff]  ;;  %v2906_v45 = vld [vmem:[%s4294_s5 + $0x28] sm:$0xff]  ;;  %v3179_v48 = vld [vmem:[%s4295_s6] ss:$0 sm:$0xff] }
  0x14   :  { %v2905_v46 = vld [vmem:[%s4294_s5 + $0x20] sm:$0xff]  ;;  %v3180_v55 = vld [vmem:[%s4295_s6 + $0x8] ss:$0 sm:$0xff]  ;;  %v2915_v63 = vld [vmem:[%s4294_s5 + $0xb8] sm:$0xff] }
  0x15   :  { %v2922_v0 = vld [vmem:[%s4294_s5 + $0x138] sm:$0xff]  ;;  %v2914_v1 = vld [vmem:[%s4294_s5 + $0xb0] sm:$0xff]  ;;  %v2913_v3 = vld [vmem:[%s4294_s5 + $0xa8] sm:$0xff] }
  0x16   :  { %v2921_v2 = vld [vmem:[%s4294_s5 + $0x130] sm:$0xff]  ;;  %v2920_v4 = vld [vmem:[%s4294_s5 + $0x128] sm:$0xff]  ;;  %v2912_v5 = vld [vmem:[%s4294_s5 + $0xa0] sm:$0xff] }
  0x17   :  { %v2919_v6 = vld [vmem:[%s4294_s5 + $0x120] sm:$0xff] }
  0x80   :  { %v76_v9 = vpop.f32.mrf.mxu0 }
  0x81   :  { %v77_v10 = vadd.f32 %v76_v9, %v51_v8 }
  0x83   :  { %v3410_v11 = vmax.f32 %v77_v10, 0.0 }
  0x85   :  { %2873 = vmatmul.msk.f32.vlgmr.msra.gmra.mxu1 %vm90_vm1, %v3410_v11 }
  0x88   :  { %v79_v12 = vpop.f32.mrf.mxu0 }
  0x89   :  { %v80_v13 = vadd.f32 %v79_v12, %v51_v8 }
  0x8b   :  { %v3414_v14 = vmax.f32 %v80_v13, 0.0 }
  0x8d   :  { %2874 = vmatmul.msk.f32.gmra.mxu1 %vm90_vm1, %v3414_v14 }
 0x102   :  { %v114_v15 = vpop.f32.mrf.mxu1 }
 0x10a   :  { %v117_v16 = vpop.f32.mrf.mxu1 }
 0x10b   :  { %141 = vmatpush.msra.mxu2 %v117_v16 }
 0x10d   :  { %142 = vmatpush.msra.mxu2 %v114_v15 }
 0x10e   :  { %2875 = vmatmul.msk.f32.vlgmr.msra.gmra.mxu2 %vm120_vm2, %v47_v17  ;;  %v3312_v17 = vmov 0  }
 0x10f   :  { %281 = vmatpush.msrb.mxu2 %v2884_v18  ;;  %3175 = vset.pattern.permute.xlu1 %v3312_v17  ;;  %v438_v18 = vld [vmem:[%s4296_s7] sm:$0xff] }
 0x110   :  { %3176 = vset.pattern.permute.xlu0 %v3312_v17  ;;  %3177 = vset.pattern.permute.xlu2 %v3312_v17 }
 0x111   :  { %282 = vmatpush.msrb.mxu2 %v2883_v19 }
 0x113   :  { %283 = vmatpush.msrb.mxu2 %v2882_v20 }
 0x115   :  { %284 = vmatpush.msrb.mxu2 %v2881_v21 }
 0x116   :  { %2876 = vmatmul.msk.f32.gmra.mxu2 %vm120_vm2, %v48_v22 }
 0x11e   :  { %2886 = vmatmul.msk.f32.vlgmr.msrb.gmra.mxu2 %vm90_vm1, %v3410_v11 }
 0x126   :  { %2887 = vmatmul.msk.f32.gmra.mxu2 %vm90_vm1, %v3414_v14 }
 0x191   :  { %v144_v23 = vpop.f32.mrf.mxu2 }
 0x192   :  { %v3443_v25 = vadd.f32 %v144_v23, %v3410_v11 }
 0x194   :  { %v173_v29 = vmul.f32 %v3443_v25, %v3443_v25 }
 0x199   :  { %v147_v24 = vpop.f32.mrf.mxu2 }
 0x19a   :  { %v3446_v26 = vadd.f32 %v147_v24, %v3414_v14 }
 0x19c   :  { %167 = vmatpush.msrb.mxu0 %v3446_v26  ;;  %v174_v27 = vmul.f32 %v3446_v26, %v3446_v26 }
 0x19e   :  { %168 = vmatpush.msrb.mxu0 %v3443_v25  ;;  %189 = vmatpush.msra.mxu3 %v174_v27 }
 0x19f   :  { %2877 = vmatmul.msk.f32.vlgmr.msrb.gmra.mxu0 %vm120_vm2, %v3311_v30 }
 0x1a0   :  { %190 = vmatpush.msra.mxu3 %v173_v29  ;;  %248 = vmatpush.msra.mxu0 %v231_v28  ;;  %v3182_v29 = vld [vmem:[%s4295_s6 + $0x5] ss:$0 sm:$0xff] }
 0x1a1   :  { %2878 = vmatmul.msk.f32.vlgmr.msra.gmra.mxu3 %vm120_vm2, %v3311_v30  ;;  %v286_v33 = vpop.f32.mrf.mxu2 }
 0x1a2   :  { %249 = vmatpush.msra.mxu0 %v230_v31  ;;  %314 = vmatpush.msrb.mxu3 %v2891_v32  ;;  %v287_v42 = vadd.f32 %v3178_v39, %v286_v33 }
 0x1a4   :  { %250 = vmatpush.msra.mxu0 %v229_v34  ;;  %315 = vmatpush.msrb.mxu3 %v2890_v35  ;;  %v3183_v34 = vld [vmem:[%s4295_s6 + $0x9] ss:$0 sm:$0xff] }
 0x1a6   :  { %251 = vmatpush.msra.mxu0 %v228_v36  ;;  %316 = vmatpush.msrb.mxu3 %v2889_v37 }
 0x1a7   :  { %2879 = vmatmul.msk.f32.vlgmr.msra.gmra.mxu0 %vm90_vm1, %v3410_v11 }
 0x1a8   :  { %317 = vmatpush.msrb.mxu3 %v2888_v38  ;;  %392 = vmatpush.msrb.mxu0 %v3311_v30 }
 0x1a9   :  { %v289_v40 = vpop.f32.mrf.mxu2  ;;  %2893 = vmatmul.msk.f32.vlgmr.msrb.gmra.mxu3 %vm90_vm1, %v3410_v11 }
 0x1aa   :  { %v290_v41 = vadd.f32 %v3178_v39, %v289_v40  ;;  %393 = vmatpush.msrb.mxu0 %v3311_v30  ;;  %460 = vmatpush.msra.mxu3 %v438_v18  ;;  %v2940_v40 = vld [vmem:[%s4294_s5 + $0x58] sm:$0xff] }
 0x1ac   :  { %2895 = vmatpush.xpose.msk.msrb.mxu1 %vm52_vm0, %v290_v41  ;;  %525 = vmatpush.msra.mxu0 %v2915_v63  ;;  %v2939_v41 = vld [vmem:[%s4294_s5 + $0x50] sm:$0xff]  ;;  %v2945_v63 = vld [vmem:[%s4294_s5 + $0xc8] sm:$0xff] }
 0x1ae   :  { %526 = vmatpush.msra.mxu0 %v2914_v1  ;;  %v2944_v1 = vld [vmem:[%s4294_s5 + $0xc0] sm:$0xff] }
 0x1af   :  { %2880 = vmatmul.msk.f32.gmra.mxu0 %vm90_vm1, %v3414_v14 }
 0x1b0   :  { %2896 = vmatpush.xpose.msk.msrb.mxu1 %vm52_vm0, %v287_v42  ;;  %527 = vmatpush.msra.mxu0 %v2913_v3  ;;  %v2938_v42 = vld [vmem:[%s4294_s5 + $0x48] sm:$0xff] }
 0x1b1   :  { %2894 = vmatmul.msk.f32.gmra.mxu3 %vm90_vm1, %v3414_v14 }
 0x1b2   :  { %528 = vmatpush.msra.mxu0 %v2912_v5 }
 0x1b4   :  { %492 = vmatpush.msra.mxu1 %v2908_v43  ;;  %v2937_v43 = vld [vmem:[%s4294_s5 + $0x40] sm:$0xff] }
 0x1b6   :  { %493 = vmatpush.msra.mxu1 %v2907_v44 }
 0x1b8   :  { %494 = vmatpush.msra.mxu1 %v2906_v45 }
 0x1ba   :  { %495 = vmatpush.msra.mxu1 %v2905_v46 }
 0x21c   :  { %v3509_v47 = vpop.f32.mrf.mxu0 }
 0x224   :  { %v3514_v49 = vpop.f32.mrf.mxu3  ;;  %v253_v50 = vpop.f32.mrf.mxu0 }
 0x225   :  { %v254_v51 = vadd.f32 %v3179_v48, %v253_v50 }
 0x227   :  { %2897 = vmatmul.msk.f32.vlgmr.msrb.gmra.mxu1 %vm52_vm0, %v254_v51 }
 0x228   :  { %636 = vmatpush.msrb.mxu1 %v3311_v30 }
 0x22a   :  { %637 = vmatpush.msrb.mxu1 %v3311_v30 }
 0x22c   :  { %v256_v52 = vpop.f32.mrf.mxu0  ;;  %v319_v53 = vpop.f32.mrf.mxu3 }
 0x22d   :  { %v257_v54 = vadd.f32 %v3179_v48, %v256_v52  ;;  %v320_v58 = vadd.f32 %v3180_v55, %v319_v53  ;;  %v3181_v48 = vld [vmem:[%s4295_s6 + $0x1] ss:$0 sm:$0xff] }
 0x22f   :  { %2898 = vmatmul.msk.f32.gmra.mxu1 %vm52_vm0, %v257_v54 }
 0x234   :  { %v322_v56 = vpop.f32.mrf.mxu3 }
 0x235   :  { %v323_v57 = vadd.f32 %v3180_v55, %v322_v56 }
 0x237   :  { %415 = vmatpush.msra.mxu2 %v323_v57  ;;  %2910 = vmatmul.msk.f32.vlgmr.msra.gmra.mxu1 %vm90_vm1, %v3410_v11 }
 0x239   :  { %416 = vmatpush.msra.mxu2 %v320_v58 }
 0x23b   :  { %558 = vmatpush.msrb.mxu2 %v2922_v0  ;;  %v2952_v0 = vld [vmem:[%s4294_s5 + $0x148] sm:$0xff] }
 0x23d   :  { %559 = vmatpush.msrb.mxu2 %v2921_v2  ;;  %v2951_v2 = vld [vmem:[%s4294_s5 + $0x140] sm:$0xff] }
 0x23f   :  { %2911 = vmatmul.msk.f32.gmra.mxu1 %vm90_vm1, %v3414_v14  ;;  %560 = vmatpush.msrb.mxu2 %v2920_v4 }
 0x241   :  { %561 = vmatpush.msrb.mxu2 %v2919_v6 }
 0x2a4   :  { %v354_v59 = vpop.f32.mrf.mxu1 }
 0x2a5   :  { %v360_v60 = vsel %vm120_vm2, %v354_v59, -inf }
 0x2a6   :  { %361 = vmax.xlane.f32.xlu0 %v360_v60  ;;  %v2954_v60 = vld [vmem:[%s4294_s5 + $0x158] sm:$0xff] }
 0x2ac   :  { %v357_v61 = vpop.f32.mrf.mxu1 }
 0x2ad   :  { %v363_v62 = vsel %vm120_vm2, %v357_v61, -inf }
 0x2ae   :  { %364 = vmax.xlane.f32.xlu0 %v363_v62  ;;  %v2953_v62 = vld [vmem:[%s4294_s5 + $0x150] sm:$0xff] }
 0x2b4   :  { %v497_v46 = vpop.f32.mrf.mxu1 }
 0x2b5   :  { %v498_v50 = vadd.f32 %v3181_v48, %v497_v46 }
 0x2bc   :  { %v500_v51 = vpop.f32.mrf.mxu1 }
 0x2bd   :  { %v501_v52 = vadd.f32 %v3181_v48, %v500_v51 }
 0x319   :  { %v362_v7 = vpop.xlane.xlu0 %361 }
 0x31a   :  { %v366_v8 = vsub.f32 %v354_v59, %v362_v7  ;;  %v2947_v59 = vld [vmem:[%s4294_s5 + $0xd8] sm:$0xff] }
 0x31b   :  { %770 = vmatpush.msra.mxu1 %v2947_v59  ;;  %v2985_v59 = vld [vmem:[%s4294_s5 + $0x170] sm:$0xff] }
 0x31c   :  { %v368_v9 = vmul.f32 1.442695, %v366_v8 }
 0x31e   :  { %3202 = vpow2.f32 %v368_v9 }
 0x321   :  { %v365_v10 = vpop.xlane.xlu0 %364 }
 0x322   :  { %v367_v12 = vsub.f32 %v357_v61, %v365_v10  ;;  %v2946_v61 = vld [vmem:[%s4294_s5 + $0xd0] sm:$0xff] }
 0x323   :  { %771 = vmatpush.msra.mxu1 %v2946_v61  ;;  %v2984_v61 = vld [vmem:[%s4294_s5 + $0x168] sm:$0xff] }
 0x324   :  { %v3203_v13 = vpop.eup %3202  ;;  %v370_v15 = vmul.f32 1.442695, %v367_v12  ;;  %v2934_v12 = vld [vmem:[%s4296_s7 + $0x8] sm:$0xff] }
 0x325   :  { %2899 = vmatmul.msk.f32.vlgmr.msrb.gmra.mxu0 %vm120_vm2, %v3203_v13  ;;  %2901 = vmatmul.msk.f32.vlgmr.msra.gmra.mxu2 %vm120_vm2, %v3203_v13 }
 0x326   :  { %3204 = vpow2.f32 %v370_v15  ;;  %772 = vmatpush.msra.mxu1 %v2945_v63  ;;  %705 = vmatpush.msra.mxu2 %v2934_v12  ;;  %v2983_v63 = vld [vmem:[%s4294_s5 + $0x160] sm:$0xff] }
 0x328   :  { %773 = vmatpush.msra.mxu1 %v2944_v1 }
 0x32c   :  { %v3205_v16 = vpop.eup %3204 }
 0x32d   :  { %2900 = vmatmul.msk.f32.gmra.mxu0 %vm120_vm2, %v3205_v16  ;;  %2902 = vmatmul.msk.f32.gmra.mxu2 %vm120_vm2, %v3205_v16 }
 0x335   :  { %2917 = vmatmul.msk.f32.vlgmr.msra.gmra.mxu0 %vm90_vm1, %v3410_v11  ;;  %2924 = vmatmul.msk.f32.vlgmr.msrb.gmra.mxu2 %vm90_vm1, %v3410_v11 }
 0x33d   :  { %2918 = vmatmul.msk.f32.gmra.mxu0 %vm90_vm1, %v3414_v14  ;;  %2925 = vmatmul.msk.f32.gmra.mxu2 %vm90_vm1, %v3414_v14 }
 0x3a2   :  { %v395_v19 = vpop.f32.mrf.mxu0 }
 0x3a3   :  { %3206 = vrcp.f32 %v395_v19 }
 0x3a8   :  { %v418_v20 = vpop.f32.mrf.mxu2 }
 0x3a9   :  { %v3207_v21 = vpop.eup %3206 }
 0x3aa   :  { %428 = vperm.xlu1 %3175, %v3207_v21   ;;  %v398_v22 = vpop.f32.mrf.mxu0 }
 0x3ab   :  { %3208 = vrcp.f32 %v398_v22  ;;  %v3185_v22 = vld [vmem:[%s4295_s6 + $0x6] ss:$0 sm:$0xff] }
 0x3b0   :  { %v421_v23 = vpop.f32.mrf.mxu2 }
 0x3b1   :  { %v3209_v24 = vpop.eup %3208 }
 0x3b2   :  { %v530_v27 = vpop.f32.mrf.mxu0  ;;  %433 = vperm.xlu1 %3175, %v3209_v24  }
 0x3b3   :  { %v531_v33 = vadd.f32 %v3182_v29, %v530_v27 }
 0x3b8   :  { %v563_v28 = vpop.f32.mrf.mxu2 }
 0x3b9   :  { %v564_v37 = vadd.f32 %v3183_v34, %v563_v28 }
 0x3ba   :  { %v533_v31 = vpop.f32.mrf.mxu0 }
 0x3bb   :  { %v534_v32 = vadd.f32 %v3182_v29, %v533_v31 }
 0x3bd   :  { %2926 = vmatpush.xpose.msk.msrb.mxu3 %vm52_vm0, %v534_v32 }
 0x3c0   :  { %v566_v35 = vpop.f32.mrf.mxu2 }
 0x3c1   :  { %v567_v36 = vadd.f32 %v3183_v34, %v566_v35  ;;  %2927 = vmatpush.xpose.msk.msrb.mxu3 %vm52_vm0, %v531_v33  ;;  %v2972_v35 = vld [vmem:[%s4294_s5 + $0x78] sm:$0xff] }
 0x3c3   :  { %659 = vmatpush.msrb.mxu0 %v567_v36  ;;  %v2971_v36 = vld [vmem:[%s4294_s5 + $0x70] sm:$0xff] }
 0x3c5   :  { %660 = vmatpush.msrb.mxu0 %v564_v37  ;;  %v2970_v37 = vld [vmem:[%s4294_s5 + $0x68] sm:$0xff] }
 0x3c7   :  { %803 = vmatpush.msra.mxu0 %v2954_v60  ;;  %v2977_v60 = vld [vmem:[%s4294_s5 + $0xe8] sm:$0xff] }
 0x3c9   :  { %804 = vmatpush.msra.mxu0 %v2953_v62  ;;  %v2976_v62 = vld [vmem:[%s4294_s5 + $0xe0] sm:$0xff] }
 0x3cb   :  { %805 = vmatpush.msra.mxu0 %v2952_v0 }
 0x3cd   :  { %806 = vmatpush.msra.mxu0 %v2951_v2 }
 0x41c   :  { %v429_v38 = vpop.permute.xlu1 %428 }
 0x41d   :  { %v436_v39 = vmul.f32 %v429_v38, %v418_v20  ;;  %v2969_v38 = vld [vmem:[%s4294_s5 + $0x60] sm:$0xff] }
 0x41f   :  { %2903 = vmatmul.msk.f32.vlgmr.msra.gmra.mxu3 %vm52_vm0, %v436_v39 }
 0x420   :  { %737 = vmatpush.msra.mxu3 %v2940_v40 }
 0x422   :  { %738 = vmatpush.msra.mxu3 %v2939_v41 }
 0x424   :  { %v434_v44 = vpop.permute.xlu1 %433  ;;  %739 = vmatpush.msra.mxu3 %v2938_v42  ;;  %v3184_v42 = vld [vmem:[%s4295_s6 + $0x2] ss:$0 sm:$0xff] }
 0x425   :  { %v437_v45 = vmul.f32 %v434_v44, %v421_v23  ;;  %v3186_v23 = vld [vmem:[%s4295_s6 + $0xa] ss:$0 sm:$0xff] }
 0x426   :  { %740 = vmatpush.msra.mxu3 %v2937_v43 }
 0x427   :  { %2904 = vmatmul.msk.f32.gmra.mxu3 %vm52_vm0, %v437_v45 }
 0x42f   :  { %2928 = vmatmul.msk.f32.vlgmr.msrb.gmra.mxu3 %vm52_vm0, %v498_v50 }
 0x430   :  { %881 = vmatpush.msrb.mxu3 %v3311_v30 }
 0x432   :  { %882 = vmatpush.msrb.mxu3 %v3311_v30 }
 0x437   :  { %2929 = vmatmul.msk.f32.gmra.mxu3 %vm52_vm0, %v501_v52 }
 0x43f   :  { %2942 = vmatmul.msk.f32.vlgmr.msra.gmra.mxu3 %vm90_vm1, %v3410_v11 }
 0x447   :  { %2943 = vmatmul.msk.f32.gmra.mxu3 %vm90_vm1, %v3414_v14 }
 0x4a2   :  { %v3601_v53 = vpop.f32.mrf.mxu3 }
 0x4aa   :  { %v3603_v54 = vpop.f32.mrf.mxu3 }
 0x4b2   :  { %v598_v55 = vpop.f32.mrf.mxu3 }
 0x4b3   :  { %v604_v56 = vsel %vm120_vm2, %v598_v55, -inf }
 0x4b4   :  { %605 = vmax.xlane.f32.xlu2 %v604_v56  ;;  %v2979_v56 = vld [vmem:[%s4294_s5 + $0xf8] sm:$0xff] }
 0x4b5   :  { %1015 = vmatpush.msra.mxu3 %v2979_v56 }
 0x4ba   :  { %v601_v57 = vpop.f32.mrf.mxu3 }
 0x4bb   :  { %v607_v58 = vsel %vm120_vm2, %v601_v57, -inf }
 0x4bc   :  { %608 = vmax.xlane.f32.xlu2 %v607_v58  ;;  %v2978_v58 = vld [vmem:[%s4294_s5 + $0xf0] sm:$0xff] }
 0x4bd   :  { %1016 = vmatpush.msra.mxu3 %v2978_v58 }
 0x4bf   :  { %1017 = vmatpush.msra.mxu3 %v2977_v60 }
 0x4c1   :  { %1018 = vmatpush.msra.mxu3 %v2976_v62 }
 0x4c2   :  { %v742_v41 = vpop.f32.mrf.mxu3 }
 0x4c3   :  { %v743_v43 = vadd.f32 %v3184_v42, %v742_v41 }
 0x4ca   :  { %v745_v44 = vpop.f32.mrf.mxu3 }
 0x4cb   :  { %v746_v45 = vadd.f32 %v3184_v42, %v745_v44 }
 0x527   :  { %v606_v3 = vpop.xlane.xlu2 %605 }
 0x528   :  { %v610_v4 = vsub.f32 %v598_v55, %v606_v3 }
 0x52a   :  { %v612_v5 = vmul.f32 1.442695, %v610_v4 }
 0x52c   :  { %3210 = vpow2.f32 %v612_v5 }
 0x52f   :  { %v609_v6 = vpop.xlane.xlu2 %608 }
 0x530   :  { %v611_v7 = vsub.f32 %v601_v57, %v609_v6  ;;  %v2986_v57 = vld [vmem:[%s4294_s5 + $0x178] sm:$0xff] }
 0x532   :  { %v3211_v8 = vpop.eup %3210  ;;  %v614_v9 = vmul.f32 1.442695, %v611_v7 }
 0x533   :  { %2930 = vmatmul.msk.f32.vlgmr.msrb.gmra.mxu1 %vm120_vm2, %v3211_v8  ;;  %2932 = vmatmul.msk.f32.vlgmr.msrb.gmra.mxu0 %vm120_vm2, %v3211_v8  ;;  %v2966_v8 = vld [vmem:[%s4296_s7 + $0x10] sm:$0xff] }
 0x534   :  { %3212 = vpow2.f32 %v614_v9  ;;  %950 = vmatpush.msrb.mxu0 %v2966_v8  ;;  %v469_v8 = vadd.f32 %v3603_v54, %v3414_v14 }
 0x53a   :  { %v3213_v10 = vpop.eup %3212 }
 0x53b   :  { %2931 = vmatmul.msk.f32.gmra.mxu1 %vm120_vm2, %v3213_v10  ;;  %2933 = vmatmul.msk.f32.gmra.mxu0 %vm120_vm2, %v3213_v10 }
 0x543   :  { %2949 = vmatmul.msk.f32.vlgmr.msra.gmra.mxu1 %vm90_vm1, %v3410_v11  ;;  %2956 = vmatmul.msk.f32.vlgmr.msra.gmra.mxu0 %vm90_vm1, %v3410_v11 }
 0x54b   :  { %2950 = vmatmul.msk.f32.gmra.mxu1 %vm90_vm1, %v3414_v14  ;;  %2957 = vmatmul.msk.f32.gmra.mxu0 %vm90_vm1, %v3414_v14 }
 0x5b0   :  { %v639_v13 = vpop.f32.mrf.mxu1  ;;  %v662_v15 = vpop.f32.mrf.mxu0 }
 0x5b1   :  { %3214 = vrcp.f32 %v639_v13 }
 0x5b7   :  { %v3215_v16 = vpop.eup %3214 }
 0x5b8   :  { %672 = vperm.xlu0 %3176, %v3215_v16   ;;  %v642_v17 = vpop.f32.mrf.mxu1  ;;  %v665_v18 = vpop.f32.mrf.mxu0 }
 0x5b9   :  { %3216 = vrcp.f32 %v642_v17 }
 0x5bf   :  { %v3217_v19 = vpop.eup %3216 }
 0x5c0   :  { %v775_v20 = vpop.f32.mrf.mxu1  ;;  %v808_v21 = vpop.f32.mrf.mxu0  ;;  %677 = vperm.xlu1 %3175, %v3217_v19   ;;  %v3188_v19 = vld [vmem:[%s4295_s6 + $0xb] ss:$0 sm:$0xff] }
 0x5c1   :  { %v809_v31 = vadd.f32 %v3186_v23, %v808_v21  ;;  %v776_v32 = vadd.f32 %v3185_v22, %v775_v20 }
 0x5c8   :  { %v778_v24 = vpop.f32.mrf.mxu1  ;;  %v811_v27 = vpop.f32.mrf.mxu0 }
 0x5c9   :  { %v779_v28 = vadd.f32 %v3185_v22, %v778_v24  ;;  %v812_v29 = vadd.f32 %v3186_v23, %v811_v27  ;;  %v3189_v23 = vld [vmem:[%s4295_s6 + $0x7] ss:$0 sm:$0xff] }
 0x5cb   :  { %2958 = vmatpush.xpose.msk.msrb.mxu2 %vm52_vm0, %v779_v28  ;;  %904 = vmatpush.msrb.mxu1 %v812_v29 }
 0x5cd   :  { %905 = vmatpush.msrb.mxu1 %v809_v31 }
 0x5cf   :  { %2959 = vmatpush.xpose.msk.msrb.mxu2 %vm52_vm0, %v776_v32  ;;  %1048 = vmatpush.msra.mxu1 %v2986_v57 }
 0x5d1   :  { %1049 = vmatpush.msra.mxu1 %v2985_v59  ;;  %v2998_v59 = vld [vmem:[%s4296_s7 + $0x18] sm:$0xff] }
 0x5d3   :  { %1050 = vmatpush.msra.mxu1 %v2984_v61 }
 0x5d5   :  { %1051 = vmatpush.msra.mxu1 %v2983_v63 }
 0x62a   :  { %v673_v33 = vpop.permute.xlu0 %672 }
 0x62b   :  { %v680_v34 = vmul.f32 %v673_v33, %v662_v15 }
 0x62d   :  { %2935 = vmatmul.msk.f32.vlgmr.msra.gmra.mxu2 %vm52_vm0, %v680_v34 }
 0x62e   :  { %982 = vmatpush.msra.mxu2 %v2972_v35  ;;  %v3187_v35 = vld [vmem:[%s4295_s6 + $0x3] ss:$0 sm:$0xff] }
 0x630   :  { %983 = vmatpush.msra.mxu2 %v2971_v36 }
 0x632   :  { %v678_v39 = vpop.permute.xlu1 %677  ;;  %984 = vmatpush.msra.mxu2 %v2970_v37 }
 0x633   :  { %v681_v40 = vmul.f32 %v678_v39, %v665_v18 }
 0x634   :  { %985 = vmatpush.msra.mxu2 %v2969_v38 }
 0x635   :  { %2936 = vmatmul.msk.f32.gmra.mxu2 %vm52_vm0, %v681_v40 }
 0x63d   :  { %2960 = vmatmul.msk.f32.vlgmr.msrb.gmra.mxu2 %vm52_vm0, %v743_v43 }
 0x63e   :  { %1126 = vmatpush.msrb.mxu2 %v3311_v30 }
 0x640   :  { %1127 = vmatpush.msrb.mxu2 %v3311_v30 }
 0x645   :  { %2961 = vmatmul.msk.f32.gmra.mxu2 %vm52_vm0, %v746_v45 }
 0x64d   :  { %2974 = vmatmul.msk.f32.vlgmr.msra.gmra.mxu2 %vm90_vm1, %v3410_v11 }
 0x655   :  { %2975 = vmatmul.msk.f32.gmra.mxu2 %vm90_vm1, %v3414_v14 }
 0x6b0   :  { %v3679_v46 = vpop.f32.mrf.mxu2 }
 0x6b8   :  { %v3681_v48 = vpop.f32.mrf.mxu2 }
 0x6c0   :  { %v843_v50 = vpop.f32.mrf.mxu2 }
 0x6c1   :  { %v849_v51 = vsel %vm120_vm2, %v843_v50, -inf }
 0x6c2   :  { %850 = vmax.xlane.f32.xlu2 %v849_v51 }
 0x6c8   :  { %v846_v52 = vpop.f32.mrf.mxu2 }
 0x6c9   :  { %v852_v55 = vsel %vm120_vm2, %v846_v52, -inf }
 0x6ca   :  { %853 = vmax.xlane.f32.xlu1 %v852_v55 }
 0x6d0   :  { %v987_v34 = vpop.f32.mrf.mxu2 }
 0x6d1   :  { %v988_v36 = vadd.f32 %v3187_v35, %v987_v34 }
 0x6d8   :  { %v990_v37 = vpop.f32.mrf.mxu2 }
 0x6d9   :  { %v991_v38 = vadd.f32 %v3187_v35, %v990_v37  ;;  %v1286_v37 = vld [vmem:[%s4297_s8 + $0x8] sm:$0xff] }
 0x735   :  { %v851_v0 = vpop.xlane.xlu2 %850 }
 0x736   :  { %v855_v1 = vsub.f32 %v843_v50, %v851_v0 }
 0x738   :  { %v857_v2 = vmul.f32 1.442695, %v855_v1 }
 0x73a   :  { %3218 = vpow2.f32 %v857_v2 }
 0x73d   :  { %v854_v3 = vpop.xlane.xlu1 %853 }
 0x73e   :  { %v856_v4 = vsub.f32 %v846_v52, %v854_v3 }
 0x740   :  { %v3219_v5 = vpop.eup %3218  ;;  %v859_v6 = vmul.f32 1.442695, %v856_v4 }
 0x741   :  { %2962 = vmatmul.msk.f32.vlgmr.msrb.gmra.mxu3 %vm120_vm2, %v3219_v5  ;;  %2964 = vmatmul.msk.f32.vlgmr.msrb.gmra.mxu1 %vm120_vm2, %v3219_v5 }
 0x742   :  { %3220 = vpow2.f32 %v859_v6  ;;  %1195 = vmatpush.msrb.mxu1 %v2998_v59 }
 0x748   :  { %v3221_v7 = vpop.eup %3220 }
 0x749   :  { %2963 = vmatmul.msk.f32.gmra.mxu3 %vm120_vm2, %v3221_v7  ;;  %2965 = vmatmul.msk.f32.gmra.mxu1 %vm120_vm2, %v3221_v7  ;;  %v468_v7 = vadd.f32 %v3601_v53, %v3410_v11 }
 0x751   :  { %2981 = vmatmul.msk.f32.vlgmr.msra.gmra.mxu3 %vm90_vm1, %v3410_v11  ;;  %2988 = vmatmul.msk.f32.vlgmr.msra.gmra.mxu1 %vm90_vm1, %v3410_v11 }
 0x759   :  { %2982 = vmatmul.msk.f32.gmra.mxu3 %vm90_vm1, %v3414_v14  ;;  %2989 = vmatmul.msk.f32.gmra.mxu1 %vm90_vm1, %v3414_v14 }
 0x7be   :  { %v907_v9 = vpop.f32.mrf.mxu1 }
 0x7c4   :  { %v884_v10 = vpop.f32.mrf.mxu3 }
 0x7c5   :  { %3222 = vrcp.f32 %v884_v10  ;;  %v714_v10 = vadd.f32 %v3681_v48, %v469_v8  ;;  %v196_v48 = vmul.f32 0.0625, %v3514_v49  ;;  %v1287_v49 = vld [vmem:[%s4297_s8 + $0x10] sm:$0xff] }
 0x7c6   :  { %v910_v12 = vpop.f32.mrf.mxu1 }
 0x7cb   :  { %v3223_v13 = vpop.eup %3222 }
 0x7cc   :  { %917 = vperm.xlu2 %3177, %v3223_v13   ;;  %v887_v15 = vpop.f32.mrf.mxu3  ;;  %v3759_v13 = vld [vmem:[%s4300_s11] sm:$0xff] }
 0x7cd   :  { %3224 = vrcp.f32 %v887_v15 }
 0x7ce   :  { %v1053_v16 = vpop.f32.mrf.mxu1 }
 0x7cf   :  { %v1054_v22 = vadd.f32 %v3188_v19, %v1053_v16 }
 0x7d3   :  { %v3225_v17 = vpop.eup %3224 }
 0x7d4   :  { %v1020_v18 = vpop.f32.mrf.mxu3  ;;  %922 = vperm.xlu2 %3177, %v3225_v17   ;;  %v1205_v17 = vperm.slane %v3759_v13, 0 }
 0x7d5   :  { %v1021_v28 = vadd.f32 %v3189_v23, %v1020_v18 }
 0x7d6   :  { %v1056_v20 = vpop.f32.mrf.mxu1 }
 0x7d7   :  { %v1057_v21 = vadd.f32 %v3188_v19, %v1056_v20 }
 0x7d9   :  { %1149 = vmatpush.msrb.mxu3 %v1057_v21 }
 0x7db   :  { %1150 = vmatpush.msrb.mxu3 %v1054_v22 }
 0x7dc   :  { %v1023_v24 = vpop.f32.mrf.mxu3 }
 0x7dd   :  { %v1024_v27 = vadd.f32 %v3189_v23, %v1023_v24 }
 0x7df   :  { %2990 = vmatpush.xpose.msk.msra.mxu0 %vm52_vm0, %v1024_v27 }
 0x7e3   :  { %2991 = vmatpush.xpose.msk.msra.mxu0 %vm52_vm0, %v1021_v28 }
 0x826   :  { %v918_v29 = vpop.permute.xlu2 %917 }
 0x827   :  { %v925_v31 = vmul.f32 %v918_v29, %v907_v9  ;;  %v713_v9 = vadd.f32 %v3679_v46, %v468_v7  ;;  %v195_v46 = vmul.f32 0.0625, %v3509_v47  ;;  %v1288_v47 = vld [vmem:[%s4297_s8 + $0x18] sm:$0xff] }
 0x828   :  { %1308 = vmatpush.msra.mxu3 %v1288_v47 }
 0x829   :  { %2967 = vmatmul.msk.f32.vlgmr.msrb.gmra.mxu0 %vm52_vm0, %v925_v31  ;;  %v197_v20 = vmul.f32 %v195_v46, %v195_v46 }
 0x82a   :  { %1309 = vmatpush.msra.mxu3 %v1287_v49 }
 0x82b   :  { %v198_v21 = vsub.f32 %v196_v48, %v197_v20 }
 0x82c   :  { %1310 = vmatpush.msra.mxu3 %v1286_v37 }
 0x82d   :  { %v199_v22 = vadd.f32 1e-05, %v198_v21 }
 0x82e   :  { %v923_v32 = vpop.permute.xlu2 %922 }
 0x82f   :  { %v926_v33 = vmul.f32 %v923_v32, %v910_v12  ;;  %vm206_vm4 = vweird.f32 %v199_v22 }
 0x831   :  { %2968 = vmatmul.msk.f32.gmra.mxu0 %vm52_vm0, %v926_v33 }
 0x839   :  { %2992 = vmatmul.msk.f32.vlgmr.msra.gmra.mxu0 %vm52_vm0, %v988_v36 }
 0x841   :  { %2993 = vmatmul.msk.f32.gmra.mxu0 %vm52_vm0, %v991_v38 }
 0x8a6   :  { %v952_v39 = vpop.f32.mrf.mxu0 }
 0x8a7   :  { %v958_v12 = vadd.f32 %v952_v39, %v713_v9 }
 0x8ae   :  { %v955_v40 = vpop.f32.mrf.mxu0 }
 0x8af   :  { %v959_v15 = vadd.f32 %v955_v40, %v714_v10  ;;  %v1285_v40 = vld [vmem:[%s4297_s8] sm:$0xff] }
 0x8b0   :  { %1311 = vmatpush.msra.mxu3 %v1285_v40  ;;  %v3014_v40 = vld [vmem:[%s4293_s4 + $0x38] sm:$0xff] }
 0x8b6   :  { %v1088_v41 = vpop.f32.mrf.mxu0 }
 0x8b7   :  { %v1094_v42 = vsel %vm120_vm2, %v1088_v41, -inf }
 0x8b8   :  { %1095 = vmax.xlane.f32.xlu0 %v1094_v42 }
 0x8be   :  { %v1091_v43 = vpop.f32.mrf.mxu0 }
 0x8bf   :  { %v1097_v44 = vsel %vm120_vm2, %v1091_v43, -inf }
 0x8c0   :  { %1098 = vmax.xlane.f32.xlu2 %v1097_v44 }
 0x92b   :  { %v1096_v45 = vpop.xlane.xlu0 %1095 }
 0x92c   :  { %v1100_v50 = vsub.f32 %v1088_v41, %v1096_v45 }
 0x92e   :  { %v1102_v51 = vmul.f32 1.442695, %v1100_v50 }
 0x930   :  { %3226 = vpow2.f32 %v1102_v51 }
 0x933   :  { %v1099_v52 = vpop.xlane.xlu2 %1098 }
 0x934   :  { %v1101_v55 = vsub.f32 %v1091_v43, %v1099_v52 }
 0x936   :  { %v3227_v56 = vpop.eup %3226  ;;  %v1104_v57 = vmul.f32 1.442695, %v1101_v55  ;;  %v1328_v55 = vld [vmem:[%s4298_s9 + $0x38] sm:$0xff] }
 0x937   :  { %2994 = vmatmul.msk.f32.vlgmr.msrb.gmra.mxu2 %vm120_vm2, %v3227_v56  ;;  %2996 = vmatmul.msk.f32.vlgmr.msrb.gmra.mxu3 %vm120_vm2, %v3227_v56  ;;  %v1327_v56 = vld [vmem:[%s4298_s9 + $0x30] sm:$0xff] }
 0x938   :  { %3228 = vpow2.f32 %v1104_v57  ;;  %1344 = vmatpush.msra.mxu1 %v1328_v55 }
 0x93a   :  { %1345 = vmatpush.msra.mxu1 %v1327_v56  ;;  %v3038_v56 = vld [vmem:[%s4294_s5 + $0x298] sm:$0xff] }
 0x93e   :  { %v3229_v58 = vpop.eup %3228 }
 0x93f   :  { %2995 = vmatmul.msk.f32.gmra.mxu2 %vm120_vm2, %v3229_v58  ;;  %2997 = vmatmul.msk.f32.gmra.mxu3 %vm120_vm2, %v3229_v58  ;;  %v1326_v58 = vld [vmem:[%s4298_s9 + $0x28] sm:$0xff] }
 0x940   :  { %1346 = vmatpush.msra.mxu1 %v1326_v58 }
 0x9ba   :  { %v1129_v60 = vpop.f32.mrf.mxu2  ;;  %v1152_v0 = vpop.f32.mrf.mxu3 }
 0x9bb   :  { %3230 = vrcp.f32 %v1129_v60 }
 0x9c1   :  { %v3231_v61 = vpop.eup %3230 }
 0x9c2   :  { %1162 = vperm.xlu1 %3175, %v3231_v61   ;;  %v1132_v62 = vpop.f32.mrf.mxu2  ;;  %v1155_v3 = vpop.f32.mrf.mxu3  ;;  %v1325_v61 = vld [vmem:[%s4298_s9 + $0x20] sm:$0xff] }
 0x9c3   :  { %3232 = vrcp.f32 %v1132_v62  ;;  %1347 = vmatpush.msra.mxu1 %v1325_v61  ;;  %v3035_v61 = vld [vmem:[%s4294_s5 + $0x280] sm:$0xff] }
 0x9c4   :  { %3234 = vrsqrt.f32 %v199_v22 }
 0x9c9   :  { %v3233_v63 = vpop.eup %3232 }
 0x9ca   :  { %1167 = vperm.xlu1 %3175, %v3233_v63   ;;  %v3235_v23 = vpop.eup %3234 }
 0x9cb   :  { %v201_v24 = vmul.f32 %v3235_v23, %v199_v22  ;;  %vm207_vm3 = vweird.f32 %v3235_v23 }
 0x9cc   :  { %vm208_vm5 = vmor %vm206_vm4, %vm207_vm3 }
 0x9cd   :  { %v202_v27 = vmul.f32 %v3235_v23, %v201_v24 }
 0x9cf   :  { %v203_v31 = vmul.f32 0.5, %v202_v27 }
 0x9d1   :  { %v204_v33 = vsub.f32 1.5, %v203_v31 }
 0x9d3   :  { %v205_v38 = vmul.f32 %v3235_v23, %v204_v33 }
 0x9d5   :  { %v209_v41 = vsel %vm208_vm5, %v3235_v23, %v205_v38 }
 0x9d6   :  { %v211_v42 = vrot.slane %v209_v41, 5 }
 0x9d8   :  { %v213_v45 = vmul.f32 %v211_v42, %v3759_v13 }
 0x9da   :  { %v218_v52 = vrot.slane %v213_v45, 3 }
 0x9dc   :  { %v220_v60 = vmul.f32 %v218_v52, %v195_v46 }
 0xa34   :  { %v1163_v1 = vpop.permute.xlu1 %1162 }
 0xa35   :  { %v1170_v2 = vmul.f32 %v1163_v1, %v1152_v0  ;;  %v1324_v0 = vld [vmem:[%s4298_s9 + $0x18] sm:$0xff] }
 0xa36   :  { %1348 = vmatpush.msra.mxu1 %v1324_v0 }
 0xa37   :  { %2999 = vmatmul.msk.f32.vlgmr.msrb.gmra.mxu1 %vm52_vm0, %v1170_v2  ;;  %v222_v2 = vrot.slane %v220_v60, 4 }
 0xa3c   :  { %v1168_v4 = vpop.permute.xlu1 %1167 }
 0xa3d   :  { %v1171_v5 = vmul.f32 %v1168_v4, %v1155_v3 }
 0xa3f   :  { %3000 = vmatmul.msk.f32.gmra.mxu1 %vm52_vm0, %v1171_v5  ;;  %v224_v5 = vsub.f32 %v3759_v13, %v222_v2 }
 0xa41   :  { %v225_v9 = vperm.slane %v224_v5, 4 }
 0xab4   :  { %v1197_v6 = vpop.f32.mrf.mxu1 }
 0xab5   :  { %v1203_v16 = vadd.f32 %v1197_v6, %v958_v12  ;;  %v214_v6 = vperm.slane %v213_v45, 3  ;;  %v3012_v45 = vld [vmem:[%s4293_s4 + $0x28] sm:$0xff] }
 0xab7   :  { %v3762_v11 = vadd.f32 %v1205_v17, %v1203_v16  ;;  %v215_v12 = vmul.f32 %v214_v6, %v3443_v25  ;;  %v1323_v25 = vld [vmem:[%s4298_s9 + $0x10] sm:$0xff] }
 0xab8   :  { %1349 = vmatpush.msra.mxu1 %v1323_v25  ;;  %v3024_v25 = vld [vmem:[%s4294_s5 + $0x198] sm:$0xff] }
 0xab9   :  { %v1228_v54 = vmul.f32 %v3762_v11, %v3762_v11 }
 0xabc   :  { %v1200_v18 = vpop.f32.mrf.mxu1 }
 0xabd   :  { %v1204_v19 = vadd.f32 %v1200_v18, %v959_v15 }
 0xabf   :  { %v3764_v53 = vadd.f32 %v1205_v17, %v1204_v19  ;;  %v226_v17 = vadd.f32 %v225_v9, %v215_v12 }
 0xac1   :  { %v1229_v14 = vmul.f32 %v3764_v53, %v3764_v53  ;;  %1222 = vmatpush.msrb.mxu0 %v3764_v53 }
 0xac3   :  { %1223 = vmatpush.msrb.mxu0 %v3762_v11  ;;  %1244 = vmatpush.msra.mxu2 %v1229_v14 }
 0xac4   :  { %3001 = vmatmul.msk.f32.vlgmr.msrb.gmra.mxu0 %vm120_vm2, %v3311_v30 }
 0xac5   :  { %1245 = vmatpush.msra.mxu2 %v1228_v54  ;;  %v216_v54 = vmul.f32 %v214_v6, %v3446_v26  ;;  %v1289_v26 = vperm.slane %v3759_v13, 1 }
 0xac6   :  { %3002 = vmatmul.msk.f32.vlgmr.msra.gmra.mxu2 %vm120_vm2, %v3311_v30 }
 0xac7   :  { %v227_v48 = vadd.f32 %v225_v9, %v216_v54 }
 0xb41   :  { %v1225_v28 = vpop.f32.mrf.mxu0 }
 0xb42   :  { %v1250_v29 = vmul.f32 0.0625, %v1225_v28 }
 0xb44   :  { %v1252_v32 = vmul.f32 %v1250_v29, %v1250_v29 }
 0xb49   :  { %v1247_v34 = vpop.f32.mrf.mxu2 }
 0xb4a   :  { %v1251_v35 = vmul.f32 0.0625, %v1247_v34 }
 0xb4c   :  { %v1253_v36 = vsub.f32 %v1251_v35, %v1252_v32  ;;  %v1361_v32 = vperm.slane %v3759_v13, 2 }
 0xb4e   :  { %v1254_v39 = vadd.f32 1e-05, %v1253_v36 }
 0xb50   :  { %3236 = vrsqrt.f32 %v1254_v39  ;;  %vm1261_vm7 = vweird.f32 %v1254_v39 }
 0xb56   :  { %v3237_v43 = vpop.eup %3236 }
 0xb57   :  { %v1256_v44 = vmul.f32 %v3237_v43, %v1254_v39  ;;  %vm1262_vm6 = vweird.f32 %v3237_v43 }
 0xb58   :  { %vm1263_vm8 = vmor %vm1261_vm7, %vm1262_vm6 }
 0xb59   :  { %v1257_v50 = vmul.f32 %v3237_v43, %v1256_v44 }
 0xb5b   :  { %v1258_v51 = vmul.f32 0.5, %v1257_v50 }
 0xb5d   :  { %v1259_v57 = vsub.f32 1.5, %v1258_v51  ;;  %v3011_v51 = vld [vmem:[%s4293_s4 + $0x20] sm:$0xff] }
 0xb5f   :  { %v1260_v59 = vmul.f32 %v3237_v43, %v1259_v57  ;;  %v3037_v57 = vld [vmem:[%s4294_s5 + $0x290] sm:$0xff] }
 0xb61   :  { %v1264_v62 = vsel %vm1263_vm8, %v3237_v43, %v1260_v59  ;;  %v3013_v43 = vld [vmem:[%s4293_s4 + $0x30] sm:$0xff]  ;;  %v3036_v59 = vld [vmem:[%s4294_s5 + $0x288] sm:$0xff]  ;;  %vm2841_vm8 = vcmask 25600  }
 0xb62   :  { %v1266_v63 = vrot.slane %v1264_v62, 3 }
 0xb64   :  { %v1268_v1 = vmul.f32 %v1266_v63, %v3759_v13 }
 0xb66   :  { %v1273_v3 = vrot.slane %v1268_v1, 5  ;;  %v1269_v7 = vperm.slane %v1268_v1, 5 }
 0xb68   :  { %v1275_v4 = vmul.f32 %v1273_v3, %v1250_v29  ;;  %v1270_v15 = vmul.f32 %v1269_v7, %v3762_v11  ;;  %v1271_v14 = vmul.f32 %v1269_v7, %v3764_v53  ;;  %v1322_v11 = vld [vmem:[%s4298_s9 + $0x8] sm:$0xff]  ;;  %v1321_v53 = vld [vmem:[%s4298_s9] sm:$0xff] }
 0xb69   :  { %1350 = vmatpush.msra.mxu1 %v1322_v11 }
 0xb6a   :  { %v1277_v8 = vrot.slane %v1275_v4, 2  ;;  %v85_v4 = vld [vmem:[%s4300_s11 + $0x8] sm:$0x1] }
 0xb6b   :  { %1351 = vmatpush.msra.mxu1 %v1321_v53  ;;  %v3031_v53 = vld [vmem:[%s4294_s5 + $0x218] sm:$0xff] }
 0xb6c   :  { %v1279_v10 = vsub.f32 %v3759_v13, %v1277_v8 }
 0xb6e   :  { %v1280_v16 = vperm.slane %v1279_v10, 6 }
 0xb70   :  { %v1281_v18 = vadd.f32 %v1280_v16, %v1270_v15  ;;  %v1282_v46 = vadd.f32 %v1280_v16, %v1271_v14 }
 0xb72   :  { %v1283_v19 = vadd.f32 %v1281_v18, %v226_v17  ;;  %v1284_v20 = vadd.f32 %v1282_v46, %v227_v48  ;;  %v3282_v17 = vld [vmem:[%s4290_s1] sm:$0xff]  ;;  %v3283_v18 = vld [vmem:[%s4290_s1 + $0x8] sm:$0xff] }
 0xb74   :  { %3003 = vmatmul.msk.f32.vlgmr.msra.gmra.mxu3 %vm90_vm1, %v1283_v19 }
 0xb7c   :  { %3004 = vmatmul.msk.f32.gmra.mxu3 %vm90_vm1, %v1284_v20 }
 0xbf7   :  { %v1313_v21 = vpop.f32.mrf.mxu3 }
 0xbf8   :  { %v1314_v22 = vadd.f32 %v1313_v21, %v1289_v26  ;;  %v3030_v21 = vld [vmem:[%s4294_s5 + $0x210] sm:$0xff] }
 0xbfa   :  { %v1319_v23 = vmax.f32 %v1314_v22, 0.0  ;;  %v3022_v22 = vld [vmem:[%s4294_s5 + $0x188] sm:$0xff] }
 0xbfc   :  { %3005 = vmatmul.msk.f32.vlgmr.msra.gmra.mxu1 %vm1329_vm9, %v1319_v23  ;;  %v3029_v23 = vld [vmem:[%s4294_s5 + $0x208] sm:$0xff] }
 0xbff   :  { %v1316_v24 = vpop.f32.mrf.mxu3 }
 0xc00   :  { %v1317_v27 = vadd.f32 %v1316_v24, %v1289_v26  ;;  %v3023_v26 = vld [vmem:[%s4294_s5 + $0x190] sm:$0xff]  ;;  %v3021_v24 = vld [vmem:[%s4294_s5 + $0x180] sm:$0xff] }
 0xc02   :  { %v1320_v28 = vmax.f32 %v1317_v27, 0.0 }
 0xc04   :  { %3006 = vmatmul.msk.f32.gmra.mxu1 %vm1329_vm9, %v1320_v28  ;;  %v3190_v28 = vld [vmem:[%s4295_s6 + $0x14] ss:$0 sm:$0xff] }
 0xc79   :  { %v1353_v29 = vpop.f32.mrf.mxu1 }
 0xc7a   :  { %v1359_v31 = vadd.f32 %v1353_v29, %v1283_v19  ;;  %v3028_v29 = vld [vmem:[%s4294_s5 + $0x200] sm:$0xff] }
 0xc7c   :  { %v1362_v35 = vadd.f32 %v1361_v32, %v1359_v31 }
 0xc7e   :  { %v1384_v36 = vmul.f32 %v1362_v35, %v1362_v35 }
 0xc81   :  { %v1356_v33 = vpop.f32.mrf.mxu1 }
 0xc82   :  { %v1360_v34 = vadd.f32 %v1356_v33, %v1284_v20 }
 0xc84   :  { %v1363_v47 = vadd.f32 %v1361_v32, %v1360_v34 }
 0xc86   :  { %v1385_v49 = vmul.f32 %v1363_v47, %v1363_v47  ;;  %1378 = vmatpush.msra.mxu0 %v1363_v47 }
 0xc88   :  { %1379 = vmatpush.msra.mxu0 %v1362_v35  ;;  %1400 = vmatpush.msrb.mxu2 %v1385_v49 }
 0xc89   :  { %3007 = vmatmul.msk.f32.vlgmr.msra.gmra.mxu0 %vm120_vm2, %v3311_v30 }
 0xc8a   :  { %1401 = vmatpush.msrb.mxu2 %v1384_v36  ;;  %1462 = vmatpush.msrb.mxu0 %v3014_v40 }
 0xc8b   :  { %3008 = vmatmul.msk.f32.vlgmr.msrb.gmra.mxu2 %vm120_vm2, %v3311_v30 }
 0xc8c   :  { %1463 = vmatpush.msrb.mxu0 %v3013_v43 }
 0xc8e   :  { %1464 = vmatpush.msrb.mxu0 %v3012_v45  ;;  %v3192_v45 = vld [vmem:[%s4295_s6 + $0xc] ss:$0 sm:$0xff] }
 0xc90   :  { %1465 = vmatpush.msrb.mxu0 %v3011_v51 }
 0xc92   :  { %1659 = vmatpush.msra.mxu0 %v3038_v56 }
 0xc94   :  { %1660 = vmatpush.msra.mxu0 %v3037_v57  ;;  %v3055_v57 = vld [vmem:[%s4294_s5 + $0x1b0] sm:$0xff] }
 0xc96   :  { %1661 = vmatpush.msra.mxu0 %v3036_v59  ;;  %v3054_v59 = vld [vmem:[%s4294_s5 + $0x1a8] sm:$0xff] }
 0xc98   :  { %1662 = vmatpush.msra.mxu0 %v3035_v61  ;;  %v3053_v61 = vld [vmem:[%s4294_s5 + $0x1a0] sm:$0xff] }
 0xd06   :  { %v1381_v37 = vpop.f32.mrf.mxu0 }
 0xd07   :  { %v1406_v38 = vmul.f32 0.0625, %v1381_v37 }
 0xd09   :  { %v1408_v39 = vmul.f32 %v1406_v38, %v1406_v38 }
 0xd0e   :  { %v1403_v41 = vpop.f32.mrf.mxu2 }
 0xd0f   :  { %v1407_v42 = vmul.f32 0.0625, %v1403_v41 }
 0xd11   :  { %v1409_v44 = vsub.f32 %v1407_v42, %v1408_v39  ;;  %v3191_v39 = vld [vmem:[%s4295_s6 + $0x10] ss:$0 sm:$0xff] }
 0xd13   :  { %v1410_v50 = vadd.f32 1e-05, %v1409_v44 }
 0xd15   :  { %3238 = vrsqrt.f32 %v1410_v50  ;;  %vm1417_vm11 = vweird.f32 %v1410_v50 }
 0xd1b   :  { %v3239_v52 = vpop.eup %3238 }
 0xd1c   :  { %v1412_v55 = vmul.f32 %v3239_v52, %v1410_v50  ;;  %vm1418_vm10 = vweird.f32 %v3239_v52 }
 0xd1d   :  { %vm1419_vm12 = vmor %vm1417_vm11, %vm1418_vm10 }
 0xd1e   :  { %v1413_v58 = vmul.f32 %v3239_v52, %v1412_v55 }
 0xd20   :  { %v1414_v60 = vmul.f32 0.5, %v1413_v58 }
 0xd22   :  { %v1415_v62 = vsub.f32 1.5, %v1414_v60 }
 0xd24   :  { %v1416_v63 = vmul.f32 %v3239_v52, %v1415_v62  ;;  %v3957_v62 = vld [vmem:[%s4300_s11 + $0x10] sm:$0xff] }
 0xd26   :  { %v1420_v0 = vsel %vm1419_vm12, %v3239_v52, %v1416_v63  ;;  %v3056_v52 = vld [vmem:[%s4294_s5 + $0x1b8] sm:$0xff] }
 0xd27   :  { %v1422_v1 = vrot.slane %v1420_v0, 1 }
 0xd29   :  { %v1424_v2 = vmul.f32 %v1422_v1, %v3759_v13 }
 0xd2b   :  { %v1429_v3 = vrot.slane %v1424_v2, 7  ;;  %v1425_v5 = vperm.slane %v1424_v2, 7 }
 0xd2d   :  { %v1431_v6 = vmul.f32 %v1429_v3, %v1406_v38  ;;  %v1426_v8 = vmul.f32 %v1425_v5, %v1362_v35  ;;  %v1427_v12 = vmul.f32 %v1425_v5, %v1363_v47 }
 0xd2f   :  { %v1432_v7 = vsub.f32 %v85_v4, %v1431_v6 }
 0xd31   :  { %v1433_v9 = vperm.slane %v1432_v7, 0 }
 0xd33   :  { %v3860_v10 = vadd.f32 %v1433_v9, %v1426_v8  ;;  %v3864_v15 = vadd.f32 %v1433_v9, %v1427_v12 }
 0xd35   :  { %3015 = vmatmul.msk.f32.vlgmr.msrb.gmra.mxu0 %vm90_vm1, %v3860_v10 }
 0xd3d   :  { %3016 = vmatmul.msk.f32.gmra.mxu0 %vm90_vm1, %v3864_v15 }
 0xd45   :  { %3040 = vmatmul.msk.f32.vlgmr.msra.gmra.mxu0 %vm90_vm1, %v3860_v10 }
 0xd4d   :  { %3041 = vmatmul.msk.f32.gmra.mxu0 %vm90_vm1, %v3864_v15 }
 0xdb2   :  { %v1467_v13 = vpop.f32.mrf.mxu0 }
 0xdba   :  { %v1470_v16 = vpop.f32.mrf.mxu0 }
 0xdbb   :  { %1487 = vmatpush.msra.mxu2 %v1470_v16 }
 0xdbd   :  { %1488 = vmatpush.msra.mxu2 %v1467_v13 }
 0xdbe   :  { %3017 = vmatmul.msk.f32.vlgmr.msra.gmra.mxu2 %vm120_vm2, %v3282_v17 }
 0xdc2   :  { %v1664_v54 = vpop.f32.mrf.mxu0 }
 0xdc3   :  { %v1665_v32 = vadd.f32 %v3190_v28, %v1664_v54 }
 0xdc6   :  { %3018 = vmatmul.msk.f32.gmra.mxu2 %vm120_vm2, %v3283_v18 }
 0xdca   :  { %v1667_v27 = vpop.f32.mrf.mxu0 }
 0xdcb   :  { %v1668_v31 = vadd.f32 %v3190_v28, %v1667_v27 }
 0xe41   :  { %v1490_v19 = vpop.f32.mrf.mxu2 }
 0xe42   :  { %v3881_v46 = vadd.f32 %v1490_v19, %v3860_v10 }
 0xe44   :  { %v1516_v11 = vmul.f32 %v3881_v46, %v3881_v46 }
 0xe49   :  { %v1493_v14 = vpop.f32.mrf.mxu2 }
 0xe4a   :  { %v3884_v48 = vadd.f32 %v1493_v14, %v3864_v15 }
 0xe4c   :  { %v1517_v20 = vmul.f32 %v3884_v48, %v3884_v48  ;;  %1510 = vmatpush.msrb.mxu3 %v3884_v48 }
 0xe4e   :  { %1511 = vmatpush.msrb.mxu3 %v3881_v46  ;;  %1532 = vmatpush.msrb.mxu1 %v1517_v20  ;;  %v3062_v20 = vld [vmem:[%s4294_s5 + $0x230] sm:$0xff] }
 0xe4f   :  { %3019 = vmatmul.msk.f32.vlgmr.msrb.gmra.mxu3 %vm120_vm2, %v3311_v30 }
 0xe50   :  { %1533 = vmatpush.msrb.mxu1 %v1516_v11  ;;  %1593 = vmatpush.msra.mxu3 %v3024_v25  ;;  %v3069_v25 = vld [vmem:[%s4294_s5 + $0x2b0] sm:$0xff]  ;;  %v3061_v11 = vld [vmem:[%s4294_s5 + $0x228] sm:$0xff] }
 0xe51   :  { %3020 = vmatmul.msk.f32.vlgmr.msrb.gmra.mxu1 %vm120_vm2, %v3311_v30 }
 0xe52   :  { %1626 = vmatpush.msra.mxu1 %v3031_v53  ;;  %1594 = vmatpush.msra.mxu3 %v3023_v26  ;;  %v3068_v53 = vld [vmem:[%s4294_s5 + $0x2a8] sm:$0xff]  ;;  %v3060_v26 = vld [vmem:[%s4294_s5 + $0x220] sm:$0xff] }
 0xe54   :  { %1627 = vmatpush.msra.mxu1 %v3030_v21  ;;  %1595 = vmatpush.msra.mxu3 %v3022_v22  ;;  %v3067_v21 = vld [vmem:[%s4294_s5 + $0x2a0] sm:$0xff] }
 0xe56   :  { %1628 = vmatpush.msra.mxu1 %v3029_v23  ;;  %1596 = vmatpush.msra.mxu3 %v3021_v24 }
 0xe57   :  { %3026 = vmatmul.msk.f32.vlgmr.msra.gmra.mxu3 %vm90_vm1, %v3860_v10 }
 0xe58   :  { %1629 = vmatpush.msra.mxu1 %v3028_v29  ;;  %1737 = vmatpush.msrb.mxu3 %v3311_v30 }
 0xe59   :  { %3033 = vmatmul.msk.f32.vlgmr.msra.gmra.mxu1 %vm90_vm1, %v3860_v10 }
 0xe5a   :  { %1760 = vmatpush.msrb.mxu1 %v1668_v31  ;;  %1738 = vmatpush.msrb.mxu3 %v3311_v30 }
 0xe5c   :  { %1761 = vmatpush.msrb.mxu1 %v1665_v32 }
 0xe5f   :  { %3027 = vmatmul.msk.f32.gmra.mxu3 %vm90_vm1, %v3864_v15 }
 0xe61   :  { %3034 = vmatmul.msk.f32.gmra.mxu1 %vm90_vm1, %v3864_v15 }
 0xece   :  { %v1535_v33 = vpop.f32.mrf.mxu1 }
 0xecf   :  { %v1539_v47 = vmul.f32 0.0625, %v1535_v33  ;;  %v3050_v33 = vld [vmem:[%s4296_s7 + $0x20] sm:$0xff] }
 0xed0   :  { %1806 = vmatpush.msrb.mxu0 %v3050_v33 }
 0xed2   :  { %v1513_v34 = vpop.f32.mrf.mxu3 }
 0xed3   :  { %v1538_v35 = vmul.f32 0.0625, %v1513_v34 }
 0xed5   :  { %v1540_v49 = vmul.f32 %v1538_v35, %v1538_v35 }
 0xed6   :  { %v1631_v37 = vpop.f32.mrf.mxu1 }
 0xed7   :  { %v1541_v36 = vsub.f32 %v1539_v47, %v1540_v49  ;;  %v1632_v51 = vadd.f32 %v3191_v39, %v1631_v37 }
 0xed9   :  { %v1542_v38 = vadd.f32 1e-05, %v1541_v36 }
 0xeda   :  { %v1598_v44 = vpop.f32.mrf.mxu3 }
 0xedb   :  { %3240 = vrsqrt.f32 %v1542_v38  ;;  %v1599_v56 = vadd.f32 %v3192_v45, %v1598_v44  ;;  %vm1549_vm14 = vweird.f32 %v1542_v38  ;;  %v3195_v44 = vld [vmem:[%s4295_s6 + $0x11] ss:$0 sm:$0xff] }
 0xede   :  { %v1634_v40 = vpop.f32.mrf.mxu1 }
 0xedf   :  { %v1635_v41 = vadd.f32 %v3191_v39, %v1634_v40  ;;  %v3194_v40 = vld [vmem:[%s4295_s6 + $0x15] ss:$0 sm:$0xff] }
 0xee1   :  { %v3241_v42 = vpop.eup %3240  ;;  %3042 = vmatpush.xpose.msk.msrb.mxu2 %vm52_vm0, %v1635_v41 }
 0xee2   :  { %v1544_v43 = vmul.f32 %v3241_v42, %v1542_v38  ;;  %vm1550_vm13 = vweird.f32 %v3241_v42  ;;  %v1601_v0 = vpop.f32.mrf.mxu3 }
 0xee3   :  { %vm1551_vm15 = vmor %vm1549_vm14, %vm1550_vm13  ;;  %v1602_v3 = vadd.f32 %v3192_v45, %v1601_v0  ;;  %v3193_v0 = vld [vmem:[%s4295_s6 + $0xd] ss:$0 sm:$0xff] }
 0xee4   :  { %v1545_v50 = vmul.f32 %v3241_v42, %v1544_v43 }
 0xee5   :  { %3043 = vmatpush.xpose.msk.msrb.mxu2 %vm52_vm0, %v1632_v51 }
 0xee6   :  { %v1546_v55 = vmul.f32 0.5, %v1545_v50 }
 0xee8   :  { %v1547_v58 = vsub.f32 1.5, %v1546_v55  ;;  %3044 = vmatmul.msk.f32.vlgmr.msrb.gmra.mxu2 %vm52_vm0, %v1599_v56  ;;  %v3088_v56 = vld [vmem:[%s4294_s5 + $0x1d8] sm:$0xff] }
 0xee9   :  { %1838 = vmatpush.msra.mxu2 %v3056_v52 }
 0xeea   :  { %v1548_v60 = vmul.f32 %v3241_v42, %v1547_v58  ;;  %v3086_v58 = vld [vmem:[%s4294_s5 + $0x1c8] sm:$0xff] }
 0xeeb   :  { %1839 = vmatpush.msra.mxu2 %v3055_v57  ;;  %v3087_v57 = vld [vmem:[%s4294_s5 + $0x1d0] sm:$0xff] }
 0xeec   :  { %v1552_v63 = vsel %vm1551_vm15, %v3241_v42, %v1548_v60  ;;  %v3085_v60 = vld [vmem:[%s4294_s5 + $0x1c0] sm:$0xff] }
 0xeed   :  { %1840 = vmatpush.msra.mxu2 %v3054_v59  ;;  %v1554_v1 = vrot.slane %v1552_v63, 5 }
 0xeef   :  { %1841 = vmatpush.msra.mxu2 %v3053_v61  ;;  %v1556_v2 = vmul.f32 %v3957_v62, %v1554_v1 }
 0xef0   :  { %3045 = vmatmul.msk.f32.gmra.mxu2 %vm52_vm0, %v1602_v3 }
 0xef1   :  { %1982 = vmatpush.msrb.mxu2 %v3311_v30  ;;  %v1561_v4 = vrot.slane %v1556_v2, 3  ;;  %v1557_v6 = vperm.slane %v1556_v2, 3 }
 0xef3   :  { %1983 = vmatpush.msrb.mxu2 %v3311_v30  ;;  %v1563_v5 = vmul.f32 %v1561_v4, %v1538_v35  ;;  %v1558_v9 = vmul.f32 %v1557_v6, %v3881_v46  ;;  %v1559_v12 = vmul.f32 %v1557_v6, %v3884_v48  ;;  %v3063_v46 = vld [vmem:[%s4294_s5 + $0x238] sm:$0xff] }
 0xef4   :  { %v3070_v48 = vld [vmem:[%s4294_s5 + $0x2b8] sm:$0xff]  ;;  %1871 = vmatpush.msra.mxu3 %v3063_v46  ;;  %v3092_v46 = vld [vmem:[%s4294_s5 + $0x240] sm:$0xff] }
 0xef5   :  { %v1565_v7 = vrot.slane %v1563_v5, 4  ;;  %1904 = vmatpush.msra.mxu1 %v3070_v48  ;;  %v3099_v48 = vld [vmem:[%s4294_s5 + $0x2c0] sm:$0xff] }
 0xef6   :  { %1872 = vmatpush.msra.mxu3 %v3062_v20 }
 0xef7   :  { %v1567_v8 = vsub.f32 %v3957_v62, %v1565_v7  ;;  %1905 = vmatpush.msra.mxu1 %v3069_v25 }
 0xef8   :  { %3058 = vmatmul.msk.f32.vlgmr.msra.gmra.mxu2 %vm90_vm1, %v3860_v10  ;;  %1873 = vmatpush.msra.mxu3 %v3061_v11 }
 0xef9   :  { %v1568_v13 = vperm.slane %v1567_v8, 4  ;;  %1906 = vmatpush.msra.mxu1 %v3068_v53 }
 0xefa   :  { %1874 = vmatpush.msra.mxu3 %v3060_v26 }
 0xefb   :  { %v3968_v16 = vadd.f32 %v1568_v13, %v1558_v9  ;;  %v3970_v17 = vadd.f32 %v1568_v13, %v1559_v12  ;;  %1907 = vmatpush.msra.mxu1 %v3067_v21  ;;  %v3095_v12 = vld [vmem:[%s4294_s5 + $0x258] sm:$0xff] }
 0xefc   :  { %v3102_v13 = vld [vmem:[%s4294_s5 + $0x2d8] sm:$0xff]  ;;  %2116 = vmatpush.msra.mxu2 %v3095_v12 }
 0xefd   :  { %v3134_v12 = vld [vmem:[%s4294_s5 + $0x2f8] sm:$0xff] }
 0xf00   :  { %3059 = vmatmul.msk.f32.gmra.mxu2 %vm90_vm1, %v3864_v15 }
 0xf6b   :  { %v1699_v18 = vpop.f32.mrf.mxu2 }
 0xf6c   :  { %v1705_v19 = vsel %vm120_vm2, %v1699_v18, -inf }
 0xf6d   :  { %1706 = vmax.xlane.f32.xlu2 %v1705_v19  ;;  %v3101_v19 = vld [vmem:[%s4294_s5 + $0x2d0] sm:$0xff] }
 0xf73   :  { %v1702_v14 = vpop.f32.mrf.mxu2 }
 0xf74   :  { %v1708_v54 = vsel %vm120_vm2, %v1702_v14, -inf }
 0xf75   :  { %1709 = vmax.xlane.f32.xlu0 %v1708_v54  ;;  %v3100_v54 = vld [vmem:[%s4294_s5 + $0x2c8] sm:$0xff] }
 0xf7b   :  { %v1843_v63 = vpop.f32.mrf.mxu2 }
 0xf7c   :  { %v1844_v1 = vadd.f32 %v3193_v0, %v1843_v63 }
 0xf83   :  { %v1846_v2 = vpop.f32.mrf.mxu2 }
 0xf84   :  { %v1847_v3 = vadd.f32 %v3193_v0, %v1846_v2 }
 0xfe0   :  { %v1707_v22 = vpop.xlane.xlu2 %1706 }
 0xfe1   :  { %v1711_v23 = vsub.f32 %v1699_v18, %v1707_v22  ;;  %v3094_v18 = vld [vmem:[%s4294_s5 + $0x250] sm:$0xff] }
 0xfe2   :  { %2117 = vmatpush.msra.mxu2 %v3094_v18  ;;  %v3125_v18 = vld [vmem:[%s4294_s5 + $0x268] sm:$0xff] }
 0xfe3   :  { %v1713_v24 = vmul.f32 1.442695, %v1711_v23 }
 0xfe5   :  { %3242 = vpow2.f32 %v1713_v24  ;;  %v3082_v24 = vld [vmem:[%s4296_s7 + $0x28] sm:$0xff] }
 0xfe8   :  { %v1710_v27 = vpop.xlane.xlu0 %1709 }
 0xfe9   :  { %v1712_v28 = vsub.f32 %v1702_v14, %v1710_v27  ;;  %v3093_v14 = vld [vmem:[%s4294_s5 + $0x248] sm:$0xff] }
 0xfea   :  { %2118 = vmatpush.msra.mxu2 %v3093_v14  ;;  %v3124_v14 = vld [vmem:[%s4294_s5 + $0x260] sm:$0xff] }
 0xfeb   :  { %v3243_v29 = vpop.eup %3242  ;;  %v1715_v31 = vmul.f32 1.442695, %v1712_v28 }
 0xfec   :  { %3046 = vmatmul.msk.f32.vlgmr.msrb.gmra.mxu3 %vm120_vm2, %v3243_v29  ;;  %3048 = vmatmul.msk.f32.vlgmr.msrb.gmra.mxu1 %vm120_vm2, %v3243_v29 }
 0xfed   :  { %3244 = vpow2.f32 %v1715_v31  ;;  %2119 = vmatpush.msra.mxu2 %v3092_v46  ;;  %2051 = vmatpush.msrb.mxu1 %v3082_v24 }
 0xff3   :  { %v3245_v32 = vpop.eup %3244 }
 0xff4   :  { %3047 = vmatmul.msk.f32.gmra.mxu3 %vm120_vm2, %v3245_v32  ;;  %3049 = vmatmul.msk.f32.gmra.mxu1 %vm120_vm2, %v3245_v32 }
 0xffc   :  { %3065 = vmatmul.msk.f32.vlgmr.msra.gmra.mxu3 %vm90_vm1, %v3860_v10  ;;  %3072 = vmatmul.msk.f32.vlgmr.msra.gmra.mxu1 %vm90_vm1, %v3860_v10 }
0x1004   :  { %3066 = vmatmul.msk.f32.gmra.mxu3 %vm90_vm1, %v3864_v15  ;;  %3073 = vmatmul.msk.f32.gmra.mxu1 %vm90_vm1, %v3864_v15 }
0x1069   :  { %v1763_v34 = vpop.f32.mrf.mxu1 }
0x106f   :  { %v1740_v35 = vpop.f32.mrf.mxu3 }
0x1070   :  { %3246 = vrcp.f32 %v1740_v35 }
0x1071   :  { %v1766_v47 = vpop.f32.mrf.mxu1 }
0x1076   :  { %v3247_v49 = vpop.eup %3246 }
0x1077   :  { %1773 = vperm.xlu1 %3175, %v3247_v49   ;;  %v1743_v36 = vpop.f32.mrf.mxu3  ;;  %v3198_v49 = vld [vmem:[%s4295_s6 + $0x16] ss:$0 sm:$0xff] }
0x1078   :  { %3248 = vrcp.f32 %v1743_v36 }
0x1079   :  { %v1909_v37 = vpop.f32.mrf.mxu1 }
0x107a   :  { %v1910_v43 = vadd.f32 %v3194_v40, %v1909_v37 }
0x107e   :  { %v3249_v38 = vpop.eup %3248 }
0x107f   :  { %v1876_v39 = vpop.f32.mrf.mxu3  ;;  %1778 = vperm.xlu2 %3177, %v3249_v38  }
0x1080   :  { %v1877_v51 = vadd.f32 %v3195_v44, %v1876_v39 }
0x1081   :  { %v1912_v41 = vpop.f32.mrf.mxu1 }
0x1082   :  { %v1913_v42 = vadd.f32 %v3194_v40, %v1912_v41 }
0x1084   :  { %2005 = vmatpush.msrb.mxu3 %v1913_v42 }
0x1086   :  { %2006 = vmatpush.msrb.mxu3 %v1910_v43 }
0x1087   :  { %v1879_v45 = vpop.f32.mrf.mxu3 }
0x1088   :  { %v1880_v50 = vadd.f32 %v3195_v44, %v1879_v45  ;;  %2149 = vmatpush.msra.mxu3 %v3102_v13  ;;  %v3120_v44 = vld [vmem:[%s4294_s5 + $0x1f8] sm:$0xff]  ;;  %v3119_v45 = vld [vmem:[%s4294_s5 + $0x1f0] sm:$0xff] }
0x1089   :  { %v3133_v13 = vld [vmem:[%s4294_s5 + $0x2f0] sm:$0xff] }
0x108a   :  { %3074 = vmatpush.xpose.msk.msra.mxu0 %vm52_vm0, %v1880_v50  ;;  %2150 = vmatpush.msra.mxu3 %v3101_v19  ;;  %v3118_v50 = vld [vmem:[%s4294_s5 + $0x1e8] sm:$0xff] }
0x108b   :  { %v3132_v19 = vld [vmem:[%s4294_s5 + $0x2e8] sm:$0xff] }
0x108c   :  { %2151 = vmatpush.msra.mxu3 %v3100_v54  ;;  %v3131_v54 = vld [vmem:[%s4294_s5 + $0x2e0] sm:$0xff] }
0x108e   :  { %3075 = vmatpush.xpose.msk.msra.mxu0 %vm52_vm0, %v1877_v51  ;;  %2152 = vmatpush.msra.mxu3 %v3099_v48 }
0x10d9   :  { %v1779_v59 = vpop.permute.xlu2 %1778 }
0x10da   :  { %v1782_v61 = vmul.f32 %v1779_v59, %v1766_v47  ;;  %v3197_v47 = vld [vmem:[%s4295_s6 + $0x12] ss:$0 sm:$0xff] }
0x10e9   :  { %v1774_v52 = vpop.permute.xlu1 %1773 }
0x10ea   :  { %v1781_v55 = vmul.f32 %v1774_v52, %v1763_v34  ;;  %v3117_v52 = vld [vmem:[%s4294_s5 + $0x1e0] sm:$0xff] }
0x10ec   :  { %3051 = vmatmul.msk.f32.vlgmr.msrb.gmra.mxu0 %vm52_vm0, %v1781_v55 }
0x10ed   :  { %2083 = vmatpush.msrb.mxu0 %v3088_v56 }
0x10ef   :  { %2084 = vmatpush.msrb.mxu0 %v3087_v57  ;;  %v3196_v57 = vld [vmem:[%s4295_s6 + $0xe] ss:$0 sm:$0xff] }
0x10f1   :  { %2085 = vmatpush.msrb.mxu0 %v3086_v58 }
0x10f3   :  { %2086 = vmatpush.msrb.mxu0 %v3085_v60 }
0x10f4   :  { %3052 = vmatmul.msk.f32.gmra.mxu0 %vm52_vm0, %v1782_v61 }
0x10fc   :  { %3076 = vmatmul.msk.f32.vlgmr.msra.gmra.mxu0 %vm52_vm0, %v1844_v1 }
0x10fd   :  { %2227 = vmatpush.msra.mxu0 %v3311_v30 }
0x10ff   :  { %2228 = vmatpush.msra.mxu0 %v3311_v30 }
0x1104   :  { %3077 = vmatmul.msk.f32.gmra.mxu0 %vm52_vm0, %v1847_v3 }
0x110c   :  { %3090 = vmatmul.msk.f32.vlgmr.msrb.gmra.mxu0 %vm90_vm1, %v3860_v10 }
0x1114   :  { %3091 = vmatmul.msk.f32.gmra.mxu0 %vm90_vm1, %v3864_v15 }
0x1169   :  { %v4048_v4 = vpop.f32.mrf.mxu0 }
0x116a   :  { %v1814_v61 = vadd.f32 %v4048_v4, %v3860_v10  ;;  %v3127_v4 = vld [vmem:[%s4294_s5 + $0x278] sm:$0xff] }
0x116b   :  { %2361 = vmatpush.msrb.mxu0 %v3127_v4 }
0x1171   :  { %v4050_v5 = vpop.f32.mrf.mxu0 }
0x1172   :  { %v1815_v1 = vadd.f32 %v4050_v5, %v3864_v15  ;;  %v3126_v5 = vld [vmem:[%s4294_s5 + $0x270] sm:$0xff] }
0x1173   :  { %2362 = vmatpush.msrb.mxu0 %v3126_v5 }
0x1175   :  { %2363 = vmatpush.msrb.mxu0 %v3125_v18 }
0x1177   :  { %2364 = vmatpush.msrb.mxu0 %v3124_v14 }
0x1179   :  { %v1944_v6 = vpop.f32.mrf.mxu0 }
0x117a   :  { %v1950_v7 = vsel %vm120_vm2, %v1944_v6, -inf }
0x117b   :  { %1951 = vmax.xlane.f32.xlu0 %v1950_v7 }
0x1181   :  { %v1947_v8 = vpop.f32.mrf.mxu0 }
0x1182   :  { %v1953_v9 = vsel %vm120_vm2, %v1947_v8, -inf }
0x1183   :  { %1954 = vmax.xlane.f32.xlu1 %v1953_v9 }
0x1189   :  { %v2088_v56 = vpop.f32.mrf.mxu0 }
0x118a   :  { %v2089_v58 = vadd.f32 %v3196_v57, %v2088_v56 }
0x1191   :  { %v2091_v59 = vpop.f32.mrf.mxu0 }
0x1192   :  { %v2092_v60 = vadd.f32 %v3196_v57, %v2091_v59 }
0x11ee   :  { %v1952_v20 = vpop.xlane.xlu0 %1951 }
0x11ef   :  { %v1956_v25 = vsub.f32 %v1944_v6, %v1952_v20 }
0x11f1   :  { %v1958_v11 = vmul.f32 1.442695, %v1956_v25 }
0x11f3   :  { %3250 = vpow2.f32 %v1958_v11 }
0x11f6   :  { %v1955_v53 = vpop.xlane.xlu1 %1954 }
0x11f7   :  { %v1957_v26 = vsub.f32 %v1947_v8, %v1955_v53 }
0x11f9   :  { %v3251_v21 = vpop.eup %3250  ;;  %v1960_v22 = vmul.f32 1.442695, %v1957_v26 }
0x11fa   :  { %3078 = vmatmul.msk.f32.vlgmr.msrb.gmra.mxu2 %vm120_vm2, %v3251_v21  ;;  %3080 = vmatmul.msk.f32.vlgmr.msrb.gmra.mxu3 %vm120_vm2, %v3251_v21 }
0x11fb   :  { %3252 = vpow2.f32 %v1960_v22  ;;  %v3114_v22 = vld [vmem:[%s4296_s7 + $0x30] sm:$0xff] }
0x11fc   :  { %2296 = vmatpush.msrb.mxu3 %v3114_v22 }
0x1201   :  { %v3253_v23 = vpop.eup %3252 }
0x1202   :  { %3079 = vmatmul.msk.f32.gmra.mxu2 %vm120_vm2, %v3253_v23  ;;  %3081 = vmatmul.msk.f32.gmra.mxu3 %vm120_vm2, %v3253_v23 }
0x120a   :  { %3097 = vmatmul.msk.f32.vlgmr.msra.gmra.mxu2 %vm90_vm1, %v3860_v10  ;;  %3104 = vmatmul.msk.f32.vlgmr.msra.gmra.mxu3 %vm90_vm1, %v3860_v10 }
0x1212   :  { %3098 = vmatmul.msk.f32.gmra.mxu2 %vm90_vm1, %v3864_v15  ;;  %3105 = vmatmul.msk.f32.gmra.mxu3 %vm90_vm1, %v3864_v15 }
0x127d   :  { %v1985_v27 = vpop.f32.mrf.mxu2  ;;  %v2008_v28 = vpop.f32.mrf.mxu3 }
0x127e   :  { %3254 = vrcp.f32 %v1985_v27 }
0x1284   :  { %v3255_v29 = vpop.eup %3254 }
0x1285   :  { %2018 = vperm.xlu0 %3176, %v3255_v29   ;;  %v1988_v31 = vpop.f32.mrf.mxu2  ;;  %v2011_v32 = vpop.f32.mrf.mxu3 }
0x1286   :  { %3256 = vrcp.f32 %v1988_v31 }
0x128c   :  { %v3257_v33 = vpop.eup %3256 }
0x128d   :  { %v2121_v34 = vpop.f32.mrf.mxu2  ;;  %v2154_v35 = vpop.f32.mrf.mxu3  ;;  %2023 = vperm.xlu2 %3177, %v3257_v33  }
0x128e   :  { %v2155_v40 = vadd.f32 %v3198_v49, %v2154_v35  ;;  %v2122_v41 = vadd.f32 %v3197_v47, %v2121_v34 }
0x1295   :  { %v2124_v36 = vpop.f32.mrf.mxu2  ;;  %v2157_v37 = vpop.f32.mrf.mxu3 }
0x1296   :  { %v2125_v38 = vadd.f32 %v3197_v47, %v2124_v36  ;;  %v2158_v39 = vadd.f32 %v3198_v49, %v2157_v37  ;;  %v3201_v47 = vld [vmem:[%s4295_s6 + $0x17] ss:$0 sm:$0xff] }
0x1298   :  { %3106 = vmatpush.xpose.msk.msra.mxu1 %vm52_vm0, %v2125_v38  ;;  %2250 = vmatpush.msrb.mxu2 %v2158_v39 }
0x129a   :  { %2251 = vmatpush.msrb.mxu2 %v2155_v40 }
0x129c   :  { %3107 = vmatpush.xpose.msk.msra.mxu1 %vm52_vm0, %v2122_v41  ;;  %2394 = vmatpush.msra.mxu2 %v3134_v12 }
0x129e   :  { %2395 = vmatpush.msra.mxu2 %v3133_v13 }
0x12a0   :  { %2396 = vmatpush.msra.mxu2 %v3132_v19 }
0x12a2   :  { %2397 = vmatpush.msra.mxu2 %v3131_v54 }
0x12e7   :  { %v2024_v51 = vpop.permute.xlu2 %2023 }
0x12e8   :  { %v2027_v55 = vmul.f32 %v2024_v51, %v2011_v32 }
0x12f7   :  { %v2019_v42 = vpop.permute.xlu0 %2018 }
0x12f8   :  { %v2026_v43 = vmul.f32 %v2019_v42, %v2008_v28 }
0x12fa   :  { %3083 = vmatmul.msk.f32.vlgmr.msrb.gmra.mxu1 %vm52_vm0, %v2026_v43  ;;  %v3199_v43 = vld [vmem:[%s4295_s6 + $0xf] ss:$0 sm:$0xff] }
0x12fb   :  { %2328 = vmatpush.msrb.mxu1 %v3120_v44 }
0x12fd   :  { %2329 = vmatpush.msrb.mxu1 %v3119_v45 }
0x12ff   :  { %2330 = vmatpush.msrb.mxu1 %v3118_v50 }
0x1301   :  { %2331 = vmatpush.msrb.mxu1 %v3117_v52 }
0x1302   :  { %3084 = vmatmul.msk.f32.gmra.mxu1 %vm52_vm0, %v2027_v55 }
0x130a   :  { %3108 = vmatmul.msk.f32.vlgmr.msra.gmra.mxu1 %vm52_vm0, %v2089_v58 }
0x130b   :  { %2472 = vmatpush.msra.mxu1 %v3311_v30 }
0x130d   :  { %2473 = vmatpush.msra.mxu1 %v3311_v30 }
0x1312   :  { %3109 = vmatmul.msk.f32.gmra.mxu1 %vm52_vm0, %v2092_v60 }
0x131a   :  { %3122 = vmatmul.msk.f32.vlgmr.msrb.gmra.mxu1 %vm90_vm1, %v3860_v10 }
0x1322   :  { %3123 = vmatmul.msk.f32.gmra.mxu1 %vm90_vm1, %v3864_v15 }
0x1377   :  { %v2053_v63 = vpop.f32.mrf.mxu1 }
0x1378   :  { %v4128_v0 = vadd.f32 %v2053_v63, %v1814_v61 }
0x137f   :  { %v2056_v2 = vpop.f32.mrf.mxu1 }
0x1380   :  { %v4132_v3 = vadd.f32 %v2056_v2, %v1815_v1 }
0x1387   :  { %v2189_v6 = vpop.f32.mrf.mxu1 }
0x1388   :  { %v2195_v7 = vsel %vm120_vm2, %v2189_v6, -inf }
0x1389   :  { %2196 = vmax.xlane.f32.xlu0 %v2195_v7 }
0x138f   :  { %v2192_v8 = vpop.f32.mrf.mxu1 }
0x1390   :  { %v2198_v9 = vsel %vm120_vm2, %v2192_v8, -inf }
0x1391   :  { %2199 = vmax.xlane.f32.xlu2 %v2198_v9 }
0x1397   :  { %v2333_v42 = vpop.f32.mrf.mxu1 }
0x1398   :  { %v2334_v44 = vadd.f32 %v3199_v43, %v2333_v42 }
0x139f   :  { %v2336_v45 = vpop.f32.mrf.mxu1 }
0x13a0   :  { %v2337_v50 = vadd.f32 %v3199_v43, %v2336_v45  ;;  %v3161_v43 = vld [vmem:[%s4298_s9 + $0x60] sm:$0xff] }
0x13fc   :  { %v2197_v46 = vpop.xlane.xlu0 %2196 }
0x13fd   :  { %v2201_v48 = vsub.f32 %v2189_v6, %v2197_v46 }
0x13ff   :  { %v2203_v20 = vmul.f32 1.442695, %v2201_v48 }
0x1401   :  { %3258 = vpow2.f32 %v2203_v20 }
0x1404   :  { %v2200_v25 = vpop.xlane.xlu2 %2199 }
0x1405   :  { %v2202_v11 = vsub.f32 %v2192_v8, %v2200_v25  ;;  %v2551_v25 = vperm.slane %v3957_v62, 0 }
0x1407   :  { %v3259_v53 = vpop.eup %3258  ;;  %v2205_v26 = vmul.f32 1.442695, %v2202_v11 }
0x1408   :  { %3110 = vmatmul.msk.f32.vlgmr.msra.gmra.mxu0 %vm120_vm2, %v3259_v53  ;;  %3112 = vmatmul.msk.f32.vlgmr.msrb.gmra.mxu2 %vm120_vm2, %v3259_v53 }
0x1409   :  { %3260 = vpow2.f32 %v2205_v26 }
0x140f   :  { %v3261_v21 = vpop.eup %3260 }
0x1410   :  { %3111 = vmatmul.msk.f32.gmra.mxu0 %vm120_vm2, %v3261_v21  ;;  %3113 = vmatmul.msk.f32.gmra.mxu2 %vm120_vm2, %v3261_v21 }
0x1418   :  { %3129 = vmatmul.msk.f32.vlgmr.msrb.gmra.mxu0 %vm90_vm1, %v3860_v10  ;;  %3136 = vmatmul.msk.f32.vlgmr.msra.gmra.mxu2 %vm90_vm1, %v3860_v10 }
0x1420   :  { %3130 = vmatmul.msk.f32.gmra.mxu0 %vm90_vm1, %v3864_v15  ;;  %3137 = vmatmul.msk.f32.gmra.mxu2 %vm90_vm1, %v3864_v15  ;;  %v3200_v15 = vld [vmem:[%s4295_s6 + $0x13] ss:$0 sm:$0xff] }
0x1485   :  { %v2230_v23 = vpop.f32.mrf.mxu0 }
0x1486   :  { %3262 = vrcp.f32 %v2230_v23 }
0x148b   :  { %v2253_v24 = vpop.f32.mrf.mxu2 }
0x148c   :  { %v3263_v27 = vpop.eup %3262 }
0x148d   :  { %2263 = vperm.xlu1 %3175, %v3263_v27   ;;  %v2233_v28 = vpop.f32.mrf.mxu0 }
0x148e   :  { %3264 = vrcp.f32 %v2233_v28 }
0x1493   :  { %v2256_v29 = vpop.f32.mrf.mxu2 }
0x1494   :  { %v3265_v10 = vpop.eup %3264 }
0x1495   :  { %v2366_v31 = vpop.f32.mrf.mxu0  ;;  %2268 = vperm.xlu1 %3175, %v3265_v10  }
0x1496   :  { %v2367_v35 = vadd.f32 %v3200_v15, %v2366_v31 }
0x149b   :  { %v2399_v32 = vpop.f32.mrf.mxu2 }
0x149c   :  { %v2400_v37 = vadd.f32 %v3201_v47, %v2399_v32  ;;  %v3154_v32 = vld [vmem:[%s4297_s8 + $0x38] sm:$0xff] }
0x149d   :  { %v2369_v33 = vpop.f32.mrf.mxu0 }
0x149e   :  { %v2370_v34 = vadd.f32 %v3200_v15, %v2369_v33  ;;  %v3153_v33 = vld [vmem:[%s4297_s8 + $0x30] sm:$0xff] }
0x14a0   :  { %3138 = vmatpush.xpose.msk.msra.mxu3 %vm52_vm0, %v2370_v34  ;;  %v3152_v34 = vld [vmem:[%s4297_s8 + $0x28] sm:$0xff] }
0x14a3   :  { %v2402_v49 = vpop.f32.mrf.mxu2 }
0x14a4   :  { %v2403_v36 = vadd.f32 %v3201_v47, %v2402_v49  ;;  %3139 = vmatpush.xpose.msk.msra.mxu3 %vm52_vm0, %v2367_v35  ;;  %v3151_v35 = vld [vmem:[%s4297_s8 + $0x20] sm:$0xff] }
0x14a6   :  { %2495 = vmatpush.msra.mxu0 %v2403_v36 }
0x14a8   :  { %2496 = vmatpush.msra.mxu0 %v2400_v37 }
0x14aa   :  { %2655 = vmatpush.msrb.mxu0 %v3154_v32 }
0x14ac   :  { %2656 = vmatpush.msrb.mxu0 %v3153_v33 }
0x14ae   :  { %2657 = vmatpush.msrb.mxu0 %v3152_v34 }
0x14b0   :  { %2658 = vmatpush.msrb.mxu0 %v3151_v35 }
0x14ff   :  { %v2264_v38 = vpop.permute.xlu1 %2263 }
0x1500   :  { %v2271_v39 = vmul.f32 %v2264_v38, %v2253_v24  ;;  %v3164_v38 = vld [vmem:[%s4298_s9 + $0x78] sm:$0xff] }
0x1502   :  { %3115 = vmatmul.msk.f32.vlgmr.msrb.gmra.mxu3 %vm52_vm0, %v2271_v39  ;;  %v3163_v39 = vld [vmem:[%s4298_s9 + $0x70] sm:$0xff] }
0x1507   :  { %v2269_v40 = vpop.permute.xlu1 %2268 }
0x1508   :  { %v2272_v41 = vmul.f32 %v2269_v40, %v2256_v29 }
0x150a   :  { %3116 = vmatmul.msk.f32.gmra.mxu3 %vm52_vm0, %v2272_v41  ;;  %v3162_v41 = vld [vmem:[%s4298_s9 + $0x68] sm:$0xff] }
0x1512   :  { %3140 = vmatmul.msk.f32.vlgmr.msra.gmra.mxu3 %vm52_vm0, %v2334_v44 }
0x151a   :  { %3141 = vmatmul.msk.f32.gmra.mxu3 %vm52_vm0, %v2337_v50  ;;  %v3160_v50 = vld [vmem:[%s4298_s9 + $0x58] sm:$0xff] }
0x1585   :  { %v2298_v51 = vpop.f32.mrf.mxu3 }
0x1586   :  { %v2304_v52 = vadd.f32 %v2298_v51, %v4128_v0 }
0x158d   :  { %v2301_v55 = vpop.f32.mrf.mxu3 }
0x158e   :  { %v2305_v56 = vadd.f32 %v2301_v55, %v4132_v3  ;;  %v3146_v3 = vld [vmem:[%s4296_s7 + $0x38] sm:$0xff] }
0x158f   :  { %2541 = vmatpush.msrb.mxu2 %v3146_v3 }
0x1591   :  { %2691 = vmatpush.msra.mxu2 %v3164_v38 }
0x1593   :  { %2692 = vmatpush.msra.mxu2 %v3163_v39 }
0x1595   :  { %v2434_v57 = vpop.f32.mrf.mxu3  ;;  %2693 = vmatpush.msra.mxu2 %v3162_v41 }
0x1596   :  { %v2440_v58 = vsel %vm120_vm2, %v2434_v57, -inf }
0x1597   :  { %2441 = vmax.xlane.f32.xlu0 %v2440_v58  ;;  %2694 = vmatpush.msra.mxu2 %v3161_v43 }
0x1599   :  { %2695 = vmatpush.msra.mxu2 %v3160_v50 }
0x159d   :  { %v2437_v59 = vpop.f32.mrf.mxu3 }
0x159e   :  { %v2443_v60 = vsel %vm120_vm2, %v2437_v59, -inf }
0x159f   :  { %2444 = vmax.xlane.f32.xlu2 %v2443_v60 }
0x160a   :  { %v2442_v61 = vpop.xlane.xlu0 %2441 }
0x160b   :  { %v2446_v63 = vsub.f32 %v2434_v57, %v2442_v61 }
0x160d   :  { %v2448_v1 = vmul.f32 1.442695, %v2446_v63 }
0x160f   :  { %3266 = vpow2.f32 %v2448_v1 }
0x1612   :  { %v2445_v2 = vpop.xlane.xlu2 %2444 }
0x1613   :  { %v2447_v6 = vsub.f32 %v2437_v59, %v2445_v2 }
0x1615   :  { %v3267_v7 = vpop.eup %3266  ;;  %v2450_v8 = vmul.f32 1.442695, %v2447_v6 }
0x1616   :  { %3142 = vmatmul.msk.f32.vlgmr.msra.gmra.mxu1 %vm120_vm2, %v3267_v7  ;;  %3144 = vmatmul.msk.f32.vlgmr.msra.gmra.mxu0 %vm120_vm2, %v3267_v7  ;;  %v3159_v7 = vld [vmem:[%s4298_s9 + $0x50] sm:$0xff] }
0x1617   :  { %3268 = vpow2.f32 %v2450_v8  ;;  %2696 = vmatpush.msra.mxu2 %v3159_v7  ;;  %v3158_v8 = vld [vmem:[%s4298_s9 + $0x48] sm:$0xff] }
0x1619   :  { %2697 = vmatpush.msra.mxu2 %v3158_v8 }
0x161d   :  { %v3269_v0 = vpop.eup %3268 }
0x161e   :  { %3143 = vmatmul.msk.f32.gmra.mxu1 %vm120_vm2, %v3269_v0  ;;  %3145 = vmatmul.msk.f32.gmra.mxu0 %vm120_vm2, %v3269_v0  ;;  %v2636_v0 = vperm.slane %v3957_v62, 1 }
0x1693   :  { %v2475_v9 = vpop.f32.mrf.mxu1  ;;  %v2498_v13 = vpop.f32.mrf.mxu0 }
0x1694   :  { %3270 = vrcp.f32 %v2475_v9 }
0x169a   :  { %v3271_v4 = vpop.eup %3270 }
0x169b   :  { %2508 = vperm.xlu1 %3175, %v3271_v4   ;;  %v2478_v12 = vpop.f32.mrf.mxu1  ;;  %v2501_v14 = vpop.f32.mrf.mxu0 }
0x169c   :  { %3272 = vrcp.f32 %v2478_v12 }
0x16a2   :  { %v3273_v5 = vpop.eup %3272 }
0x16a3   :  { %2513 = vperm.xlu0 %3176, %v3273_v5  }
0x170d   :  { %v2509_v18 = vpop.permute.xlu1 %2508 }
0x170e   :  { %v2516_v19 = vmul.f32 %v2509_v18, %v2498_v13 }
0x1710   :  { %3147 = vmatmul.msk.f32.vlgmr.msrb.gmra.mxu2 %vm52_vm0, %v2516_v19  ;;  %v2708_v19 = vperm.slane %v3957_v62, 2 }
0x1715   :  { %v2514_v54 = vpop.permute.xlu0 %2513 }
0x1716   :  { %v2517_v46 = vmul.f32 %v2514_v54, %v2501_v14 }
0x1718   :  { %3148 = vmatmul.msk.f32.gmra.mxu2 %vm52_vm0, %v2517_v46 }
0x1793   :  { %v2543_v48 = vpop.f32.mrf.mxu2 }
0x1794   :  { %v2549_v20 = vadd.f32 %v2543_v48, %v2304_v52 }
0x1796   :  { %v2552_v26 = vadd.f32 %v2551_v25, %v2549_v20 }
0x1798   :  { %v2574_v23 = vmul.f32 %v2552_v26, %v2552_v26 }
0x179b   :  { %v2546_v11 = vpop.f32.mrf.mxu2 }
0x179c   :  { %v2550_v53 = vadd.f32 %v2546_v11, %v2305_v56 }
0x179e   :  { %v2553_v21 = vadd.f32 %v2551_v25, %v2550_v53 }
0x17a0   :  { %v2575_v22 = vmul.f32 %v2553_v21, %v2553_v21  ;;  %2568 = vmatpush.msrb.mxu3 %v2553_v21 }
0x17a2   :  { %2569 = vmatpush.msrb.mxu3 %v2552_v26  ;;  %2590 = vmatpush.msrb.mxu1 %v2575_v22  ;;  %v2786_v22 = vld [vmem:[%s4299_s10 + $0x18] sm:$0xff] }
0x17a3   :  { %3149 = vmatmul.msk.f32.vlgmr.msrb.gmra.mxu3 %vm120_vm2, %v3311_v30 }
0x17a4   :  { %2591 = vmatpush.msrb.mxu1 %v2574_v23 }
0x17a5   :  { %3150 = vmatmul.msk.f32.vlgmr.msrb.gmra.mxu1 %vm120_vm2, %v3311_v30 }
0x1822   :  { %v2593_v24 = vpop.f32.mrf.mxu1 }
0x1823   :  { %v2597_v29 = vmul.f32 0.0625, %v2593_v24  ;;  %v2785_v24 = vld [vmem:[%s4299_s10 + $0x10] sm:$0xff] }
0x1826   :  { %v2571_v27 = vpop.f32.mrf.mxu3 }
0x1827   :  { %v2596_v28 = vmul.f32 0.0625, %v2571_v27  ;;  %v2784_v27 = vld [vmem:[%s4299_s10 + $0x8] sm:$0xff] }
0x1829   :  { %v2598_v10 = vmul.f32 %v2596_v28, %v2596_v28 }
0x182b   :  { %v2599_v31 = vsub.f32 %v2597_v29, %v2598_v10 }
0x182d   :  { %v2600_v15 = vadd.f32 1e-05, %v2599_v31 }
0x182f   :  { %3274 = vrsqrt.f32 %v2600_v15  ;;  %vm2607_vm3 = vweird.f32 %v2600_v15 }
0x1835   :  { %v3275_v47 = vpop.eup %3274 }
0x1836   :  { %v2602_v49 = vmul.f32 %v3275_v47, %v2600_v15  ;;  %vm2608_vm0 = vweird.f32 %v3275_v47 }
0x1837   :  { %vm2609_vm4 = vmor %vm2607_vm3, %vm2608_vm0 }
0x1838   :  { %v2603_v36 = vmul.f32 %v3275_v47, %v2602_v49 }
0x183a   :  { %v2604_v37 = vmul.f32 0.5, %v2603_v36 }
0x183c   :  { %v2605_v40 = vsub.f32 1.5, %v2604_v37  ;;  %v3010_v37 = vld [vmem:[%s4300_s11 + $0x18] sm:$0x1] }
0x183e   :  { %v2606_v42 = vmul.f32 %v3275_v47, %v2605_v40 }
0x1840   :  { %v2610_v44 = vsel %vm2609_vm4, %v3275_v47, %v2606_v42 }
0x1841   :  { %v2612_v45 = vrot.slane %v2610_v44, 3 }
0x1843   :  { %v2614_v51 = vmul.f32 %v3957_v62, %v2612_v45 }
0x1845   :  { %v2619_v52 = vrot.slane %v2614_v51, 5  ;;  %v2615_v56 = vperm.slane %v2614_v51, 5 }
0x1847   :  { %v2621_v55 = vmul.f32 %v2619_v52, %v2596_v28  ;;  %v2616_v59 = vmul.f32 %v2615_v56, %v2552_v26  ;;  %v2617_v1 = vmul.f32 %v2615_v56, %v2553_v21  ;;  %v2783_v28 = vld [vmem:[%s4299_s10] sm:$0xff] }
0x1849   :  { %v2623_v57 = vrot.slane %v2621_v55, 2 }
0x184b   :  { %v2625_v58 = vsub.f32 %v3957_v62, %v2623_v57  ;;  %v2817_v57 = vld [vmem:[%s4291_s2] sm:$0x3]  ;;  %s3313_s2 = smov [#allocation2]  }
0x184d   :  { %v2626_v60 = vperm.slane %v2625_v58, 6 }
0x184f   :  { %v2627_v61 = vadd.f32 %v2626_v60, %v2616_v59  ;;  %v2628_v2 = vadd.f32 %v2626_v60, %v2617_v1 }
0x1851   :  { %v2629_v63 = vadd.f32 %v2627_v61, %v3968_v16  ;;  %v2630_v6 = vadd.f32 %v2628_v2, %v3970_v17  ;;  %v3157_v16 = vld [vmem:[%s4298_s9 + $0x40] sm:$0xff] }
0x1852   :  { %2698 = vmatpush.msra.mxu2 %v3157_v16 }
0x1853   :  { %3155 = vmatmul.msk.f32.vlgmr.msrb.gmra.mxu0 %vm90_vm1, %v2629_v63 }
0x185b   :  { %3156 = vmatmul.msk.f32.gmra.mxu0 %vm90_vm1, %v2630_v6 }
0x18d0   :  { %v2660_v17 = vpop.f32.mrf.mxu0 }
0x18d1   :  { %v2661_v3 = vadd.f32 %v2660_v17, %v2636_v0 }
0x18d3   :  { %v2666_v9 = vmax.f32 %v2661_v3, 0.0 }
0x18d5   :  { %3165 = vmatmul.msk.f32.vlgmr.msra.gmra.mxu2 %vm1329_vm9, %v2666_v9 }
0x18d8   :  { %v2663_v4 = vpop.f32.mrf.mxu0 }
0x18d9   :  { %v2664_v12 = vadd.f32 %v2663_v4, %v2636_v0 }
0x18db   :  { %v2667_v5 = vmax.f32 %v2664_v12, 0.0 }
0x18dd   :  { %3166 = vmatmul.msk.f32.gmra.mxu2 %vm1329_vm9, %v2667_v5 }
0x1958   :  { %v2700_v13 = vpop.f32.mrf.mxu2 }
0x1959   :  { %v2706_v18 = vadd.f32 %v2700_v13, %v2629_v63 }
0x195b   :  { %v2709_v46 = vadd.f32 %v2708_v19, %v2706_v18 }
0x195d   :  { %v2731_v25 = vmul.f32 %v2709_v46, %v2709_v46 }
0x1960   :  { %v2703_v14 = vpop.f32.mrf.mxu2 }
0x1961   :  { %v2707_v54 = vadd.f32 %v2703_v14, %v2630_v6 }
0x1963   :  { %v2710_v48 = vadd.f32 %v2708_v19, %v2707_v54 }
0x1965   :  { %v2732_v20 = vmul.f32 %v2710_v48, %v2710_v48  ;;  %2725 = vmatpush.msra.mxu3 %v2710_v48 }
0x1967   :  { %2726 = vmatpush.msra.mxu3 %v2709_v46  ;;  %2747 = vmatpush.msra.mxu1 %v2732_v20 }
0x1968   :  { %3167 = vmatmul.msk.f32.vlgmr.msra.gmra.mxu3 %vm120_vm2, %v3311_v30 }
0x1969   :  { %2748 = vmatpush.msra.mxu1 %v2731_v25  ;;  %2806 = vmatpush.msrb.mxu3 %v2786_v22 }
0x196a   :  { %3168 = vmatmul.msk.f32.vlgmr.msra.gmra.mxu1 %vm120_vm2, %v3311_v30 }
0x196b   :  { %2807 = vmatpush.msrb.mxu3 %v2785_v24 }
0x196d   :  { %2808 = vmatpush.msrb.mxu3 %v2784_v27 }
0x196f   :  { %2809 = vmatpush.msrb.mxu3 %v2783_v28 }
0x19e7   :  { %v2750_v11 = vpop.f32.mrf.mxu1 }
0x19e8   :  { %v2754_v21 = vmul.f32 0.0625, %v2750_v11 }
0x19eb   :  { %v2728_v53 = vpop.f32.mrf.mxu3 }
0x19ec   :  { %v2753_v26 = vmul.f32 0.0625, %v2728_v53 }
0x19ee   :  { %v2755_v23 = vmul.f32 %v2753_v26, %v2753_v26 }
0x19f0   :  { %v2756_v30 = vsub.f32 %v2754_v21, %v2755_v23 }
0x19f2   :  { %v2757_v29 = vadd.f32 1e-05, %v2756_v30 }
0x19f4   :  { %3276 = vrsqrt.f32 %v2757_v29  ;;  %vm2764_vm6 = vweird.f32 %v2757_v29 }
0x19fa   :  { %v3277_v10 = vpop.eup %3276 }
0x19fb   :  { %v2759_v31 = vmul.f32 %v3277_v10, %v2757_v29  ;;  %vm2765_vm5 = vweird.f32 %v3277_v10 }
0x19fc   :  { %vm2766_vm7 = vmor %vm2764_vm6, %vm2765_vm5 }
0x19fd   :  { %v2760_v32 = vmul.f32 %v3277_v10, %v2759_v31 }
0x19ff   :  { %v2761_v15 = vmul.f32 0.5, %v2760_v32 }
0x1a01   :  { %v2762_v33 = vsub.f32 1.5, %v2761_v15 }
0x1a03   :  { %v2763_v34 = vmul.f32 %v3277_v10, %v2762_v33 }
0x1a05   :  { %v2767_v35 = vsel %vm2766_vm7, %v3277_v10, %v2763_v34 }
0x1a06   :  { %v2769_v47 = vrot.slane %v2767_v35, 1 }
0x1a08   :  { %v2771_v49 = vmul.f32 %v3957_v62, %v2769_v47  ;;  %v3284_v62 = vld [vmem:[%s4301_s12] sm:$0x3]  ;;  %s2860_s12 = sshll.u32 %s3313_s2, 4  ;;  %s2861_s12 = int_to_ptr.vmem [resolvable:$true] %s2860_s12 }
0x1a09   :  { %v2787_v51 = vperm.slane %v3284_v62, 1 }
0x1a0a   :  { %v2776_v36 = vrot.slane %v2771_v49, 7  ;;  %v2772_v38 = vperm.slane %v2771_v49, 7 }
0x1a0c   :  { %v2778_v39 = vmul.f32 %v2776_v36, %v2753_v26  ;;  %v2773_v41 = vmul.f32 %v2772_v38, %v2709_v46  ;;  %v2774_v44 = vmul.f32 %v2772_v38, %v2710_v48 }
0x1a0e   :  { %v2779_v40 = vsub.f32 %v3010_v37, %v2778_v39 }
0x1a10   :  { %v2780_v42 = vperm.slane %v2779_v40, 0 }
0x1a12   :  { %v2781_v43 = vadd.f32 %v2780_v42, %v2773_v41  ;;  %v2782_v45 = vadd.f32 %v2780_v42, %v2774_v44 }
0x1a14   :  { %3169 = vmatmul.msk.f32.vlgmr.msrb.gmra.mxu3 %vm90_vm1, %v2781_v43 }
0x1a1c   :  { %3170 = vmatmul.msk.f32.gmra.mxu3 %vm90_vm1, %v2782_v45 }
0x1a97   :  { %v2811_v50 = vpop.f32.mrf.mxu3 }
0x1a98   :  { %v2812_v56 = vadd.f32 %v2811_v50, %v2787_v51 }
0x1a9f   :  { %v2814_v52 = vpop.f32.mrf.mxu3 }
0x1aa0   :  { %v2815_v55 = vadd.f32 %v2814_v52, %v2787_v51 }
0x1aa2   :  { %2835 = vmatpush.msrb.mxu1 %v2815_v55 }
0x1aa4   :  { %2836 = vmatpush.msrb.mxu1 %v2812_v56 }
0x1aa5   :  { %3171 = vmatmul.msk.f32.vlgmr.msrb.gmra.mxu1 %vm120_vm2, %v2817_v57 }
0x1b22   :  { %v2838_v58 = vpop.f32.mrf.mxu1 }
0x1b23   :  { %v2842_v59 = vsel %vm2841_vm8, %v2838_v58, -inf }
0x1b24   :  { %2843 = vmax.xlane.f32.xlu2 %v2842_v59 }
0x1b97   :  { %v2844_v60 = vpop.xlane.xlu2 %2843 }
0x1b98   :  { %v2845_v61 = vsub.f32 %v2838_v58, %v2844_v60 }
0x1b9a   :  { %v2846_v63 = vmul.f32 1.442695, %v2845_v61 }
0x1b9c   :  { %3278 = vpow2.f32 %v2846_v63 }
0x1ba2   :  { %v3279_v1 = vpop.eup %3278 }
0x1ba3   :  { %v2848_v2 = vsel %vm2841_vm8, %v3279_v1, 0.0 }
0x1ba4   :  { %2849 = vadd.xlane.f32.xlu1 %v2848_v2 }
0x1c17   :  { %v2850_v6 = vpop.xlane.xlu1 %2849 }
0x1c18   :  { %3280 = vlog2.f32 %v2850_v6 }
0x1c1e   :  { %v3281_v7 = vpop.eup %3280 }
0x1c1f   :  { %v2852_v8 = vmul.f32 0.6931472, %v3281_v7 }
0x1c21   :  { %v2853_v16 = vsub.f32 %v2845_v61, %v2852_v8 }
0x1c23   :  { %2854 = vst.msk [vmem:[#allocation2] sm:$0x3] %vm2841_vm8, %v2853_v16 }
0x1c24   :  { %2865 = dma.vmem_to_hbm [thread:$0]  %s2861_s12, 32, %s2863_s16, [#allocation3]  }
0x1c25   :  { %3309 = dma.done.wait [#allocation3], 32  }
0x1c26   :  { %3310 = vsyncadd [#allocation3], 4294967264 }
0x1c27   :  { %2870 = vsyncpa [#allocation3], 1 }

</bundles_post_ra>
